<compile_context>
chip_gen: v6e
topology: v6e:2x2x1
jax: 0.10.0
libtpu: 0.0.40
codegen_flags: <defaults>
</compile_context>

<pallas_src>
import jax
import jax.numpy as jnp
from jax.experimental import pallas as pl
from jax.experimental.pallas import tpu as pltpu


def _attn_pool_kernel(x_ref, m_ref, w1_ref, b1_ref, w2_ref, b2_ref, out_ref):
    # x_ref : (bb, C, T) f32      m_ref : (bb, 1, T) f32 (exact 0/1)
    # w1_ref: (MID, C)  bf16      b1_ref: (MID, 1) f32
    # w2_ref: (C, MID)  bf16      b2_ref: (C, 1)   f32
    # out_ref: (bb, 2*C) f32  ([:, :C] = mu, [:, C:] = sg)
    bb, c, _ = x_ref.shape
    mid = w1_ref.shape[0]

    x = x_ref[...]                                   # (bb, C, T) f32
    m = m_ref[...]                                   # (bb, 1, T) f32

    # attention = Conv1d(C,128,1) -> Tanh -> Conv1d(128,C,1).  kernel_size=1
    # convs == batched matmuls contracting over channels; bf16 MXU operands
    # with f32 accumulation; weights broadcast over the (small) batch dim.
    w1b = jnp.broadcast_to(w1_ref[...], (bb, mid, c))          # (bb, MID, C) bf16
    h = jnp.einsum("bmc,bct->bmt", w1b, x.astype(jnp.bfloat16),
                   preferred_element_type=jnp.float32)         # (bb, MID, T) f32
    h = jnp.tanh(h + b1_ref[...])
    w2b = jnp.broadcast_to(w2_ref[...], (bb, c, mid))          # (bb, C, MID) bf16
    a = jnp.einsum("bcm,bmt->bct", w2b, h.astype(jnp.bfloat16),
                   preferred_element_type=jnp.float32)         # (bb, C, T) f32
    a = a + b2_ref[...]

    # masked_fill(mask == 0, -1e9) then softmax over time (the lane axis).
    a = jnp.where(m == 0.0, jnp.float32(-1e9), a)
    a = a - jnp.max(a, axis=-1, keepdims=True)
    e = jnp.exp(a)
    wgt = e * pl.reciprocal(jnp.sum(e, axis=-1, keepdims=True), approx=True)

    # asp_encoder: attentive mean / std pooling over time, all rows at once.
    len_ = jnp.sum(m, axis=-1)                       # (bb, 1)
    inv_len = 1.0 / len_                             # exact divide (one per row)
    p = wgt * m                                      # (bb, C, T)
    xp = x * p
    mu = jnp.sum(xp, axis=-1) * inv_len              # (bb, C)
    sg = jnp.sum(x * xp, axis=-1) * inv_len          # (bb, C)
    sg = jnp.sqrt(jnp.maximum(sg - mu * mu, 1e-5))

    # Two block-wide stores (whole tile each) instead of per-row masked stores.
    out_ref[:, :c] = mu
    out_ref[:, c:] = sg


def _choose_block_b(batch, seq, *, max_rows=4096):
    """Batch rows per grid step.

    Constraints: B % bb == 0 and (bb % 8 == 0 or bb == B) so the (bb, 2C)
    output block is sublane-aligned.  Preference: the largest tile such that
    bb*T <= max_rows (keeps the dominant f32 intermediate, bb*128*T bytes*4,
    to a few MiB -- safe for v7x's 32 MiB scoped VMEM) while keeping >= 4
    grid steps if possible (v7x: 2 TensorCores x >= 2 steps each), else >= 2.
    """
    cands = [bb for bb in range(1, batch + 1)
             if batch % bb == 0 and (bb % 8 == 0 or bb == batch)]
    for min_steps in (4, 2, 1):
        good = [bb for bb in cands
                if batch // bb >= min_steps and bb * seq <= max_rows]
        if good:
            return max(good)
    return min(cands)


def attention_pooling(x, mask, w1, b1, w2, b2, *, block_b=None):
    """Pallas forward of AttentionPooling.

    x    : (B, C, T) float  -- PyTorch NCW layout
    mask : (B, 1, T) float/bool (nonzero = valid)
    w1   : (128, C) = Conv1d(C, 128, 1).weight[:, :, 0]
    b1   : (128,)   = Conv1d(C, 128, 1).bias
    w2   : (C, 128) = Conv1d(128, C, 1).weight[:, :, 0]
    b2   : (C,)     = Conv1d(128, C, 1).bias
    Returns (B, 2*C) float32 == torch.cat((mu, sg), dim=1).
    """
    B, C, T = x.shape
    MID = w1.shape[0]

    bb = block_b if block_b is not None else _choose_block_b(B, T)
    if B % bb != 0 or not (bb % 8 == 0 or bb == B):
        bb = B                                   # full-dim blocks are always legal

    x = x.astype(jnp.float32)
    m = mask.astype(jnp.float32)
    # bf16 MXU operands; biases stay f32 (added post-matmul in f32).
    w1b = w1.astype(jnp.bfloat16)
    w2b = w2.astype(jnp.bfloat16)
    b1c = jnp.reshape(b1, (MID, 1)).astype(jnp.float32)
    b2c = jnp.reshape(b2, (C, 1)).astype(jnp.float32)

    return pl.pallas_call(
        _attn_pool_kernel,
        out_shape=jax.ShapeDtypeStruct((B, 2 * C), jnp.float32),
        grid_spec=pltpu.PrefetchScalarGridSpec(
            num_scalar_prefetch=0,
            grid=(B // bb,),
            in_specs=[
                pl.BlockSpec((bb, C, T), lambda i: (i, 0, 0)),   # x  (native NCW)
                pl.BlockSpec((bb, 1, T), lambda i: (i, 0, 0)),   # mask (native)
                pl.BlockSpec((MID, C), lambda i: (0, 0)),        # w1 (resident)
                pl.BlockSpec((MID, 1), lambda i: (0, 0)),        # b1
                pl.BlockSpec((C, MID), lambda i: (0, 0)),        # w2
                pl.BlockSpec((C, 1), lambda i: (0, 0)),          # b2
            ],
            out_specs=pl.BlockSpec((bb, 2 * C), lambda i: (i, 0)),
        ),
        compiler_params=pltpu.CompilerParams(
            dimension_semantics=("parallel",)),    # batch axis shards over TCs on v7x
    )(x, m, w1b, b1c, w2b, b2c)


def _reference(x, mask, w1, b1, w2, b2):
    """Pure-JAX f32 reference mirroring the PyTorch forward (for verification)."""
    x = x.astype(jnp.float32)                       # (B, C, T)
    m = mask.astype(jnp.float32)                    # (B, 1, T)
    h = jnp.tanh(jnp.einsum("mc,bct->bmt", w1, x) + b1[None, :, None])
    a = jnp.einsum("cm,bmt->bct", w2, h) + b2[None, :, None]
    a = jnp.where(m == 0.0, -1e9, a)
    w = jax.nn.softmax(a, axis=2)
    len_ = jnp.sum(m, axis=2)                       # (B, 1)
    mu = jnp.sum(x * w * m, axis=2) / len_
    sg = jnp.sum(x * x * w * m, axis=2) / len_
    sg = jnp.sqrt(jnp.maximum(sg - mu * mu, 1e-5))
    return jnp.concatenate([mu, sg], axis=1)


if __name__ == "__main__":
    # hidden_channels=32, MID=128 fixed by the module; small B/T demo shapes.
    B, C, T, MID = 16, 32, 64, 128

    key = jax.random.PRNGKey(0)
    k_x, k_len, k_w1, k_b1, k_w2, k_b2 = jax.random.split(key, 6)

    # Conv1d kernel_size=1 weights, stored with the kernel dim squeezed.
    w1 = jax.random.normal(k_w1, (MID, C), jnp.float32) * 0.1   # Conv1d(C,128,1).weight[:,:,0]
    b1 = jax.random.normal(k_b1, (MID,), jnp.float32) * 0.1
    w2 = jax.random.normal(k_w2, (C, MID), jnp.float32) * 0.1   # Conv1d(128,C,1).weight[:,:,0]
    b2 = jax.random.normal(k_b2, (C,), jnp.float32) * 0.1

    # Inputs in PyTorch NCW layout; mask (B, 1, T) with ragged valid lengths.
    x = jax.random.normal(k_x, (B, C, T), jnp.float32)
    lengths = jax.random.randint(k_len, (B,), 1, T + 1)
    mask = (jnp.arange(T)[None, None, :] < lengths[:, None, None]).astype(jnp.float32)

    pooled = attention_pooling(x, mask, w1, b1, w2, b2)
    pooled = jax.block_until_ready(pooled)

    ref = _reference(x, mask, w1, b1, w2, b2)
    assert pooled.shape == (B, 2 * C)
    # 2e-2 tolerance: the kernel runs the two conv matmuls with bf16 MXU
    # operands (f32 accumulation) and uses an approximate EUP reciprocal for
    # the softmax denominator; everything else is f32-exact up to reduction
    # reassociation.
    err = jnp.max(jnp.abs(pooled - ref))
    assert jnp.allclose(pooled, ref, rtol=2e-2, atol=2e-2), f"mismatch vs reference: {err}"

    print("KERNEL_OK")
</pallas_src>

<mosaic_0001>
module attributes {stable_mosaic.version = 11 : i64} {
  func.func @_attn_pool_kernel(%arg0: i32, %arg1: memref<8x32x64xf32, #tpu.memory_space<vmem>>, %arg2: memref<8x1x64xf32, #tpu.memory_space<vmem>>, %arg3: memref<128x32xbf16, #tpu.memory_space<vmem>>, %arg4: memref<128x1xf32, #tpu.memory_space<vmem>>, %arg5: memref<32x128xbf16, #tpu.memory_space<vmem>>, %arg6: memref<32x1xf32, #tpu.memory_space<vmem>>, %arg7: memref<8x64xf32, #tpu.memory_space<vmem>>) attributes {dimension_semantics = [#tpu.dimension_semantics<parallel>], iteration_bounds = array<i64: 2>, scalar_prefetch = 0 : i64, scratch_operands = 0 : i64, tpu.core_type = #tpu.core_type<tc>, window_params = [{transform_indices = @transform_0, window_bounds = array<i64: 8, 32, 64>}, {transform_indices = @transform_1, window_bounds = array<i64: 8, 1, 64>}, {pipeline_mode = #tpu.pipeline_mode<synchronous>, transform_indices = @transform_2, window_bounds = array<i64: 128, 32>}, {pipeline_mode = #tpu.pipeline_mode<synchronous>, transform_indices = @transform_3, window_bounds = array<i64: 128, 1>}, {pipeline_mode = #tpu.pipeline_mode<synchronous>, transform_indices = @transform_4, window_bounds = array<i64: 32, 128>}, {pipeline_mode = #tpu.pipeline_mode<synchronous>, transform_indices = @transform_5, window_bounds = array<i64: 32, 1>}, {transform_indices = @transform_6, window_bounds = array<i64: 8, 64>}]} {
    %c0 = arith.constant 0 : index
    %c0_0 = arith.constant 0 : index
    %c0_1 = arith.constant 0 : index
    %0 = vector.load %arg1[%c0, %c0_0, %c0_1] : memref<8x32x64xf32, #tpu.memory_space<vmem>>, vector<8x32x64xf32>
    %c0_2 = arith.constant 0 : index
    %c0_3 = arith.constant 0 : index
    %c0_4 = arith.constant 0 : index
    %1 = vector.load %arg2[%c0_2, %c0_3, %c0_4] : memref<8x1x64xf32, #tpu.memory_space<vmem>>, vector<8x1x64xf32>
    %c0_5 = arith.constant 0 : index
    %c0_6 = arith.constant 0 : index
    %2 = vector.load %arg3[%c0_5, %c0_6] : memref<128x32xbf16, #tpu.memory_space<vmem>>, vector<128x32xbf16>
    %3 = vector.shape_cast %2 : vector<128x32xbf16> to vector<1x128x32xbf16>
    %4 = vector.broadcast %3 : vector<1x128x32xbf16> to vector<8x128x32xbf16>
    %5 = arith.truncf %0 : vector<8x32x64xf32> to vector<8x32x64xbf16>
    "tpu.trace_start"() <{level = 10 : i32, message = "bmc,bct->bmt"}> : () -> ()
    %cst = arith.constant dense<0.000000e+00> : vector<8x128x64xf32>
    %6 = tpu.matmul %4, %5, %cst {dimension_numbers = #tpu.dot_dimension_numbers<[2], [1], [1], [2], [0, 0, 0, 1, 1, 2], [0], [0]>} : vector<8x128x32xbf16>, vector<8x32x64xbf16>, vector<8x128x64xf32> -> vector<8x128x64xf32>
    "tpu.trace_stop"() : () -> ()
    %c0_7 = arith.constant 0 : index
    %c0_8 = arith.constant 0 : index
    %7 = vector.load %arg4[%c0_7, %c0_8] : memref<128x1xf32, #tpu.memory_space<vmem>>, vector<128x1xf32>
    %8 = vector.shape_cast %7 : vector<128x1xf32> to vector<1x128x1xf32>
    %9 = vector.broadcast %8 : vector<1x128x1xf32> to vector<8x128x64xf32>
    %10 = arith.addf %6, %9 : vector<8x128x64xf32>
    %11 = math.tanh %10 : vector<8x128x64xf32>
    %c0_9 = arith.constant 0 : index
    %c0_10 = arith.constant 0 : index
    %12 = vector.load %arg5[%c0_9, %c0_10] : memref<32x128xbf16, #tpu.memory_space<vmem>>, vector<32x128xbf16>
    %13 = vector.shape_cast %12 : vector<32x128xbf16> to vector<1x32x128xbf16>
    %14 = vector.broadcast %13 : vector<1x32x128xbf16> to vector<8x32x128xbf16>
    %15 = arith.truncf %11 : vector<8x128x64xf32> to vector<8x128x64xbf16>
    "tpu.trace_start"() <{level = 10 : i32, message = "bcm,bmt->bct"}> : () -> ()
    %cst_11 = arith.constant dense<0.000000e+00> : vector<8x32x64xf32>
    %16 = tpu.matmul %14, %15, %cst_11 {dimension_numbers = #tpu.dot_dimension_numbers<[2], [1], [1], [2], [0, 0, 0, 1, 1, 2], [0], [0]>} : vector<8x32x128xbf16>, vector<8x128x64xbf16>, vector<8x32x64xf32> -> vector<8x32x64xf32>
    "tpu.trace_stop"() : () -> ()
    %c0_12 = arith.constant 0 : index
    %c0_13 = arith.constant 0 : index
    %17 = vector.load %arg6[%c0_12, %c0_13] : memref<32x1xf32, #tpu.memory_space<vmem>>, vector<32x1xf32>
    %18 = vector.shape_cast %17 : vector<32x1xf32> to vector<1x32x1xf32>
    %19 = vector.broadcast %18 : vector<1x32x1xf32> to vector<8x32x64xf32>
    %20 = arith.addf %16, %19 : vector<8x32x64xf32>
    %cst_14 = arith.constant 0.000000e+00 : f32
    %21 = vector.broadcast %cst_14 : f32 to vector<8x1x64xf32>
    %22 = arith.cmpf oeq, %1, %21 : vector<8x1x64xf32>
    %cst_15 = arith.constant -1.000000e+09 : f32
    %23 = vector.shape_cast %22 : vector<8x1x64xi1> to vector<8x1x64xi1>
    %24 = vector.broadcast %23 : vector<8x1x64xi1> to vector<8x32x64xi1>
    %25 = vector.broadcast %cst_15 : f32 to vector<8x32x64xf32>
    %26 = arith.select %24, %25, %20 : vector<8x32x64xi1>, vector<8x32x64xf32>
    %cst_16 = arith.constant dense<0xFF800000> : vector<8x32xf32>
    %27 = vector.multi_reduction <maximumf>, %26, %cst_16 [2] : vector<8x32x64xf32> to vector<8x32xf32>
    %28 = vector.shape_cast %27 : vector<8x32xf32> to vector<8x32x1xf32>
    %29 = vector.broadcast %28 : vector<8x32x1xf32> to vector<8x32x64xf32>
    %30 = arith.subf %26, %29 : vector<8x32x64xf32>
    %31 = math.exp %30 : vector<8x32x64xf32>
    %cst_17 = arith.constant dense<0.000000e+00> : vector<8x32xf32>
    %32 = vector.multi_reduction <add>, %31, %cst_17 [2] : vector<8x32x64xf32> to vector<8x32xf32>
    %33 = vector.shape_cast %32 : vector<8x32xf32> to vector<8x32x1xf32>
    %34 = tpu.reciprocal %33 {approx = true} : vector<8x32x1xf32> -> vector<8x32x1xf32>
    %35 = vector.broadcast %34 : vector<8x32x1xf32> to vector<8x32x64xf32>
    %36 = arith.mulf %31, %35 : vector<8x32x64xf32>
    %cst_18 = arith.constant dense<0.000000e+00> : vector<8x1xf32>
    %37 = vector.multi_reduction <add>, %1, %cst_18 [2] : vector<8x1x64xf32> to vector<8x1xf32>
    %cst_19 = arith.constant 1.000000e+00 : f32
    %38 = vector.broadcast %cst_19 : f32 to vector<8x1xf32>
    %39 = arith.divf %38, %37 : vector<8x1xf32>
    %40 = vector.broadcast %1 : vector<8x1x64xf32> to vector<8x32x64xf32>
    %41 = arith.mulf %36, %40 : vector<8x32x64xf32>
    %42 = arith.mulf %0, %41 : vector<8x32x64xf32>
    %cst_20 = arith.constant dense<0.000000e+00> : vector<8x32xf32>
    %43 = vector.multi_reduction <add>, %42, %cst_20 [2] : vector<8x32x64xf32> to vector<8x32xf32>
    %44 = vector.broadcast %39 : vector<8x1xf32> to vector<8x32xf32>
    %45 = arith.mulf %43, %44 : vector<8x32xf32>
    %46 = arith.mulf %0, %42 : vector<8x32x64xf32>
    %cst_21 = arith.constant dense<0.000000e+00> : vector<8x32xf32>
    %47 = vector.multi_reduction <add>, %46, %cst_21 [2] : vector<8x32x64xf32> to vector<8x32xf32>
    %48 = vector.broadcast %39 : vector<8x1xf32> to vector<8x32xf32>
    %49 = arith.mulf %47, %48 : vector<8x32xf32>
    %50 = arith.mulf %45, %45 : vector<8x32xf32>
    %51 = arith.subf %49, %50 : vector<8x32xf32>
    %cst_22 = arith.constant 9.99999974E-6 : f32
    %52 = vector.broadcast %cst_22 : f32 to vector<8x32xf32>
    %53 = arith.maximumf %51, %52 : vector<8x32xf32>
    %54 = math.sqrt %53 : vector<8x32xf32>
    %c0_23 = arith.constant 0 : index
    %c0_24 = arith.constant 0 : index
    %55 = vector.load %arg7[%c0_23, %c0_24] : memref<8x64xf32, #tpu.memory_space<vmem>>, vector<8x32xf32>
    tpu.vector_store %arg7[%c0_23, %c0_24], %45 {strides = array<i32>} : memref<8x64xf32, #tpu.memory_space<vmem>>, vector<8x32xf32>,
    %c0_25 = arith.constant 0 : index
    %c32 = arith.constant 32 : index
    %56 = vector.load %arg7[%c0_25, %c32] : memref<8x64xf32, #tpu.memory_space<vmem>>, vector<8x32xf32>
    tpu.vector_store %arg7[%c0_25, %c32], %54 {strides = array<i32>} : memref<8x64xf32, #tpu.memory_space<vmem>>, vector<8x32xf32>,
    return
  }
  func.func @transform_0(%arg0: i32) -> (i32, i32, i32) {
    %c0_i32 = arith.constant 0 : i32
    %c0_i32_0 = arith.constant 0 : i32
    %c0_i32_1 = arith.constant 0 : i32
    return %arg0, %c0_i32, %c0_i32_0 : i32, i32, i32
  }
  func.func @transform_1(%arg0: i32) -> (i32, i32, i32) {
    %c0_i32 = arith.constant 0 : i32
    %c0_i32_0 = arith.constant 0 : i32
    %c0_i32_1 = arith.constant 0 : i32
    return %arg0, %c0_i32, %c0_i32_0 : i32, i32, i32
  }
  func.func @transform_2(%arg0: i32) -> (i32, i32) {
    %c0_i32 = arith.constant 0 : i32
    %c0_i32_0 = arith.constant 0 : i32
    %c0_i32_1 = arith.constant 0 : i32
    return %c0_i32, %c0_i32_0 : i32, i32
  }
  func.func @transform_3(%arg0: i32) -> (i32, i32) {
    %c0_i32 = arith.constant 0 : i32
    %c0_i32_0 = arith.constant 0 : i32
    %c0_i32_1 = arith.constant 0 : i32
    return %c0_i32, %c0_i32_0 : i32, i32
  }
  func.func @transform_4(%arg0: i32) -> (i32, i32) {
    %c0_i32 = arith.constant 0 : i32
    %c0_i32_0 = arith.constant 0 : i32
    %c0_i32_1 = arith.constant 0 : i32
    return %c0_i32, %c0_i32_0 : i32, i32
  }
  func.func @transform_5(%arg0: i32) -> (i32, i32) {
    %c0_i32 = arith.constant 0 : i32
    %c0_i32_0 = arith.constant 0 : i32
    %c0_i32_1 = arith.constant 0 : i32
    return %c0_i32, %c0_i32_0 : i32, i32
  }
  func.func @transform_6(%arg0: i32) -> (i32, i32) {
    %c0_i32 = arith.constant 0 : i32
    %c0_i32_0 = arith.constant 0 : i32
    return %arg0, %c0_i32 : i32, i32
  }
}

</mosaic_0001>

<bundles_post_ra>
// kernel: tpu_custom_call.1
= control target key start
LH: loop header
LB: loop body
LE: loop exit
PB: predicated region body
PF: predicated region fallthrough
CT: control target
= control target key end

     0   :  { %11 = vsyncpa [#allocation3], 0  ;;  %s7269_s0 = inlined_call_operand.hbm [shape: f32[16,32,64], index: 0, kind: input, shape index: {}]   ;;  %s7270_s1 = inlined_call_operand.vmem [shape: f32[16,1,64], index: 1, kind: input, shape index: {}]   ;;  %s7271_s2 = inlined_call_operand.vmem [shape: bf16[128,32], index: 2, kind: input, shape index: {}]   ;;  %s7272_s3 = inlined_call_operand.vmem [shape: f32[128,1], index: 3, kind: input, shape index: {}]   ;;  %s7273_s4 = inlined_call_operand.vmem [shape: bf16[32,128], index: 4, kind: input, shape index: {}]   ;;  %s7274_s5 = inlined_call_operand.vmem [shape: f32[32,1], index: 5, kind: input, shape index: {}]   ;;  %s7275_s6 = inlined_call_operand.hbm [shape: f32[16,64], index: 6, kind: output, shape index: {}]  }
   0x1   :  { %13 = vsyncpa [#allocation3 + $0x1], 0 }
   0x2   :  { %14 = vsyncpa [#allocation4], 0 }
   0x3   :  { %16 = vsyncpa [#allocation4 + $0x1], 0  ;;  %s4936_s21 = smov 0   ;;  %s4938_s22 = smov 0  }
   0x4   :  { %s4940_s23 = smov 0   ;;  %s4942_s24 = smov 0  }
   0x5 LB: > { %s4957_s25 = sadd.s32 4294967295, %s4894_s24   ;;  %s3661_s26 = sadd.s32 4294967294, %s4894_s24   ;;  %s4894_s24 = sphi %s4942_s24, %s7317_s24   ;;  %s4890_s23 = sphi %s4940_s23, %s7316_s23   ;;  %s4886_s22 = sphi %s4938_s22, %s7315_s22   ;;  %s4882_s21 = sphi %s4936_s21, %s7314_s21  }
   0x6   : > { %s4961_s27 = sadd.s32 1, %s4894_s24   ;;  %s29_s28 = sadd.s32 1, %s4890_s23 }
   0x7   : > { %s26_s29 = ssub.s32 %s4894_s24, %s4961_s27  ;;  %p36_p0 = scmp.ne.s32.totalorder %s4890_s23, %s4886_s22 }
   0x8   : > { %p27_p1 = scmp.eq.s32.totalorder %s26_s29, 0  ;;  %p37_p2 = scmp.eq.s32.totalorder %s4894_s24, 0 }
   0x9   : > { %p42_p3 = scmp.ne.s32.totalorder %s4886_s22, %s4882_s21  ;;  %p43_p4 = scmp.eq.s32.totalorder %s4957_s25, 0 }
   0xa   : > { %s4973_s30 = scalar_select %p27_p1, %s4890_s23, %s29_s28  }
   0xb   : > { %p4975_p5 = por %p37_p2, %p36_p0  ;;  %p4979_p6 = por %p43_p4, %p42_p3 }
   0xc   : > { %p176_p7 = scmp.eq.s32.totalorder %s4957_s25, 1  ;;  %p182_p8 = scmp.eq.s32.totalorder %s3661_s26, 1 }
   0xd   : > { %s7285_s8 = scalar_select %p4979_p6, 1, 0 }
   0xe   : > { %p4244_p10 = scmp.lt.s32.totalorder %s4894_s24, 2  ;;  %p4986_p11 = por %p176_p7, %p36_p0 }
   0xf   : > { %p4990_p12 = por %p182_p8, %p42_p3  ;;  %s214_s11 = sand.u32 1, %s4890_s23  }
  0x10   : > { %s7286_s9 = scalar_select %p4986_p11, 1, 0 }
  0x11   : > { %s7287_s10 = scalar_select %p4990_p12, 1, 0 }
  0x12   : > { %s3751_s12 = sshll.u32 %s4894_s24, 12  ;;  %s3664_s13 = sshll.u32 %s214_s11, 8 }
  0x13   : > { %s4999_s16 = scalar_lea.hbm %s7269_s0, %s3751_s12  ;;  %s218_s17 = scalar_lea.vmem [#allocation2], %s3664_s13 }
  0x14   : > { %s226_s18 = sshll.u32 %s218_s17, 4  ;;  %p5003_p13 = pnand %p4244_p10, %p4975_p5  ;;  %s5007_s18 = int_to_ptr.vmem [resolvable:$true] %s226_s18 }
  0x15   : > { %s5009_s20 = scalar_lea.sflag [#allocation3], %s214_s11  ;;  %s4802_s26 = scalar_lea.hbm %s4999_s16, 4096 }
  0x16   : > { %p4803_p0 = scmp.ne.s32.totalorder %s4999_s16, %s4802_s26  ;;  %p4804_p1 = pneg %p5003_p13 }
  0x17   : > { %s4807_s12 = scalar_lea.hbm %s7269_s0, 8192  ;;  %p4808_p4 = scmp.lt.s32.totalorder %s4999_s16, %s7269_s0 }
  0x18   : > { %p4805_p2 = pnand %p4804_p1, %p4803_p0  ;;  %p4809_p5 = scmp.lt.s32.totalorder %s4807_s12, %s4802_s26 }
  0x1a   : > { %p4806_p3 = pneg %p4805_p2  ;;  %p4810_p7 = por %p4809_p5, %p4808_p4 }
  0x1c   : > { %p4811_p8 = pnand %p4810_p7, %p4806_p3 }
  0x1e   : > { %4814 = shalt.err (!%p4811_p8)
}
  0x1f   : > { %s4815_s11 = scalar_lea.vmem %s5007_s18, 4096  ;;  %s4896_s14 = smov [#allocation2]  }
  0x20   : > { %p4816_p10 = scmp.ne.s32.totalorder %s5007_s18, %s4815_s11  ;;  %s4820_s15 = sshll.u32 %s4896_s14, 4  ;;  %s4821_s15 = int_to_ptr.vmem [resolvable:$false] %s4820_s15 }
  0x21   : > { %s4822_s17 = scalar_lea.vmem %s4821_s15, 8192  ;;  %p4823_p2 = scmp.lt.s32.totalorder %s5007_s18, %s4821_s15 }
  0x22   : > { %p4818_p9 = pnand %p4816_p10, %p4804_p1  ;;  %p4824_p12 = scmp.lt.s32.totalorder %s4822_s17, %s4815_s11 }
  0x24   : > { %p4819_p0 = pneg %p4818_p9  ;;  %p4825_p11 = por %p4824_p12, %p4823_p2 }
  0x26   : > { %p4826_p6 = pnand %p4825_p11, %p4819_p0 }
  0x28   : > { %4829 = shalt.err (!%p4826_p6)
}
  0x29   : > { %s4897_s26 = smov 128   ;;  %s4898_s28 = smov 8  }
  0x2a   : > { %4239 = dma.hbm_to_vmem [thread:$0]  (!%p5003_p13), %s4999_s16, 4096, %s5007_s18, %s5009_s20, %s4897_s26, %s4897_s26, %s4898_s28  }
  0x2b   : > { %p3668_p9 = scmp.ge.s32.totalorder %s4894_s24, 1  ;;  %p242_p1 = scmp.lt.s32.totalorder %s4894_s24, 3 }
  0x2d   : > { %p243_p3 = pnand %p3668_p9, %p242_p1 }
  0x2e   : > { %s5033_s29 = sand.u32 (!%p243_p3), 1, %s4886_s22   ;;  %p7289_p6 = scmp.ne.s32.totalorder (!%p243_p3), %s7285_s8, 0 }
  0x2f   : > { %246 = sbr.rel (%p243_p3) target bundleno = 1164 (0x48c), region = 44  ;;  %s3669_s12 = sshll.u32 (!%p243_p3), %s5033_s29, 8 }
  0x30   : > { %s249_s7 = scalar_lea.sflag (!%p243_p3), [#allocation3], %s5033_s29  ;;  %s5037_s13 = scalar_lea.vmem (!%p243_p3), [#allocation2], %s3669_s12 }
  0x34   : > { %4873 = dma.done.wait (%p7289_p6), %s249_s7, 4096  }
  0x35   : > { %4875 = vsyncadd (%p7289_p6), %s249_s7, 4294963200  ;;  %v7278_v0 = vmov 0   ;;  %v294_v1 = vld [vmem:[%s5037_s13 + $0x10] sm:$0xff]  ;;  %v295_v2 = vld [vmem:[%s5037_s13 + $0x18] sm:$0xff]  ;;  %vm7281_vm0 = vcmask 261120   ;;  %s3671_s14 = sshll.u32 %s4957_s25, 3 }
  0x36   : > { %4281 = vset.pattern.permute.xlu0 %v7278_v0  ;;  %4282 = vset.pattern.permute.xlu1 %v7278_v0  ;;  %v298_v3 = vld [vmem:[%s5037_s13 + $0x30] sm:$0xff]  ;;  %v349_v4 = vpack.c.bf16 %v295_v2, %v294_v1  ;;  %v299_v5 = vld [vmem:[%s5037_s13 + $0x38] sm:$0xff]  ;;  %v292_v6 = vld [vmem:[%s5037_s13] sm:$0xff]  ;;  %p287_p11 = scmp.lt.s32.totalorder %s3671_s14, 15  ;;  %vm2366_vm1 = vcmask 516096   ;;  %vm2013_vm6 = vcmask 523264  }
  0x37   : > { %v293_v7 = vld [vmem:[%s5037_s13 + $0x8] sm:$0xff]  ;;  %v351_v8 = vpack.c.bf16 %v299_v5, %v298_v3  ;;  %v296_v10 = vld [vmem:[%s5037_s13 + $0x20] sm:$0xff]  ;;  %v302_v14 = vld [vmem:[%s5037_s13 + $0x50] sm:$0xff]  ;;  %s3747_s18 = sshll.u32 %s4957_s25, 7  ;;  %s3569_s25 = scalar_lea.sflag [#allocation4], %s5033_s29 }
  0x38   : > { %v348_v9 = vpack.c.bf16 %v293_v7, %v292_v6  ;;  %v297_v11 = vld [vmem:[%s5037_s13 + $0x28] sm:$0xff]  ;;  %3912 = vmatprep.subr.bf16.mxu0 %v349_v4  ;;  %v5056_v13 = vld [vmem:[%s7271_s2] sm:$0xff]   ;;  %v303_v15 = vld [vmem:[%s5037_s13 + $0x58] sm:$0xff]  ;;  %s7319_s14 = smov (!%p287_p11, %s3671_s14), 15  ;;  %p7311_p13 = scmp.ne.s32.totalorder %s7286_s9, 0 }
  0x39   : > { %v350_v12 = vpack.c.bf16 %v297_v11, %v296_v10  ;;  %3932 = vmatprep.subr.bf16.mxu1 %v351_v8  ;;  %3913 = vmatpush3.bf16.msra.mxu0 %v349_v4  ;;  %v306_v16 = vld [vmem:[%s5037_s13 + $0x70] sm:$0xff]  ;;  %v307_v17 = vld [vmem:[%s5037_s13 + $0x78] sm:$0xff]  ;;  %v353_v18 = vpack.c.bf16 %v303_v15, %v302_v14  ;;  %v5069_v20 = vld [vmem:[%s7271_s2 + $0x8] sm:$0xff]   ;;  %s5482_s26 = scalar_lea.vmem %s7270_s1, %s7319_s14  ;;  %s7230_s14 = scalar_lea.hbm %s7275_s6, %s3747_s18 }
  0x3a   : > { %3933 = vmatpush3.bf16.msra.mxu1 %v351_v8  ;;  %3914 = vmatprep.subr.bf16.mxu0 %v348_v9  ;;  %v355_v19 = vpack.c.bf16 %v307_v17, %v306_v16  ;;  %v5074_v21 = vld [vmem:[%s7271_s2 + $0x10] sm:$0xff]   ;;  %v300_v22 = vld [vmem:[%s5037_s13 + $0x40] sm:$0xff]  ;;  %v301_v23 = vld [vmem:[%s5037_s13 + $0x48] sm:$0xff]  ;;  %s4900_s17 = smov [#allocation5]  }
  0x3b   : > { %3934 = vmatprep.subr.bf16.mxu1 %v350_v12  ;;  %3916 = vmatprep.mubr.msk.bf16.mxu0 %vm7281_vm0, %v5056_v13  ;;  %v304_v24 = vld [vmem:[%s5037_s13 + $0x60] sm:$0xff]  ;;  %v352_v25 = vpack.c.bf16 %v301_v23, %v300_v22  ;;  %v305_v26 = vld [vmem:[%s5037_s13 + $0x68] sm:$0xff]  ;;  %v310_v28 = vld [vmem:[%s5037_s13 + $0x90] sm:$0xff] }
  0x3c   : > { %3936 = vmatprep.mubr.msk.bf16.mxu1 %vm7281_vm0, %v5056_v13  ;;  %v354_v27 = vpack.c.bf16 %v305_v26, %v304_v24  ;;  %v311_v29 = vld [vmem:[%s5037_s13 + $0x98] sm:$0xff]  ;;  %v314_v31 = vld [vmem:[%s5037_s13 + $0xb0] sm:$0xff]  ;;  %v376_v36 = vld [vmem:[%s7272_s3 + $0x60] sm:$0xff] }
  0x3d   : > { %3915 = vmatpush3.bf16.msra.mxu0 %v348_v9  ;;  %v5090_v30 = vpack.c.bf16 %v311_v29, %v310_v28  ;;  %v315_v32 = vld [vmem:[%s5037_s13 + $0xb8] sm:$0xff]  ;;  %v378_v33 = vld [vmem:[%s7272_s3 + $0x70] sm:$0xff]  ;;  %v5110_v37 = vld [vmem:[%s7271_s2 + $0x20] sm:$0xff]   ;;  %442 = vperm.xlu1 %4282, %v376_v36  }
  0x3e   : > { %3935 = vmatpush3.bf16.msra.mxu1 %v350_v12  ;;  %3952 = vmatprep.subr.bf16.mxu0 %v353_v18  ;;  %v5100_v34 = vld [vmem:[%s7271_s2 + $0x18] sm:$0xff]   ;;  %v5102_v35 = vpack.c.bf16 %v315_v32, %v314_v31  ;;  %v377_v39 = vld [vmem:[%s7272_s3 + $0x68] sm:$0xff]  ;;  %v374_v40 = vld [vmem:[%s7272_s3 + $0x50] sm:$0xff] }
  0x3f   : > { %3972 = vmatprep.subr.bf16.mxu1 %v355_v19  ;;  %452 = vperm.xlu0 %4281, %v378_v33   ;;  %v379_v38 = vld [vmem:[%s7272_s3 + $0x78] sm:$0xff]  ;;  %v5137_v42 = vld [vmem:[%s7271_s2 + $0x28] sm:$0xff]   ;;  %v5142_v43 = vld [vmem:[%s7271_s2 + $0x30] sm:$0xff]  }
  0x40   : > { %3917 = vmatmul.mubr.msk.bf16.vlgmr.msra.gmra.mxu0 %vm7281_vm0, %v5069_v20  ;;  %v375_v41 = vld [vmem:[%s7272_s3 + $0x58] sm:$0xff]  ;;  %v372_v44 = vld [vmem:[%s7272_s3 + $0x40] sm:$0xff]  ;;  %v373_v45 = vld [vmem:[%s7272_s3 + $0x48] sm:$0xff] }
  0x41   : > { %3937 = vmatmul.mubr.msk.bf16.vlgmr.msra.gmra.mxu1 %vm7281_vm0, %v5069_v20  ;;  %3953 = vmatpush3.bf16.msra.mxu0 %v353_v18  ;;  %v370_v46 = vld [vmem:[%s7272_s3 + $0x30] sm:$0xff]  ;;  %v371_v47 = vld [vmem:[%s7272_s3 + $0x38] sm:$0xff]  ;;  %v368_v49 = vld [vmem:[%s7272_s3 + $0x20] sm:$0xff] }
  0x42   : > { %3973 = vmatpush3.bf16.msra.mxu1 %v355_v19  ;;  %3920 = vmatprep.mubr.msk.bf16.mxu0 %vm7281_vm0, %v5074_v21  ;;  %v5167_v48 = vld [vmem:[%s7271_s2 + $0x38] sm:$0xff]   ;;  %v369_v50 = vld [vmem:[%s7272_s3 + $0x28] sm:$0xff]  ;;  %v366_v51 = vld [vmem:[%s7272_s3 + $0x10] sm:$0xff] }
  0x43   : > { %3940 = vmatprep.mubr.msk.bf16.mxu1 %vm7281_vm0, %v5074_v21  ;;  %3954 = vmatprep.subr.bf16.mxu0 %v352_v25  ;;  %v367_v52 = vld [vmem:[%s7272_s3 + $0x18] sm:$0xff]  ;;  %v308_v53 = vld [vmem:[%s5037_s13 + $0x80] sm:$0xff]  ;;  %v309_v54 = vld [vmem:[%s5037_s13 + $0x88] sm:$0xff] }
  0x44   : > { %3974 = vmatprep.subr.bf16.mxu1 %v354_v27  ;;  %457 = vperm.xlu0 %4281, %v379_v38   ;;  %v312_v55 = vld [vmem:[%s5037_s13 + $0xa0] sm:$0xff]  ;;  %v313_v56 = vld [vmem:[%s5037_s13 + $0xa8] sm:$0xff]  ;;  %v356_v58 = vpack.c.bf16 %v309_v54, %v308_v53  ;;  %v318_v59 = vld [vmem:[%s5037_s13 + $0xd0] sm:$0xff] }
  0x45   : > { %3955 = vmatpush3.bf16.msra.mxu0 %v352_v25  ;;  %447 = vperm.xlu1 %4282, %v377_v39   ;;  %v364_v57 = vld [vmem:[%s7272_s3] sm:$0xff]  ;;  %v319_v60 = vld [vmem:[%s5037_s13 + $0xd8] sm:$0xff]  ;;  %v358_v61 = vpack.c.bf16 %v313_v56, %v312_v55  ;;  %v365_v62 = vld [vmem:[%s7272_s3 + $0x8] sm:$0xff] }
  0x46   : > { %3975 = vmatpush3.bf16.msra.mxu1 %v354_v27  ;;  %3992 = vmatprep.subr.bf16.mxu0 %v5090_v30  ;;  %v322_v63 = vld [vmem:[%s5037_s13 + $0xf0] sm:$0xff]  ;;  %v323_v1 = vld [vmem:[%s5037_s13 + $0xf8] sm:$0xff]  ;;  %v361_v2 = vpack.c.bf16 %v319_v60, %v318_v59  ;;  %v1497_v3 = vld [vmem:[%s7274_s5] sm:$0xff] }
  0x47   : > { %4012 = vmatprep.subr.bf16.mxu1 %v5102_v35  ;;  %v363_v4 = vpack.c.bf16 %v323_v1, %v322_v63  ;;  %v1498_v5 = vld [vmem:[%s7274_s5 + $0x8] sm:$0xff]  ;;  %v1499_v6 = vld [vmem:[%s7274_s5 + $0x10] sm:$0xff]  ;;  %v1500_v7 = vld [vmem:[%s7274_s5 + $0x18] sm:$0xff] }
  0x48   : > { %3921 = vmatmul.mubr.msk.bf16.gmra.mxu0 %vm7281_vm0, %v5100_v34  ;;  %432 = vperm.xlu0 %4281, %v374_v40   ;;  %v316_v8 = vld [vmem:[%s5037_s13 + $0xc0] sm:$0xff]  ;;  %v317_v9 = vld [vmem:[%s5037_s13 + $0xc8] sm:$0xff] }
  0x49   : > { %3941 = vmatmul.mubr.msk.bf16.gmra.mxu1 %vm7281_vm0, %v5100_v34  ;;  %3924 = vmatprep.mubr.msk.bf16.mxu0 %vm7281_vm0, %v5110_v37  ;;  %v320_v10 = vld [vmem:[%s5037_s13 + $0xe0] sm:$0xff]  ;;  %v321_v11 = vld [vmem:[%s5037_s13 + $0xe8] sm:$0xff]  ;;  %v360_v12 = vpack.c.bf16 %v317_v9, %v316_v8 }
  0x4a   : > { %3944 = vmatprep.mubr.msk.bf16.mxu1 %vm7281_vm0, %v5110_v37  ;;  %437 = vperm.xlu1 %4282, %v375_v41   ;;  %v362_v14 = vpack.c.bf16 %v321_v11, %v320_v10 }
  0x4c   : > { %422 = vperm.xlu0 %4281, %v372_v44  }
  0x4e   : > { %427 = vperm.xlu1 %4282, %v373_v45  }
  0x50   : > { %3925 = vmatmul.mubr.msk.bf16.gmra.mxu0 %vm7281_vm0, %v5137_v42  ;;  %412 = vperm.xlu0 %4281, %v370_v46  }
  0x51   : > { %3945 = vmatmul.mubr.msk.bf16.gmra.mxu1 %vm7281_vm0, %v5137_v42  ;;  %3928 = vmatprep.mubr.msk.bf16.mxu0 %vm7281_vm0, %v5142_v43 }
  0x52   : > { %3948 = vmatprep.mubr.msk.bf16.mxu1 %vm7281_vm0, %v5142_v43  ;;  %417 = vperm.xlu1 %4282, %v371_v47  }
  0x54   : > { %402 = vperm.xlu0 %4281, %v368_v49  }
  0x56   : > { %407 = vperm.xlu1 %4282, %v369_v50  }
  0x58   : > { %3929 = vmatmul.mubr.msk.bf16.gmra.mxu0 %vm7281_vm0, %v5167_v48  ;;  %392 = vperm.xlu0 %4281, %v366_v51  }
  0x59   : > { %3949 = vmatmul.mubr.msk.bf16.gmra.mxu1 %vm7281_vm0, %v5167_v48  ;;  %3956 = vmatprep.mubr.msk.bf16.mxu0 %vm7281_vm0, %v5056_v13 }
  0x5a   : > { %3976 = vmatprep.mubr.msk.bf16.mxu1 %vm7281_vm0, %v5056_v13  ;;  %397 = vperm.xlu1 %4282, %v367_v52  }
  0x5c   : > { %382 = vperm.xlu0 %4281, %v364_v57  }
  0x5e   : > { %387 = vperm.xlu1 %4282, %v365_v62  }
  0x60   : > { %3957 = vmatmul.mubr.msk.bf16.vlgmr.msra.gmra.mxu0 %vm7281_vm0, %v5069_v20  ;;  %1503 = vperm.xlu0 %4281, %v1497_v3  }
  0x61   : > { %3977 = vmatmul.mubr.msk.bf16.vlgmr.msra.gmra.mxu1 %vm7281_vm0, %v5069_v20  ;;  %3993 = vmatpush3.bf16.msra.mxu0 %v5090_v30 }
  0x62   : > { %3960 = vmatprep.mubr.msk.bf16.mxu0 %vm7281_vm0, %v5074_v21  ;;  %3980 = vmatprep.mubr.msk.bf16.mxu1 %vm7281_vm0, %v5074_v21 }
  0x63   : > { %4013 = vmatpush3.bf16.msra.mxu1 %v5102_v35  ;;  %3994 = vmatprep.subr.bf16.mxu0 %v356_v58 }
  0x64   : > { %4014 = vmatprep.subr.bf16.mxu1 %v358_v61  ;;  %1508 = vperm.xlu1 %4282, %v1498_v5  }
  0x65   : > { %3995 = vmatpush3.bf16.msra.mxu0 %v356_v58  ;;  %1513 = vperm.xlu0 %4281, %v1499_v6  }
  0x66   : > { %4032 = vmatprep.subr.bf16.mxu0 %v361_v2 }
  0x67   : > { %4015 = vmatpush3.bf16.msra.mxu1 %v358_v61 }
  0x68   : > { %3961 = vmatmul.mubr.msk.bf16.gmra.mxu0 %vm7281_vm0, %v5100_v34  ;;  %4052 = vmatprep.subr.bf16.mxu1 %v363_v4 }
  0x69   : > { %3981 = vmatmul.mubr.msk.bf16.gmra.mxu1 %vm7281_vm0, %v5100_v34  ;;  %3964 = vmatprep.mubr.msk.bf16.mxu0 %vm7281_vm0, %v5110_v37 }
  0x6a   : > { %3984 = vmatprep.mubr.msk.bf16.mxu1 %vm7281_vm0, %v5110_v37  ;;  %1518 = vperm.xlu1 %4282, %v1500_v7  }
  0x70   : > { %3965 = vmatmul.mubr.msk.bf16.gmra.mxu0 %vm7281_vm0, %v5137_v42 }
  0x71   : > { %3985 = vmatmul.mubr.msk.bf16.gmra.mxu1 %vm7281_vm0, %v5137_v42  ;;  %3968 = vmatprep.mubr.msk.bf16.mxu0 %vm7281_vm0, %v5142_v43 }
  0x72   : > { %3988 = vmatprep.mubr.msk.bf16.mxu1 %vm7281_vm0, %v5142_v43 }
  0x78   : > { %3969 = vmatmul.mubr.msk.bf16.gmra.mxu0 %vm7281_vm0, %v5167_v48 }
  0x79   : > { %3989 = vmatmul.mubr.msk.bf16.gmra.mxu1 %vm7281_vm0, %v5167_v48  ;;  %3996 = vmatprep.mubr.msk.bf16.mxu0 %vm7281_vm0, %v5056_v13 }
  0x7a   : > { %4016 = vmatprep.mubr.msk.bf16.mxu1 %vm7281_vm0, %v5056_v13 }
  0x80   : > { %3997 = vmatmul.mubr.msk.bf16.vlgmr.msra.gmra.mxu0 %vm7281_vm0, %v5069_v20 }
  0x81   : > { %4017 = vmatmul.mubr.msk.bf16.vlgmr.msra.gmra.mxu1 %vm7281_vm0, %v5069_v20  ;;  %4000 = vmatprep.mubr.msk.bf16.mxu0 %vm7281_vm0, %v5074_v21 }
  0x82   : > { %4020 = vmatprep.mubr.msk.bf16.mxu1 %vm7281_vm0, %v5074_v21  ;;  %4033 = vmatpush3.bf16.msra.mxu0 %v361_v2 }
  0x83   : > { %4053 = vmatpush3.bf16.msra.mxu1 %v363_v4  ;;  %4034 = vmatprep.subr.bf16.mxu0 %v360_v12 }
  0x84   : > { %4054 = vmatprep.subr.bf16.mxu1 %v362_v14 }
  0x86   : > { %4035 = vmatpush3.bf16.msra.mxu0 %v360_v12 }
  0x87   : > { %4055 = vmatpush3.bf16.msra.mxu1 %v362_v14 }
  0x88   : > { %4001 = vmatmul.mubr.msk.bf16.gmra.mxu0 %vm7281_vm0, %v5100_v34 }
  0x89   : > { %4021 = vmatmul.mubr.msk.bf16.gmra.mxu1 %vm7281_vm0, %v5100_v34  ;;  %4004 = vmatprep.mubr.msk.bf16.mxu0 %vm7281_vm0, %v5110_v37 }
  0x8a   : > { %4024 = vmatprep.mubr.msk.bf16.mxu1 %vm7281_vm0, %v5110_v37 }
  0x90   : > { %4005 = vmatmul.mubr.msk.bf16.gmra.mxu0 %vm7281_vm0, %v5137_v42 }
  0x91   : > { %4025 = vmatmul.mubr.msk.bf16.gmra.mxu1 %vm7281_vm0, %v5137_v42  ;;  %4008 = vmatprep.mubr.msk.bf16.mxu0 %vm7281_vm0, %v5142_v43 }
  0x92   : > { %4028 = vmatprep.mubr.msk.bf16.mxu1 %vm7281_vm0, %v5142_v43 }
  0x98   : > { %4009 = vmatmul.mubr.msk.bf16.gmra.mxu0 %vm7281_vm0, %v5167_v48 }
  0x99   : > { %4029 = vmatmul.mubr.msk.bf16.gmra.mxu1 %vm7281_vm0, %v5167_v48  ;;  %4036 = vmatprep.mubr.msk.bf16.mxu0 %vm7281_vm0, %v5056_v13 }
  0x9a   : > { %4056 = vmatprep.mubr.msk.bf16.mxu1 %vm7281_vm0, %v5056_v13  ;;  %v5316_v13 = vld [vmem:[%s7273_s4] sm:$0xff]  }
  0xa0   : > { %4037 = vmatmul.mubr.msk.bf16.vlgmr.msra.gmra.mxu0 %vm7281_vm0, %v5069_v20 }
  0xa1   : > { %4057 = vmatmul.mubr.msk.bf16.vlgmr.msra.gmra.mxu1 %vm7281_vm0, %v5069_v20  ;;  %4040 = vmatprep.mubr.msk.bf16.mxu0 %vm7281_vm0, %v5074_v21 }
  0xa2   : > { %4060 = vmatprep.mubr.msk.bf16.mxu1 %vm7281_vm0, %v5074_v21 }
  0xa8   : > { %4041 = vmatmul.mubr.msk.bf16.gmra.mxu0 %vm7281_vm0, %v5100_v34 }
  0xa9   : > { %4061 = vmatmul.mubr.msk.bf16.gmra.mxu1 %vm7281_vm0, %v5100_v34  ;;  %4044 = vmatprep.mubr.msk.bf16.mxu0 %vm7281_vm0, %v5110_v37 }
  0xaa   : > { %4064 = vmatprep.mubr.msk.bf16.mxu1 %vm7281_vm0, %v5110_v37 }
  0xb0   : > { %4045 = vmatmul.mubr.msk.bf16.gmra.mxu0 %vm7281_vm0, %v5137_v42 }
  0xb1   : > { %4065 = vmatmul.mubr.msk.bf16.gmra.mxu1 %vm7281_vm0, %v5137_v42  ;;  %4048 = vmatprep.mubr.msk.bf16.mxu0 %vm7281_vm0, %v5142_v43 }
  0xb2   : > { %4068 = vmatprep.mubr.msk.bf16.mxu1 %vm7281_vm0, %v5142_v43 }
  0xb8   : > { %4049 = vmatmul.mubr.msk.bf16.gmra.mxu0 %vm7281_vm0, %v5167_v48  ;;  %v5334_v22 = vpop.permute.xlu1 %442 }
  0xb9   : > { %4069 = vmatmul.mubr.msk.bf16.gmra.mxu1 %vm7281_vm0, %v5167_v48  ;;  %4088 = vmatprep.mubr.bf16.mxu0 %v5316_v13 }
  0xba   : > { %4108 = vmatprep.mubr.bf16.mxu1 %v5316_v13  ;;  %v5330_v20 = vpop.permute.xlu0 %452 }
  0xbf   : > { %v5344_v28 = vpop.permute.xlu0 %457 }
  0xc0   : > { %v5348_v30 = vpop.permute.xlu1 %447 }
  0xc3   : > { %v5358_v36 = vpop.permute.xlu0 %432 }
  0xc5   : > { %v5360_v38 = vpop.permute.xlu1 %437 }
  0xc7   : > { %v5363_v45 = vpop.permute.xlu0 %422 }
  0xc9   : > { %v5365_v47 = vpop.permute.xlu1 %427 }
  0xcb   : > { %v5371_v57 = vpop.permute.xlu0 %412 }
  0xcd   : > { %v5374_v60 = vpop.permute.xlu1 %417 }
  0xcf   : > { %v5389_v10 = vpop.permute.xlu0 %402 }
  0xd1   : > { %v5394_v14 = vpop.permute.xlu1 %407 }
 0x100   : > { %v5320_v15 = vpop.f32.mrf.mxu0 }
 0x101   : > { %v5322_v16 = vpop.f32.mrf.mxu1 }
 0x102   : > { %v5324_v17 = vpop.f32.mrf.mxu0 }
 0x103   : > { %v5326_v18 = vpop.f32.mrf.mxu1 }
 0x104   : > { %v5328_v19 = vpop.f32.mrf.mxu0 }
 0x105   : > { %v5332_v21 = vpop.f32.mrf.mxu1 }
 0x106   : > { %v5336_v23 = vpop.f32.mrf.mxu0 }
 0x107   : > { %v5338_v24 = vpop.f32.mrf.mxu1 }
 0x108   : > { %v5340_v25 = vpop.f32.mrf.mxu0 }
 0x109   : > { %v3942_v26 = vpop.f32.mrf.mxu1 }
 0x10a   : > { %v5342_v27 = vpop.f32.mrf.mxu0  ;;  %v681_v8 = vadd.f32 %v3942_v26, %v5371_v57 }
 0x10b   : > { %v5346_v29 = vpop.f32.mrf.mxu1 }
 0x10c   : > { %v5350_v31 = vpop.f32.mrf.mxu0 }
 0x10d   : > { %v5352_v32 = vpop.f32.mrf.mxu1 }
 0x10e   : > { %v5354_v33 = vpop.f32.mrf.mxu0 }
 0x10f   : > { %v5356_v34 = vpop.f32.mrf.mxu1 }
 0x110   : > { %v3926_v35 = vpop.f32.mrf.mxu0 }
 0x111   : > { %v3946_v37 = vpop.f32.mrf.mxu1  ;;  %v600_v6 = vadd.f32 %v3926_v35, %v5358_v36 }
 0x112   : > { %v591_v39 = vpop.f32.mrf.mxu0  ;;  %v697_v43 = vadd.f32 %v3946_v37, %v5358_v36 }
 0x113   : > { %v688_v40 = vpop.f32.mrf.mxu1  ;;  %v592_v26 = vadd.f32 %v591_v39, %v5363_v45 }
 0x114   : > { %v3927_v41 = vpop.f32.mrf.mxu0  ;;  %4293 = vtanh.f32 %v697_v43 }
 0x115   : > { %v3947_v42 = vpop.f32.mrf.mxu1  ;;  %v603_v63 = vadd.f32 %v3927_v41, %v5360_v38 }
 0x116   : > { %v594_v44 = vpop.f32.mrf.mxu0  ;;  %v700_v3 = vadd.f32 %v3947_v42, %v5360_v38  ;;  %v689_v42 = vadd.f32 %v688_v40, %v5363_v45  ;;  %v584_v40 = vadd.f32 %v5340_v25, %v5371_v57 }
 0x117   : > { %v691_v46 = vpop.f32.mrf.mxu1  ;;  %v595_v11 = vadd.f32 %v594_v44, %v5365_v47 }
 0x118   : > { %v3930_v48 = vpop.f32.mrf.mxu0  ;;  %v692_v35 = vadd.f32 %v691_v46, %v5365_v47 }
 0x119   : > { %v616_v49 = vadd.f32 %v3930_v48, %v5330_v20  ;;  %v3950_v50 = vpop.f32.mrf.mxu1  ;;  %v587_v48 = vadd.f32 %v5350_v31, %v5374_v60 }
 0x11a   : > { %v713_v51 = vadd.f32 %v3950_v50, %v5330_v20  ;;  %v607_v52 = vpop.f32.mrf.mxu0  ;;  %v684_v50 = vadd.f32 %v5352_v32, %v5374_v60 }
 0x11b   : > { %4295 = vtanh.f32 %v616_v49  ;;  %v608_v53 = vadd.f32 %v607_v52, %v5334_v22  ;;  %v704_v54 = vpop.f32.mrf.mxu1  ;;  %v5415_v52 = vpop.permute.xlu0 %392 }
 0x11c   : > { %4297 = vtanh.f32 %v713_v51  ;;  %v705_v55 = vadd.f32 %v704_v54, %v5334_v22  ;;  %v3931_v56 = vpop.f32.mrf.mxu0  ;;  %v665_v54 = vadd.f32 %v5322_v16, %v5415_v52 }
 0x11d   : > { %4299 = vtanh.f32 %v608_v53  ;;  %v619_v58 = vadd.f32 %v3931_v56, %v5344_v28  ;;  %v3951_v59 = vpop.f32.mrf.mxu1 }
 0x11e   : > { %4301 = vtanh.f32 %v705_v55  ;;  %v716_v61 = vadd.f32 %v3951_v59, %v5344_v28  ;;  %v610_v62 = vpop.f32.mrf.mxu0  ;;  %v5423_v55 = vpop.permute.xlu1 %397 }
 0x11f   : > { %4303 = vtanh.f32 %v619_v58  ;;  %v611_v1 = vadd.f32 %v610_v62, %v5348_v30  ;;  %v707_v2 = vpop.f32.mrf.mxu1  ;;  %v579_v58 = vadd.f32 %v5354_v33, %v5394_v14  ;;  %v673_v33 = vadd.f32 %v5346_v29, %v5389_v10 }
 0x120   : > { %4305 = vtanh.f32 %v716_v61  ;;  %v708_v4 = vadd.f32 %v707_v2, %v5348_v30  ;;  %v5381_v5 = vpop.f32.mrf.mxu0  ;;  %v676_v61 = vadd.f32 %v5356_v34, %v5394_v14  ;;  %v571_v34 = vadd.f32 %v5328_v19, %v5423_v55 }
 0x121   : > { %4307 = vtanh.f32 %v611_v1  ;;  %v5384_v7 = vpop.f32.mrf.mxu1  ;;  %v5405_v44 = vpop.eup %4293  ;;  %v568_v19 = vadd.f32 %v5320_v15, %v5415_v52 }
 0x122   : > { %4309 = vtanh.f32 %v708_v4  ;;  %v5387_v9 = vpop.f32.mrf.mxu0 }
 0x123   : > { %4311 = vtanh.f32 %v603_v63  ;;  %v5392_v12 = vpop.f32.mrf.mxu1  ;;  %v576_v63 = vadd.f32 %v5342_v27, %v5389_v10 }
 0x124   : > { %4313 = vtanh.f32 %v700_v3  ;;  %v5397_v37 = vpop.f32.mrf.mxu0 }
 0x125   : > { %4315 = vtanh.f32 %v600_v6  ;;  %v5400_v41 = vpop.f32.mrf.mxu1 }
 0x126   : > { %4317 = vtanh.f32 %v681_v8  ;;  %v5403_v43 = vpop.f32.mrf.mxu0 }
 0x127   : > { %4319 = vtanh.f32 %v595_v11  ;;  %v5409_v49 = vpop.f32.mrf.mxu1 }
 0x128   : > { %v4296_v46 = vpop.eup %4295  ;;  %4321 = vtanh.f32 %v692_v35  ;;  %v5413_v39 = vpop.f32.mrf.mxu0 }
 0x129   : > { %v4298_v51 = vpop.eup %4297  ;;  %4323 = vtanh.f32 %v592_v26  ;;  %v5419_v53 = vpop.f32.mrf.mxu1  ;;  %v668_v26 = vadd.f32 %v5332_v21, %v5423_v55 }
 0x12a   : > { %v4300_v31 = vpop.eup %4299  ;;  %4325 = vtanh.f32 %v689_v42  ;;  %v5425_v32 = vpop.f32.mrf.mxu0 }
 0x12b   : > { %v4302_v56 = vpop.eup %4301  ;;  %4327 = vtanh.f32 %v587_v48  ;;  %v5429_v59 = vpop.f32.mrf.mxu1 }
 0x12c   : > { %v4304_v25 = vpop.eup %4303  ;;  %4329 = vtanh.f32 %v684_v50  ;;  %v5433_v62 = vpop.f32.mrf.mxu0 }
 0x12d   : > { %v4306_v16 = vpop.eup %4305  ;;  %4331 = vtanh.f32 %v584_v40  ;;  %v5437_v1 = vpop.f32.mrf.mxu1  ;;  %v1440_v2 = vpack.c.bf16 %v4304_v25, %v4296_v46 }
 0x12e   : > { %v4308_v3 = vpop.eup %4307  ;;  %4333 = vtanh.f32 %v665_v54  ;;  %v5441_v4 = vpop.f32.mrf.mxu0  ;;  %v1448_v6 = vpack.c.bf16 %v4306_v16, %v4298_v51 }
 0x12f   : > { %v4310_v8 = vpop.eup %4309  ;;  %4335 = vtanh.f32 %v579_v58  ;;  %v5445_v11 = vpop.f32.mrf.mxu1  ;;  %4072 = vmatprep.subr.bf16.mxu0 %v1440_v2  ;;  %v1439_v27 = vpack.c.bf16 %v4308_v3, %v4300_v31 }
 0x130   : > { %v4312_v35 = vpop.eup %4311  ;;  %v5449_v42 = vpop.permute.xlu1 %387  ;;  %4337 = vtanh.f32 %v676_v61  ;;  %4092 = vmatprep.subr.bf16.mxu1 %v1448_v6  ;;  %4073 = vmatpush3.bf16.msra.mxu0 %v1440_v2  ;;  %v1447_v48 = vpack.c.bf16 %v4310_v8, %v4302_v56  ;;  %v325_v8 = vld [vmem:[%s5482_s26 + $0x1] sm:$0x1] }
 0x131   : > { %v5451_v29 = vpop.f32.mrf.mxu0  ;;  %v4314_v46 = vpop.eup %4313  ;;  %4339 = vtanh.f32 %v576_v63  ;;  %4093 = vmatpush3.bf16.msra.mxu1 %v1448_v6  ;;  %4074 = vmatprep.subr.bf16.mxu0 %v1439_v27  ;;  %v563_v54 = vadd.f32 %v5336_v23, %v5449_v42  ;;  %v660_v25 = vadd.f32 %v5338_v24, %v5449_v42 }
 0x132   : > { %v5455_v50 = vpop.f32.mrf.mxu1  ;;  %v4316_v51 = vpop.eup %4315  ;;  %4341 = vtanh.f32 %v673_v33  ;;  %4094 = vmatprep.subr.bf16.mxu1 %v1447_v48  ;;  %v1446_v16 = vpack.c.bf16 %v4314_v46, %v5405_v44 }
 0x133   : > { %v5458_v21 = vpop.permute.xlu0 %382  ;;  %v5460_v40 = vpop.f32.mrf.mxu0  ;;  %4343 = vtanh.f32 %v571_v34  ;;  %v1438_v56 = vpack.c.bf16 %v4312_v35, %v4316_v51  ;;  %v324_v34 = vld [vmem:[%s5482_s26] sm:$0x1] }
 0x134   : > { %v4318_v31 = vpop.eup %4317  ;;  %v5464_v15 = vpop.f32.mrf.mxu1  ;;  %4345 = vtanh.f32 %v668_v26  ;;  %4075 = vmatpush3.bf16.msra.mxu0 %v1439_v27  ;;  %v560_v2 = vadd.f32 %v5324_v17, %v5458_v21  ;;  %v657_v24 = vadd.f32 %v5326_v18, %v5458_v21  ;;  %v2370_v26 = vsel %vm2366_vm1, %v325_v8, 0.0 }
 0x135   : > { %v4320_v58 = vpop.eup %4319  ;;  %v5468_v61 = vpop.f32.mrf.mxu0  ;;  %4347 = vtanh.f32 %v568_v19  ;;  %4095 = vmatpush3.bf16.msra.mxu1 %v1447_v48  ;;  %4076 = vmatprep.subr.bf16.mxu0 %v1438_v56 }
 0x136   : > { %v4322_v63 = vpop.eup %4321  ;;  %v5473_v23 = vpop.f32.mrf.mxu1  ;;  %4096 = vmatprep.subr.bf16.mxu1 %v1446_v16  ;;  %4349 = vtanh.f32 %v563_v54  ;;  %2371 = vadd.xlane.f32.xlu0 %v2370_v26 }
 0x137   : > { %v4324_v3 = vpop.eup %4323  ;;  %v5477_v33 = vpop.f32.mrf.mxu0  ;;  %4351 = vtanh.f32 %v660_v25 }
 0x138   : > { %v4326_v17 = vpop.eup %4325  ;;  %v5484_v44 = vpop.f32.mrf.mxu1  ;;  %v1437_v6 = vpack.c.bf16 %v4320_v58, %v4324_v3  ;;  %4077 = vmatpush3.bf16.msra.mxu0 %v1438_v56  ;;  %4353 = vtanh.f32 %v560_v2  ;;  %v2367_v56 = vsel %vm2366_vm1, %v324_v34, 0.0 }
 0x139   : > { %v4328_v27 = vpop.eup %4327  ;;  %v3970_v18 = vpop.f32.mrf.mxu0  ;;  %v1445_v35 = vpack.c.bf16 %v4322_v63, %v4326_v17  ;;  %4097 = vmatpush3.bf16.msra.mxu1 %v1446_v16  ;;  %4355 = vtanh.f32 %v657_v24  ;;  %2368 = vadd.xlane.f32.xlu1 %v2367_v56  ;;  %v327_v17 = vld [vmem:[%s5482_s26 + $0x3] sm:$0x1] }
 0x13a   : > { %v4330_v48 = vpop.eup %4329  ;;  %v810_v46 = vadd.f32 %v3970_v18, %v5330_v20  ;;  %v3990_v19 = vpop.f32.mrf.mxu1  ;;  %4078 = vmatprep.subr.bf16.mxu0 %v1437_v6 }
 0x13b   : > { %v4332_v51 = vpop.eup %4331  ;;  %v907_v54 = vadd.f32 %v3990_v19, %v5330_v20  ;;  %4098 = vmatprep.subr.bf16.mxu1 %v1445_v35  ;;  %v801_v58 = vpop.f32.mrf.mxu0  ;;  %v1444_v18 = vpack.c.bf16 %v4330_v48, %v4318_v31  ;;  %v797_v31 = vadd.f32 %v5468_v61, %v5360_v38  ;;  %v794_v61 = vadd.f32 %v5451_v29, %v5358_v36 }
 0x13c   : > { %v5492_v25 = vpop.eup %4333  ;;  %4357 = vtanh.f32 %v810_v46  ;;  %v802_v63 = vadd.f32 %v801_v58, %v5334_v22  ;;  %v898_v2 = vpop.f32.mrf.mxu1  ;;  %v1436_v3 = vpack.c.bf16 %v4328_v27, %v4332_v51  ;;  %4079 = vmatpush3.bf16.msra.mxu0 %v1437_v6  ;;  %v326_v58 = vld [vmem:[%s5482_s26 + $0x2] sm:$0x1]  ;;  %v789_v29 = vadd.f32 %v5477_v33, %v5365_v47 }
 0x13d   : > { %v4336_v16 = vpop.eup %4335  ;;  %4359 = vtanh.f32 %v907_v54  ;;  %v899_v24 = vadd.f32 %v898_v2, %v5334_v22  ;;  %v3971_v8 = vpop.f32.mrf.mxu0  ;;  %4099 = vmatpush3.bf16.msra.mxu1 %v1445_v35  ;;  %v2376_v54 = vsel %vm2366_vm1, %v327_v17, 0.0  ;;  %v894_v2 = vadd.f32 %v5473_v23, %v5360_v38 }
 0x13e   : > { %v4338_v26 = vpop.eup %4337  ;;  %4361 = vtanh.f32 %v802_v63  ;;  %v813_v34 = vadd.f32 %v3971_v8, %v5344_v28  ;;  %v3991_v19 = vpop.f32.mrf.mxu1  ;;  %4080 = vmatprep.subr.bf16.mxu0 %v1436_v3  ;;  %4100 = vmatprep.subr.bf16.mxu1 %v1444_v18  ;;  %v2373_v23 = vsel %vm2366_vm1, %v326_v58, 0.0  ;;  %v786_v33 = vadd.f32 %v5460_v40, %v5363_v45 }
 0x13f   : > { %v4340_v46 = vpop.eup %4339  ;;  %4363 = vtanh.f32 %v899_v24  ;;  %v910_v27 = vadd.f32 %v3991_v19, %v5344_v28  ;;  %v804_v51 = vpop.f32.mrf.mxu0  ;;  %2377 = vadd.xlane.f32.xlu0 %v2376_v54  ;;  %v329_v19 = vld [vmem:[%s5482_s26 + $0x5] sm:$0x1]  ;;  %2374 = vadd.xlane.f32.xlu1 %v2373_v23  ;;  %v778_v23 = vadd.f32 %v5413_v39, %v5371_v57  ;;  %v5562_v39 = vld [vmem:[%s7273_s4 + $0x8] sm:$0xff]  }
 0x140   : > { %v4342_v56 = vpop.eup %4341  ;;  %4365 = vtanh.f32 %v813_v34  ;;  %v805_v6 = vadd.f32 %v804_v51, %v5348_v30  ;;  %v901_v48 = vpop.f32.mrf.mxu1  ;;  %v1435_v35 = vpack.c.bf16 %v4336_v16, %v4340_v46  ;;  %4081 = vmatpush3.bf16.msra.mxu0 %v1436_v3  ;;  %v891_v46 = vadd.f32 %v5455_v50, %v5358_v36  ;;  %v328_v51 = vld [vmem:[%s5482_s26 + $0x4] sm:$0x1] }
 0x141   : > { %v4344_v63 = vpop.eup %4343  ;;  %4367 = vtanh.f32 %v910_v27  ;;  %v902_v24 = vadd.f32 %v901_v48, %v5348_v30  ;;  %v5507_v17 = vpop.f32.mrf.mxu0  ;;  %v1443_v8 = vpack.c.bf16 %v4338_v26, %v4342_v56  ;;  %4101 = vmatpush3.bf16.msra.mxu1 %v1444_v18  ;;  %v2382_v18 = vsel %vm2366_vm1, %v329_v19, 0.0 }
 0x142   : > { %v4346_v0 = vpop.eup %4345  ;;  %4369 = vtanh.f32 %v805_v6  ;;  %v5512_v16 = vpop.f32.mrf.mxu1  ;;  %4082 = vmatprep.subr.bf16.mxu0 %v1435_v35  ;;  %v886_v50 = vadd.f32 %v5484_v44, %v5365_v47  ;;  %v883_v44 = vadd.f32 %v5464_v15, %v5363_v45 }
 0x143   : > { %v4348_v34 = vpop.eup %4347  ;;  %4371 = vtanh.f32 %v902_v24  ;;  %4102 = vmatprep.subr.bf16.mxu1 %v1443_v8  ;;  %v5517_v3 = vpop.f32.mrf.mxu0  ;;  %v1442_v56 = vpack.c.bf16 %v4346_v0, %v5492_v25  ;;  %2383 = vadd.xlane.f32.xlu0 %v2382_v18  ;;  %v2379_v0 = vsel %vm2366_vm1, %v328_v51, 0.0 }
 0x144   : > { %4373 = vtanh.f32 %v797_v31  ;;  %v5521_v26 = vpop.f32.mrf.mxu1  ;;  %v1434_v27 = vpack.c.bf16 %v4344_v63, %v4348_v34  ;;  %v4350_v54 = vpop.eup %4349  ;;  %4083 = vmatpush3.bf16.msra.mxu0 %v1435_v35  ;;  %v781_v35 = vadd.f32 %v5433_v62, %v5374_v60  ;;  %2380 = vadd.xlane.f32.xlu1 %v2379_v0 }
 0x145   : > { %4375 = vtanh.f32 %v894_v2  ;;  %v5527_v58 = vpop.f32.mrf.mxu0  ;;  %v4352_v31 = vpop.eup %4351  ;;  %4103 = vmatpush3.bf16.msra.mxu1 %v1443_v8  ;;  %v878_v8 = vadd.f32 %v5437_v1, %v5374_v60 }
 0x146   : > { %4377 = vtanh.f32 %v794_v61  ;;  %v5532_v6 = vpop.f32.mrf.mxu1  ;;  %4084 = vmatprep.subr.bf16.mxu0 %v1434_v27  ;;  %v4354_v48 = vpop.eup %4353  ;;  %4104 = vmatprep.subr.bf16.mxu1 %v1442_v56 }
 0x147   : > { %4379 = vtanh.f32 %v891_v46  ;;  %v5536_v63 = vpop.f32.mrf.mxu0  ;;  %v4356_v25 = vpop.eup %4355  ;;  %v1433_v2 = vpack.c.bf16 %v4350_v54, %v4354_v48  ;;  %v875_v46 = vadd.f32 %v5419_v53, %v5371_v57  ;;  %v870_v53 = vadd.f32 %v5445_v11, %v5394_v14 }
 0x148   : > { %4381 = vtanh.f32 %v789_v29  ;;  %v5541_v40 = vpop.f32.mrf.mxu1  ;;  %4085 = vmatpush3.bf16.msra.mxu0 %v1434_v27  ;;  %v1441_v19 = vpack.c.bf16 %v4352_v31, %v4356_v25  ;;  %v773_v27 = vadd.f32 %v5441_v4, %v5394_v14  ;;  %v770_v4 = vadd.f32 %v5425_v32, %v5389_v10 }
 0x149   : > { %v4358_v24 = vpop.eup %4357  ;;  %4383 = vtanh.f32 %v886_v50  ;;  %v5545_v15 = vpop.f32.mrf.mxu0  ;;  %4105 = vmatpush3.bf16.msra.mxu1 %v1442_v56  ;;  %4086 = vmatprep.subr.bf16.mxu0 %v1433_v2  ;;  %v867_v48 = vadd.f32 %v5429_v59, %v5389_v10  ;;  %v765_v25 = vadd.f32 %v5397_v37, %v5423_v55  ;;  %v762_v37 = vadd.f32 %v5381_v5, %v5415_v52 }
 0x14a   : > { %v4360_v61 = vpop.eup %4359  ;;  %4385 = vtanh.f32 %v786_v33  ;;  %v5549_v62 = vpop.f32.mrf.mxu1  ;;  %4106 = vmatprep.subr.bf16.mxu1 %v1441_v19 }
 0x14b   : > { %v4362_v34 = vpop.eup %4361  ;;  %4387 = vtanh.f32 %v883_v44  ;;  %v5553_v1 = vpop.f32.mrf.mxu0 }
 0x14c   : > { %v4364_v29 = vpop.eup %4363  ;;  %4389 = vtanh.f32 %v781_v35  ;;  %v5557_v18 = vpop.f32.mrf.mxu1  ;;  %4087 = vmatpush3.bf16.msra.mxu0 %v1433_v2 }
 0x14d   : > { %v4366_v51 = vpop.eup %4365  ;;  %4391 = vtanh.f32 %v878_v8  ;;  %v5566_v54 = vpop.f32.mrf.mxu0  ;;  %4107 = vmatpush3.bf16.msra.mxu1 %v1441_v19 }
 0x14e   : > { %v4368_v50 = vpop.eup %4367  ;;  %4393 = vtanh.f32 %v778_v23  ;;  %v5570_v56 = vpop.f32.mrf.mxu1  ;;  %v1456_v31 = vpack.c.bf16 %v4366_v51, %v4358_v24  ;;  %v862_v24 = vadd.f32 %v5400_v41, %v5423_v55  ;;  %v859_v41 = vadd.f32 %v5384_v7, %v5415_v52 }
 0x14f   : > { %v4370_v33 = vpop.eup %4369  ;;  %4395 = vtanh.f32 %v875_v46  ;;  %v5574_v44 = vpop.f32.mrf.mxu0  ;;  %v1464_v11 = vpack.c.bf16 %v4368_v50, %v4360_v61  ;;  %4089 = vmatmul.mubr.bf16.vlgmr.msra.gmra.mxu0 %v5562_v39  ;;  %v854_v7 = vadd.f32 %v5409_v49, %v5449_v42 }
 0x150   : > { %v4372_v0 = vpop.eup %4371  ;;  %4397 = vtanh.f32 %v773_v27  ;;  %v5578_v35 = vpop.f32.mrf.mxu1  ;;  %4112 = vmatprep.subr.bf16.mxu0 %v1456_v31  ;;  %v1455_v32 = vpack.c.bf16 %v4370_v33, %v4362_v34  ;;  %4109 = vmatmul.mubr.bf16.vlgmr.msra.gmra.mxu1 %v5562_v39 }
 0x151   : > { %v4374_v2 = vpop.eup %4373  ;;  %4399 = vtanh.f32 %v870_v53  ;;  %4132 = vmatprep.subr.bf16.mxu1 %v1464_v11  ;;  %v5584_v59 = vpop.f32.mrf.mxu0  ;;  %v1463_v8 = vpack.c.bf16 %v4372_v0, %v4364_v29  ;;  %4113 = vmatpush3.bf16.msra.mxu0 %v1456_v31  ;;  %v757_v29 = vadd.f32 %v5403_v43, %v5449_v42  ;;  %v754_v43 = vadd.f32 %v5387_v9, %v5458_v21 }
 0x152   : > { %v4376_v19 = vpop.eup %4375  ;;  %4401 = vtanh.f32 %v770_v4  ;;  %v5588_v61 = vpop.f32.mrf.mxu1  ;;  %4133 = vmatpush3.bf16.msra.mxu1 %v1464_v11  ;;  %4114 = vmatprep.subr.bf16.mxu0 %v1455_v32 }
 0x153   : > { %v4378_v23 = vpop.eup %4377  ;;  %4403 = vtanh.f32 %v867_v48  ;;  %4134 = vmatprep.subr.bf16.mxu1 %v1463_v8  ;;  %v5592_v34 = vpop.f32.mrf.mxu0  ;;  %4128 = vmatprep.mubr.bf16.mxu0 %v5316_v13 }
 0x154   : > { %v4380_v46 = vpop.eup %4379  ;;  %4405 = vtanh.f32 %v765_v25  ;;  %v5596_v5 = vpop.f32.mrf.mxu1  ;;  %4148 = vmatprep.mubr.bf16.mxu1 %v5316_v13  ;;  %v1454_v53 = vpack.c.bf16 %v4374_v2, %v4378_v23  ;;  %v851_v13 = vadd.f32 %v5392_v12, %v5458_v21 }
 0x155   : > { %v4382_v27 = vpop.eup %4381  ;;  %4407 = vtanh.f32 %v862_v24  ;;  %v5602_v51 = vpop.f32.mrf.mxu0  ;;  %v1462_v50 = vpack.c.bf16 %v4376_v19, %v4380_v46  ;;  %4115 = vmatpush3.bf16.msra.mxu0 %v1455_v32 }
 0x156   : > { %v4384_v4 = vpop.eup %4383  ;;  %4409 = vtanh.f32 %v762_v37  ;;  %v5606_v31 = vpop.f32.mrf.mxu1  ;;  %4135 = vmatpush3.bf16.msra.mxu1 %v1463_v8  ;;  %4116 = vmatprep.subr.bf16.mxu0 %v1454_v53 }
 0x157   : > { %v4386_v33 = vpop.eup %4385  ;;  %4411 = vtanh.f32 %v859_v41  ;;  %4136 = vmatprep.subr.bf16.mxu1 %v1462_v50  ;;  %v5610_v49 = vpop.f32.mrf.mxu0 }
 0x158   : > { %v4388_v48 = vpop.eup %4387  ;;  %4413 = vtanh.f32 %v757_v29  ;;  %v5612_v11 = vpop.f32.mrf.mxu1  ;;  %v1453_v25 = vpack.c.bf16 %v4382_v27, %v4386_v33 }
 0x159   : > { %v4390_v0 = vpop.eup %4389  ;;  %4415 = vtanh.f32 %v854_v7  ;;  %v4010_v9 = vpop.f32.mrf.mxu0  ;;  %v1461_v2 = vpack.c.bf16 %v4384_v4, %v4388_v48  ;;  %4117 = vmatpush3.bf16.msra.mxu0 %v1454_v53 }
 0x15a   : > { %v4392_v32 = vpop.eup %4391  ;;  %4417 = vtanh.f32 %v754_v43  ;;  %v1004_v24 = vadd.f32 %v4010_v9, %v5330_v20  ;;  %v4030_v8 = vpop.f32.mrf.mxu1  ;;  %4137 = vmatpush3.bf16.msra.mxu1 %v1462_v50  ;;  %4118 = vmatprep.subr.bf16.mxu0 %v1453_v25 }
 0x15b   : > { %v4394_v12 = vpop.eup %4393  ;;  %4419 = vtanh.f32 %v851_v13  ;;  %v1101_v19 = vadd.f32 %v4030_v8, %v5330_v20  ;;  %4138 = vmatprep.subr.bf16.mxu1 %v1461_v2  ;;  %v995_v37 = vpop.f32.mrf.mxu0  ;;  %v956_v8 = vadd.f32 %v5507_v17, %v5415_v52 }
 0x15c   : > { %v4396_v23 = vpop.eup %4395  ;;  %4421 = vtanh.f32 %v1004_v24  ;;  %v996_v41 = vadd.f32 %v995_v37, %v5334_v22  ;;  %v1092_v46 = vpop.f32.mrf.mxu1  ;;  %v1452_v4 = vpack.c.bf16 %v4390_v0, %v4394_v12 }
 0x15d   : > { %v4398_v29 = vpop.eup %4397  ;;  %4423 = vtanh.f32 %v1101_v19  ;;  %v1093_v27 = vadd.f32 %v1092_v46, %v5334_v22  ;;  %v4011_v7 = vpop.f32.mrf.mxu0  ;;  %v1460_v53 = vpack.c.bf16 %v4392_v32, %v4396_v23  ;;  %4119 = vmatpush3.bf16.msra.mxu0 %v1453_v25  ;;  %v991_v25 = vadd.f32 %v5602_v51, %v5360_v38 }
 0x15e   : > { %v4400_v50 = vpop.eup %4399  ;;  %4425 = vtanh.f32 %v996_v41  ;;  %v1007_v43 = vadd.f32 %v4011_v7, %v5344_v28  ;;  %v4031_v33 = vpop.f32.mrf.mxu1  ;;  %4139 = vmatpush3.bf16.msra.mxu1 %v1461_v2  ;;  %4120 = vmatprep.subr.bf16.mxu0 %v1452_v4  ;;  %v1088_v46 = vadd.f32 %v5606_v31, %v5360_v38 }
 0x15f   : > { %v4402_v13 = vpop.eup %4401  ;;  %4427 = vtanh.f32 %v1093_v27  ;;  %v1104_v48 = vadd.f32 %v4031_v33, %v5344_v28  ;;  %4140 = vmatprep.subr.bf16.mxu1 %v1460_v53  ;;  %v998_v9 = vpop.f32.mrf.mxu0  ;;  %v988_v27 = vadd.f32 %v5584_v59, %v5358_v36 }
 0x160   : > { %v4404_v24 = vpop.eup %4403  ;;  %4429 = vtanh.f32 %v1007_v43  ;;  %v999_v0 = vadd.f32 %v998_v9, %v5348_v30  ;;  %v1095_v32 = vpop.f32.mrf.mxu1  ;;  %v1451_v12 = vpack.c.bf16 %v4398_v29, %v4402_v13 }
 0x161   : > { %v4406_v19 = vpop.eup %4405  ;;  %4431 = vtanh.f32 %v1104_v48  ;;  %v1096_v2 = vadd.f32 %v1095_v32, %v5348_v30  ;;  %v5626_v37 = vpop.f32.mrf.mxu0  ;;  %v1459_v23 = vpack.c.bf16 %v4400_v50, %v4404_v24  ;;  %4121 = vmatpush3.bf16.msra.mxu0 %v1452_v4  ;;  %v1085_v50 = vadd.f32 %v5588_v61, %v5358_v36 }
 0x162   : > { %v4408_v41 = vpop.eup %4407  ;;  %4433 = vtanh.f32 %v999_v0  ;;  %v5630_v17 = vpop.f32.mrf.mxu1  ;;  %4141 = vmatpush3.bf16.msra.mxu1 %v1460_v53  ;;  %4122 = vmatprep.subr.bf16.mxu0 %v1451_v12  ;;  %v983_v4 = vadd.f32 %v5610_v49, %v5365_v47  ;;  %v1080_v48 = vadd.f32 %v5612_v11, %v5365_v47  ;;  %v980_v24 = vadd.f32 %v5592_v34, %v5363_v45 }
 0x163   : > { %v4410_v29 = vpop.eup %4409  ;;  %4435 = vtanh.f32 %v1096_v2  ;;  %4142 = vmatprep.subr.bf16.mxu1 %v1459_v23  ;;  %v5634_v51 = vpop.f32.mrf.mxu0  ;;  %v1077_v0 = vadd.f32 %v5596_v5, %v5363_v45 }
 0x164   : > { %v4412_v7 = vpop.eup %4411  ;;  %4437 = vtanh.f32 %v956_v8  ;;  %v5638_v31 = vpop.f32.mrf.mxu1  ;;  %v1450_v59 = vpack.c.bf16 %v4406_v19, %v4410_v29 }
 0x165   : > { %v4414_v43 = vpop.eup %4413  ;;  %4439 = vtanh.f32 %v991_v25  ;;  %v5642_v53 = vpop.f32.mrf.mxu0  ;;  %v1458_v33 = vpack.c.bf16 %v4408_v41, %v4412_v7  ;;  %4123 = vmatpush3.bf16.msra.mxu0 %v1451_v12  ;;  %v975_v12 = vadd.f32 %v5566_v54, %v5374_v60 }
 0x166   : > { %v4416_v13 = vpop.eup %4415  ;;  %4441 = vtanh.f32 %v1088_v46  ;;  %v5646_v9 = vpop.f32.mrf.mxu1  ;;  %4143 = vmatpush3.bf16.msra.mxu1 %v1459_v23  ;;  %4124 = vmatprep.subr.bf16.mxu0 %v1450_v59  ;;  %v1072_v23 = vadd.f32 %v5570_v56, %v5374_v60  ;;  %v972_v46 = vadd.f32 %v5545_v15, %v5371_v57 }
 0x167   : > { %v4418_v61 = vpop.eup %4417  ;;  %4443 = vtanh.f32 %v988_v27  ;;  %4144 = vmatprep.subr.bf16.mxu1 %v1458_v33  ;;  %v5650_v49 = vpop.f32.mrf.mxu0  ;;  %v1069_v27 = vadd.f32 %v5549_v62, %v5371_v57 }
 0x168   : > { %v4420_v8 = vpop.eup %4419  ;;  %4445 = vtanh.f32 %v1085_v50  ;;  %v5654_v32 = vpop.f32.mrf.mxu1  ;;  %v1449_v25 = vpack.c.bf16 %v4414_v43, %v4418_v61  ;;  %v967_v50 = vadd.f32 %v5574_v44, %v5394_v14 }
 0x169   : > { %v4422_v11 = vpop.eup %4421  ;;  %4447 = vtanh.f32 %v983_v4  ;;  %v5658_v19 = vpop.f32.mrf.mxu0  ;;  %v1457_v34 = vpack.c.bf16 %v4416_v13, %v4420_v8  ;;  %4125 = vmatpush3.bf16.msra.mxu0 %v1450_v59  ;;  %v1064_v4 = vadd.f32 %v5578_v35, %v5394_v14  ;;  %v964_v13 = vadd.f32 %v5553_v1, %v5389_v10 }
 0x16a   : > { %v4424_v2 = vpop.eup %4423  ;;  %4449 = vtanh.f32 %v1080_v48  ;;  %v5662_v41 = vpop.f32.mrf.mxu1  ;;  %4145 = vmatpush3.bf16.msra.mxu1 %v1458_v33  ;;  %4126 = vmatprep.subr.bf16.mxu0 %v1449_v25 }
 0x16b   : > { %v4426_v5 = vpop.eup %4425  ;;  %4451 = vtanh.f32 %v980_v24  ;;  %4146 = vmatprep.subr.bf16.mxu1 %v1457_v34  ;;  %v5666_v54 = vpop.f32.mrf.mxu0  ;;  %v1061_v24 = vadd.f32 %v5557_v18, %v5389_v10  ;;  %v1056_v18 = vadd.f32 %v5532_v6, %v5423_v55 }
 0x16c   : > { %v4428_v29 = vpop.eup %4427  ;;  %4453 = vtanh.f32 %v1077_v0  ;;  %v5670_v56 = vpop.f32.mrf.mxu1 }
 0x16d   : > { %v4430_v7 = vpop.eup %4429  ;;  %4455 = vtanh.f32 %v975_v12  ;;  %v5674_v43 = vpop.f32.mrf.mxu0  ;;  %4127 = vmatpush3.bf16.msra.mxu0 %v1449_v25 }
 0x16e   : > { %v4432_v15 = vpop.eup %4431  ;;  %4457 = vtanh.f32 %v1072_v23  ;;  %v5678_v59 = vpop.f32.mrf.mxu1  ;;  %4147 = vmatpush3.bf16.msra.mxu1 %v1457_v34  ;;  %v1472_v62 = vpack.c.bf16 %v4430_v7, %v4422_v11  ;;  %v959_v11 = vadd.f32 %v5527_v58, %v5423_v55  ;;  %v1053_v58 = vadd.f32 %v5512_v16, %v5415_v52 }
 0x16f   : > { %v4434_v33 = vpop.eup %4433  ;;  %4459 = vtanh.f32 %v972_v46  ;;  %v5682_v48 = vpop.f32.mrf.mxu0  ;;  %v1480_v44 = vpack.c.bf16 %v4432_v15, %v4424_v2  ;;  %v948_v46 = vadd.f32 %v5517_v3, %v5458_v21  ;;  %v1048_v15 = vadd.f32 %v5541_v40, %v5449_v42 }
 0x170   : > { %v4436_v61 = vpop.eup %4435  ;;  %4461 = vtanh.f32 %v1069_v27  ;;  %v5686_v8 = vpop.f32.mrf.mxu1  ;;  %4152 = vmatprep.subr.bf16.mxu0 %v1472_v62  ;;  %v1471_v35 = vpack.c.bf16 %v4434_v33, %v4426_v5  ;;  %4129 = vmatmul.mubr.bf16.vlgmr.msra.gmra.mxu0 %v5562_v39  ;;  %v951_v27 = vadd.f32 %v5536_v63, %v5449_v42 }
 0x171   : > { %v5688_v0 = vpop.eup %4437  ;;  %4463 = vtanh.f32 %v967_v50  ;;  %4149 = vmatmul.mubr.bf16.vlgmr.msra.gmra.mxu1 %v5562_v39  ;;  %v5694_v1 = vpop.f32.mrf.mxu0  ;;  %v1479_v12 = vpack.c.bf16 %v4436_v61, %v4428_v29  ;;  %4172 = vmatprep.subr.bf16.mxu1 %v1480_v44  ;;  %v5711_v29 = vld [vmem:[%s7273_s4] sm:$0xff]  }
 0x172   : > { %v4440_v25 = vpop.eup %4439  ;;  %4465 = vtanh.f32 %v1064_v4  ;;  %v5698_v34 = vpop.f32.mrf.mxu1  ;;  %4153 = vmatpush3.bf16.msra.mxu0 %v1472_v62  ;;  %4173 = vmatpush3.bf16.msra.mxu1 %v1480_v44 }
 0x173   : > { %v4442_v2 = vpop.eup %4441  ;;  %4467 = vtanh.f32 %v964_v13  ;;  %4154 = vmatprep.subr.bf16.mxu0 %v1471_v35  ;;  %v5702_v23 = vpop.f32.mrf.mxu0  ;;  %4174 = vmatprep.subr.bf16.mxu1 %v1479_v12  ;;  %v1045_v13 = vadd.f32 %v5521_v26, %v5458_v21 }
 0x174   : > { %v4444_v5 = vpop.eup %4443  ;;  %4469 = vtanh.f32 %v1061_v24  ;;  %v5706_v6 = vpop.f32.mrf.mxu1  ;;  %4168 = vmatprep.mubr.bf16.mxu0 %v5711_v29  ;;  %4188 = vmatprep.mubr.bf16.mxu1 %v5711_v29 }
 0x175   : > { %v4446_v16 = vpop.eup %4445  ;;  %4471 = vtanh.f32 %v959_v11  ;;  %v5716_v7 = vpop.f32.mrf.mxu0  ;;  %v1470_v50 = vpack.c.bf16 %v4440_v25, %v4444_v5 }
 0x176   : > { %v4448_v3 = vpop.eup %4447  ;;  %4473 = vtanh.f32 %v1056_v18  ;;  %v4067_v4 = vpop.f32.mrf.mxu1  ;;  %4155 = vmatpush3.bf16.msra.mxu0 %v1471_v35  ;;  %v1478_v62 = vpack.c.bf16 %v4442_v2, %v4446_v16  ;;  %4175 = vmatpush3.bf16.msra.mxu1 %v1479_v12 }
 0x177   : > { %v4450_v33 = vpop.eup %4449  ;;  %4475 = vtanh.f32 %v1053_v58  ;;  %4156 = vmatprep.subr.bf16.mxu0 %v1470_v50  ;;  %v5723_v63 = vpop.f32.mrf.mxu0 }
 0x178   : > { %v4452_v44 = vpop.eup %4451  ;;  %4477 = vtanh.f32 %v948_v46  ;;  %4176 = vmatprep.subr.bf16.mxu1 %v1478_v62  ;;  %v5725_v61 = vpop.f32.mrf.mxu1 }
 0x179   : > { %v4454_v24 = vpop.eup %4453  ;;  %4479 = vtanh.f32 %v951_v27  ;;  %v4050_v40 = vpop.f32.mrf.mxu0  ;;  %v1469_v11 = vpack.c.bf16 %v4448_v3, %v4452_v44 }
 0x17a   : > { %v4456_v35 = vpop.eup %4455  ;;  %4481 = vtanh.f32 %v1048_v15  ;;  %v1198_v25 = vadd.f32 %v4050_v40, %v5330_v20  ;;  %v4070_v18 = vpop.f32.mrf.mxu1  ;;  %4157 = vmatpush3.bf16.msra.mxu0 %v1470_v50  ;;  %v1477_v26 = vpack.c.bf16 %v4450_v33, %v4454_v24  ;;  %4177 = vmatpush3.bf16.msra.mxu1 %v1478_v62 }
 0x17b   : > { %v4458_v12 = vpop.eup %4457  ;;  %4483 = vtanh.f32 %v1045_v13  ;;  %v1295_v2 = vadd.f32 %v4070_v18, %v5330_v20  ;;  %4158 = vmatprep.subr.bf16.mxu0 %v1469_v11  ;;  %v1189_v58 = vpop.f32.mrf.mxu0 }
 0x17c   : > { %v4460_v5 = vpop.eup %4459  ;;  %4485 = vtanh.f32 %v1198_v25  ;;  %4178 = vmatprep.subr.bf16.mxu1 %v1477_v26  ;;  %v1190_v46 = vadd.f32 %v1189_v58, %v5334_v22  ;;  %v1286_v16 = vpop.f32.mrf.mxu1 }
 0x17d   : > { %v4462_v27 = vpop.eup %4461  ;;  %4487 = vtanh.f32 %v1295_v2  ;;  %v1287_v3 = vadd.f32 %v1286_v16, %v5334_v22  ;;  %v4051_v15 = vpop.f32.mrf.mxu0  ;;  %v1468_v50 = vpack.c.bf16 %v4456_v35, %v4460_v5  ;;  %v1185_v2 = vadd.f32 %v5716_v7, %v5360_v38 }
 0x17e   : > { %v4464_v33 = vpop.eup %4463  ;;  %4489 = vtanh.f32 %v1190_v46  ;;  %v1201_v13 = vadd.f32 %v4051_v15, %v5344_v28  ;;  %v4071_v20 = vpop.f32.mrf.mxu1  ;;  %4159 = vmatpush3.bf16.msra.mxu0 %v1469_v11  ;;  %v1476_v62 = vpack.c.bf16 %v4458_v12, %v4462_v27  ;;  %4179 = vmatpush3.bf16.msra.mxu1 %v1477_v26  ;;  %v1182_v46 = vadd.f32 %v5694_v1, %v5358_v36 }
 0x17f   : > { %v4466_v44 = vpop.eup %4465  ;;  %4491 = vtanh.f32 %v1287_v3  ;;  %v1298_v24 = vadd.f32 %v4071_v20, %v5344_v28  ;;  %4160 = vmatprep.subr.bf16.mxu0 %v1468_v50  ;;  %v1192_v40 = vpop.f32.mrf.mxu0  ;;  %v1282_v28 = vadd.f32 %v4067_v4, %v5360_v38  ;;  %v1279_v7 = vadd.f32 %v5698_v34, %v5358_v36 }
 0x180   : > { %v4468_v25 = vpop.eup %4467  ;;  %4493 = vtanh.f32 %v1201_v13  ;;  %4180 = vmatprep.subr.bf16.mxu1 %v1476_v62  ;;  %v1193_v22 = vadd.f32 %v1192_v40, %v5348_v30  ;;  %v1289_v35 = vpop.f32.mrf.mxu1  ;;  %v1177_v38 = vadd.f32 %v5723_v63, %v5365_v47  ;;  %v1274_v1 = vadd.f32 %v5725_v61, %v5365_v47 }
 0x181   : > { %v4470_v18 = vpop.eup %4469  ;;  %4495 = vtanh.f32 %v1298_v24  ;;  %v1290_v11 = vadd.f32 %v1289_v35, %v5348_v30  ;;  %v1467_v12 = vpack.c.bf16 %v4464_v33, %v4468_v25  ;;  %v1174_v36 = vadd.f32 %v5702_v23, %v5363_v45  ;;  %v5771_v25 = vld [vmem:[%s5482_s26 + $0x7] sm:$0x1] }
 0x182   : > { %v4472_v58 = vpop.eup %4471  ;;  %4497 = vtanh.f32 %v1193_v22  ;;  %4161 = vmatpush3.bf16.msra.mxu0 %v1468_v50  ;;  %v1475_v26 = vpack.c.bf16 %v4466_v44, %v4470_v18  ;;  %4181 = vmatpush3.bf16.msra.mxu1 %v1476_v62  ;;  %v1271_v63 = vadd.f32 %v5706_v6, %v5363_v45  ;;  %v1169_v50 = vadd.f32 %v5674_v43, %v5374_v60 }
 0x183   : > { %v4474_v5 = vpop.eup %4473  ;;  %4499 = vtanh.f32 %v1290_v11  ;;  %4162 = vmatprep.subr.bf16.mxu0 %v1467_v12  ;;  %v1466_v4 = vpack.c.bf16 %v4472_v58, %v5688_v0  ;;  %v1266_v33 = vadd.f32 %v5678_v59, %v5374_v60  ;;  %v1166_v20 = vadd.f32 %v5658_v19, %v5371_v57 }
 0x184   : > { %v4476_v16 = vpop.eup %4475  ;;  %4182 = vmatprep.subr.bf16.mxu1 %v1475_v26  ;;  %4501 = vtanh.f32 %v1185_v2  ;;  %v1263_v43 = vadd.f32 %v5662_v41, %v5371_v57  ;;  %v1161_v60 = vadd.f32 %v5682_v48, %v5394_v14  ;;  %v1258_v62 = vadd.f32 %v5686_v8, %v5394_v14 }
 0x185   : > { %v4478_v30 = vpop.eup %4477  ;;  %4503 = vtanh.f32 %v1282_v28  ;;  %v1474_v3 = vpack.c.bf16 %v4474_v5, %v4476_v16  ;;  %v1158_v57 = vadd.f32 %v5666_v54, %v5389_v10  ;;  %v1255_v48 = vadd.f32 %v5670_v56, %v5389_v10  ;;  %v5774_v54 = vld [vmem:[%s5482_s26 + $0x6] sm:$0x1] }
 0x186   : > { %v4480_v27 = vpop.eup %4479  ;;  %4163 = vmatpush3.bf16.msra.mxu0 %v1467_v12  ;;  %4505 = vtanh.f32 %v1182_v46  ;;  %4183 = vmatpush3.bf16.msra.mxu1 %v1475_v26  ;;  %v1153_v14 = vadd.f32 %v5642_v53, %v5423_v55  ;;  %v1250_v35 = vadd.f32 %v5646_v9, %v5423_v55  ;;  %v2388_v10 = vsel %vm2366_vm1, %v5771_v25, 0.0 }
 0x187   : > { %v4482_v15 = vpop.eup %4481  ;;  %4164 = vmatprep.subr.bf16.mxu0 %v1466_v4  ;;  %4507 = vtanh.f32 %v1279_v7  ;;  %4184 = vmatprep.subr.bf16.mxu1 %v1474_v3  ;;  %v1465_v47 = vpack.c.bf16 %v4480_v27, %v4478_v30  ;;  %v1150_v56 = vadd.f32 %v5626_v37, %v5415_v52  ;;  %v2385_v18 = vsel %vm2366_vm1, %v5774_v54, 0.0 }
 0x188   : > { %v4484_v34 = vpop.eup %4483  ;;  %4509 = vtanh.f32 %v1177_v38  ;;  %v1247_v55 = vadd.f32 %v5630_v17, %v5415_v52  ;;  %v1145_v11 = vadd.f32 %v5650_v49, %v5449_v42  ;;  %2389 = vadd.xlane.f32.xlu0 %v2388_v10  ;;  %v1242_v58 = vadd.f32 %v5654_v32, %v5449_v42  ;;  %2386 = vadd.xlane.f32.xlu1 %v2385_v18 }
 0x189   : > { %v4486_v0 = vpop.eup %4485  ;;  %4511 = vtanh.f32 %v1274_v1  ;;  %v1473_v23 = vpack.c.bf16 %v4482_v15, %v4484_v34  ;;  %v1142_v28 = vadd.f32 %v5634_v51, %v5458_v21  ;;  %vm1931_vm15 = vcmp.eq.f32.partialorder %v5774_v54, 0.0 }
 0x18a   : > { %v4488_v61 = vpop.eup %4487  ;;  %4165 = vmatpush3.bf16.msra.mxu0 %v1466_v4  ;;  %4513 = vtanh.f32 %v1174_v36  ;;  %4185 = vmatpush3.bf16.msra.mxu1 %v1474_v3  ;;  %vm1932_vm1 = vcmp.eq.f32.partialorder %v5771_v25, 0.0 }
 0x18b   : > { %v4490_v13 = vpop.eup %4489  ;;  %4166 = vmatprep.subr.bf16.mxu0 %v1465_v47  ;;  %4515 = vtanh.f32 %v1271_v63  ;;  %4186 = vmatprep.subr.bf16.mxu1 %v1473_v23 }
 0x18c   : > { %v4492_v45 = vpop.eup %4491  ;;  %4517 = vtanh.f32 %v1169_v50 }
 0x18d   : > { %v4494_v6 = vpop.eup %4493  ;;  %4519 = vtanh.f32 %v1266_v33 }
 0x18e   : > { %v4496_v59 = vpop.eup %4495  ;;  %4167 = vmatpush3.bf16.msra.mxu0 %v1465_v47  ;;  %v1488_v19 = vpack.c.bf16 %v4494_v6, %v4486_v0  ;;  %4521 = vtanh.f32 %v1166_v20  ;;  %4187 = vmatpush3.bf16.msra.mxu1 %v1473_v23  ;;  %v7280_v20 = vlaneseq  ;;  %v5807_v6 = vld [vmem:[%s5482_s26 + $0x1] sm:$0x1] }
 0x18f   : > { %v4498_v44 = vpop.eup %4497  ;;  %v1496_v41 = vpack.c.bf16 %v4496_v59, %v4488_v61  ;;  %4523 = vtanh.f32 %v1263_v43  ;;  %v5803_v43 = vld [vmem:[%s5482_s26] sm:$0x1]  ;;  %vm1926_vm3 = vcmp.eq.f32.partialorder %v5807_v6, 0.0  ;;  %v7290_v59 = vmov 0  }
 0x190   : > { %v4500_v24 = vpop.eup %4499  ;;  %4192 = vmatprep.subr.bf16.mxu0 %v1488_v19  ;;  %v1487_v40 = vpack.c.bf16 %v4498_v44, %v4490_v13  ;;  %4525 = vtanh.f32 %v1161_v60  ;;  %vm1925_vm2 = vcmp.eq.f32.partialorder %v5803_v43, 0.0 }
 0x191   : > { %4169 = vmatmul.mubr.bf16.vlgmr.msra.gmra.mxu0 %v5562_v39  ;;  %4212 = vmatprep.subr.bf16.mxu1 %v1496_v41  ;;  %v1495_v8 = vpack.c.bf16 %v4500_v24, %v4492_v45  ;;  %v4502_v22 = vpop.eup %4501  ;;  %4527 = vtanh.f32 %v1258_v62  ;;  %v5800_v45 = vshrl.u32 %v7280_v20, 7  ;;  %v1933_v62 = vsel %vm1925_vm2, 1, %v7290_v59 }
 0x192   : > { %4189 = vmatmul.mubr.bf16.vlgmr.msra.gmra.mxu1 %v5562_v39  ;;  %4193 = vmatpush3.bf16.msra.mxu0 %v1488_v19  ;;  %v4504_v53 = vpop.eup %4503  ;;  %4529 = vtanh.f32 %v1158_v57  ;;  %v5814_v19 = vpop.permute.xlu0 %1503 }
 0x193   : > { %4213 = vmatpush3.bf16.msra.mxu1 %v1496_v41  ;;  %4194 = vmatprep.subr.bf16.mxu0 %v1487_v40  ;;  %v4506_v2 = vpop.eup %4505  ;;  %4531 = vtanh.f32 %v1255_v48  ;;  %v5811_v60 = vsub.s32 0, %v5800_v45  ;;  %v5819_v41 = vpop.permute.xlu1 %1508 }
 0x194   : > { %4214 = vmatprep.subr.bf16.mxu1 %v1495_v8  ;;  %4208 = vmatprep.mubr.bf16.mxu0 %v5711_v29  ;;  %v4508_v9 = vpop.eup %4507  ;;  %4533 = vtanh.f32 %v1153_v14  ;;  %v1486_v37 = vpack.c.bf16 %v4502_v22, %v4506_v2 }
 0x195   : > { %4228 = vmatprep.mubr.bf16.mxu1 %v5711_v29  ;;  %v4510_v12 = vpop.eup %4509  ;;  %4535 = vtanh.f32 %v1250_v35  ;;  %v1494_v52 = vpack.c.bf16 %v4504_v53, %v4508_v9  ;;  %v1239_v29 = vadd.f32 %v5638_v31, %v5458_v21  ;;  %v1944_v44 = vrot.slane %v1933_v62, %v5811_v60 }
 0x196   : > { %4195 = vmatpush3.bf16.msra.mxu0 %v1487_v40  ;;  %v4512_v17 = vpop.eup %4511  ;;  %4537 = vtanh.f32 %v1150_v56  ;;  %v5821_v24 = vpop.permute.xlu0 %1513 }
 0x197   : > { %4215 = vmatpush3.bf16.msra.mxu1 %v1495_v8  ;;  %4196 = vmatprep.subr.bf16.mxu0 %v1486_v37  ;;  %v4514_v49 = vpop.eup %4513  ;;  %4539 = vtanh.f32 %v1247_v55  ;;  %vm5823_vm4 = vcmp.eq.s32.totalorder %v1944_v44, 1  ;;  %v5838_v2 = vpop.permute.xlu1 %1518 }
 0x198   : > { %4216 = vmatprep.subr.bf16.mxu1 %v1494_v52  ;;  %v4516_v26 = vpop.eup %4515  ;;  %4541 = vtanh.f32 %v1145_v11  ;;  %v1485_v5 = vpack.c.bf16 %v4510_v12, %v4514_v49 }
 0x199   : > { %v4518_v42 = vpop.eup %4517  ;;  %4543 = vtanh.f32 %v1242_v58  ;;  %v1493_v32 = vpack.c.bf16 %v4512_v17, %v4516_v26 }
 0x19a   : > { %4197 = vmatpush3.bf16.msra.mxu0 %v1486_v37  ;;  %v4520_v46 = vpop.eup %4519  ;;  %4545 = vtanh.f32 %v1142_v28 }
 0x19b   : > { %4217 = vmatpush3.bf16.msra.mxu1 %v1494_v52  ;;  %4198 = vmatprep.subr.bf16.mxu0 %v1485_v5  ;;  %v4522_v51 = vpop.eup %4521  ;;  %4547 = vtanh.f32 %v1239_v29 }
 0x19c   : > { %4218 = vmatprep.subr.bf16.mxu1 %v1493_v32  ;;  %v4524_v16 = vpop.eup %4523  ;;  %v1484_v7 = vpack.c.bf16 %v4518_v42, %v4522_v51 }
 0x19d   : > { %v4526_v30 = vpop.eup %4525  ;;  %v1492_v21 = vpack.c.bf16 %v4520_v46, %v4524_v16 }
 0x19e   : > { %4199 = vmatpush3.bf16.msra.mxu0 %v1485_v5  ;;  %v4528_v31 = vpop.eup %4527 }
 0x19f   : > { %4219 = vmatpush3.bf16.msra.mxu1 %v1493_v32  ;;  %4200 = vmatprep.subr.bf16.mxu0 %v1484_v7  ;;  %v4530_v38 = vpop.eup %4529 }
 0x1a0   : > { %4220 = vmatprep.subr.bf16.mxu1 %v1492_v21  ;;  %v4532_v4 = vpop.eup %4531  ;;  %v1483_v27 = vpack.c.bf16 %v4526_v30, %v4530_v38 }
 0x1a1   : > { %v4534_v1 = vpop.eup %4533  ;;  %v1491_v3 = vpack.c.bf16 %v4528_v31, %v4532_v4 }
 0x1a2   : > { %4201 = vmatpush3.bf16.msra.mxu0 %v1484_v7  ;;  %v4536_v15 = vpop.eup %4535 }
 0x1a3   : > { %4221 = vmatpush3.bf16.msra.mxu1 %v1492_v21  ;;  %4202 = vmatprep.subr.bf16.mxu0 %v1483_v27  ;;  %v4538_v36 = vpop.eup %4537 }
 0x1a4   : > { %4222 = vmatprep.subr.bf16.mxu1 %v1491_v3  ;;  %v4540_v34 = vpop.eup %4539  ;;  %v1482_v63 = vpack.c.bf16 %v4534_v1, %v4538_v36  ;;  %v5894_v1 = vld [vmem:[%s5482_s26 + $0x3] sm:$0x1] }
 0x1a5   : > { %v4542_v0 = vpop.eup %4541  ;;  %v1490_v50 = vpack.c.bf16 %v4536_v15, %v4540_v34  ;;  %vm1928_vm8 = vcmp.eq.f32.partialorder %v5894_v1, 0.0 }
 0x1a6   : > { %4203 = vmatpush3.bf16.msra.mxu0 %v1483_v27  ;;  %v4544_v47 = vpop.eup %4543  ;;  %v5890_v27 = vld [vmem:[%s5482_s26 + $0x2] sm:$0x1]  ;;  %v1936_v15 = vsel %vm1928_vm8, 1, %v7290_v59 }
 0x1a7   : > { %4223 = vmatpush3.bf16.msra.mxu1 %v1491_v3  ;;  %4204 = vmatprep.subr.bf16.mxu0 %v1482_v63  ;;  %v4546_v61 = vpop.eup %4545  ;;  %vm1927_vm7 = vcmp.eq.f32.partialorder %v5890_v27, 0.0  ;;  %v1956_v34 = vrot.slane %v1936_v15, %v5811_v60 }
 0x1a8   : > { %4224 = vmatprep.subr.bf16.mxu1 %v1490_v50  ;;  %v4548_v33 = vpop.eup %4547  ;;  %v1481_v23 = vpack.c.bf16 %v4542_v0, %v4546_v61  ;;  %v1935_v3 = vsel %vm1927_vm7, 1, %v7290_v59  ;;  %vm3351_vm7 = vcmask 1041409  }
 0x1a9   : > { %v1489_v13 = vpack.c.bf16 %v4544_v47, %v4548_v33  ;;  %v1952_v36 = vrot.slane %v1935_v3, %v5811_v60  ;;  %vm5907_vm10 = vcmp.eq.s32.totalorder %v1956_v34, 1  ;;  %v1939_v34 = vsel %vm1931_vm15, 1, %v7290_v59 }
 0x1aa   : > { %4205 = vmatpush3.bf16.msra.mxu0 %v1482_v63 }
 0x1ab   : > { %4225 = vmatpush3.bf16.msra.mxu1 %v1490_v50  ;;  %4206 = vmatprep.subr.bf16.mxu0 %v1481_v23  ;;  %vm5901_vm9 = vcmp.eq.s32.totalorder %v1952_v36, 1 }
 0x1ac   : > { %4226 = vmatprep.subr.bf16.mxu1 %v1489_v13 }
 0x1ae   : > { %4207 = vmatpush3.bf16.msra.mxu0 %v1481_v23 }
 0x1af   : > { %4227 = vmatpush3.bf16.msra.mxu1 %v1489_v13 }
 0x1b1   : > { %4209 = vmatmul.mubr.bf16.vlgmr.msra.gmra.mxu0 %v5562_v39 }
 0x1b2   : > { %4229 = vmatmul.mubr.bf16.vlgmr.msra.gmra.mxu1 %v5562_v39  ;;  %v1934_v39 = vsel %vm1926_vm3, 1, %v7290_v59 }
 0x1b3   : > { %v1948_v57 = vrot.slane %v1934_v39, %v5811_v60 }
 0x1b5   : > { %vm5828_vm5 = vcmp.eq.s32.totalorder %v1948_v57, 1 }
 0x20f   : > { %v4090_v48 = vpop.f32.mrf.mxu0 }
 0x210   : > { %v1576_v14 = vadd.f32 %v4090_v48, %v5821_v24  ;;  %v4110_v8 = vpop.f32.mrf.mxu1 }
 0x211   : > { %v1625_v35 = vadd.f32 %v4110_v8, %v5821_v24  ;;  %v1567_v10 = vpop.f32.mrf.mxu0 }
 0x212   : > { %v1568_v53 = vadd.f32 %v1567_v10, %v5814_v19  ;;  %v1616_v56 = vpop.f32.mrf.mxu1  ;;  %v5836_v18 = vsel %vm5823_vm4, -1e+09, %v1576_v14 }
 0x213   : > { %v4091_v55 = vpop.f32.mrf.mxu0  ;;  %v5842_v9 = vsel %vm5828_vm5, -1e+09, %v1625_v35  ;;  %v2020_v11 = vsel %vm2013_vm6, %v5836_v18, -inf  ;;  %v1617_v58 = vadd.f32 %v1616_v56, %v5814_v19 }
 0x214   : > { %v1579_v37 = vadd.f32 %v4091_v55, %v5838_v2  ;;  %v2032_v12 = vsel %vm2013_vm6, %v5842_v9, -inf  ;;  %2021 = vmax.xlane.f32.xlu1 %v2020_v11  ;;  %v5852_v17 = vsel %vm5823_vm4, -1e+09, %v1568_v53  ;;  %v4111_v28 = vpop.f32.mrf.mxu1 }
 0x215   : > { %2033 = vmax.xlane.f32.xlu0 %v2032_v12  ;;  %v1570_v52 = vpop.f32.mrf.mxu0  ;;  %v2014_v5 = vsel %vm2013_vm6, %v5852_v17, -inf  ;;  %v1628_v32 = vadd.f32 %v4111_v28, %v5838_v2  ;;  %v5870_v46 = vsel %vm5828_vm5, -1e+09, %v1617_v58 }
 0x216   : > { %v1571_v49 = vadd.f32 %v1570_v52, %v5819_v41  ;;  %v5857_v29 = vsel %vm5823_vm4, -1e+09, %v1579_v37  ;;  %v1619_v51 = vpop.f32.mrf.mxu1  ;;  %v2026_v7 = vsel %vm2013_vm6, %v5870_v46, -inf }
 0x217   : > { %v2023_v26 = vsel %vm2013_vm6, %v5857_v29, -inf  ;;  %v1620_v30 = vadd.f32 %v1619_v51, %v5819_v41  ;;  %v5879_v21 = vsel %vm5828_vm5, -1e+09, %v1628_v32 }
 0x218   : > { %2024 = vmax.xlane.f32.xlu1 %v2023_v26  ;;  %v5865_v42 = vsel %vm5823_vm4, -1e+09, %v1571_v49  ;;  %v2035_v31 = vsel %vm2013_vm6, %v5879_v21, -inf  ;;  %vm3202_vm4 = vcmask 130112  }
 0x219   : > { %2015 = vmax.xlane.f32.xlu0 %v2014_v5  ;;  %v2017_v16 = vsel %vm2013_vm6, %v5865_v42, -inf  ;;  %v5885_v38 = vsel %vm5828_vm5, -1e+09, %v1620_v30  ;;  %v4763_v30 = vld [vmem:[%s5482_s26 + $0x5] sm:$0x1]  ;;  %vm3209_vm5 = vcmask 195712  }
 0x21a   : > { %v2029_v4 = vsel %vm2013_vm6, %v5885_v38, -inf  ;;  %vm1930_vm12 = vcmp.eq.f32.partialorder %v4763_v30, 0.0 }
 0x21c   : > { %2018 = vmax.xlane.f32.xlu1 %v2017_v16 }
 0x21d   : > { %2027 = vmax.xlane.f32.xlu0 %v2026_v7  ;;  %v5966_v7 = vld [vmem:[%s5482_s26 + $0x4] sm:$0x1] }
 0x21e   : > { %vm1929_vm11 = vcmp.eq.f32.partialorder %v5966_v7, 0.0 }
 0x221   : > { %2036 = vmax.xlane.f32.xlu0 %v2035_v31  ;;  %v1937_v31 = vsel %vm1929_vm11, 1, %v7290_v59 }
 0x222   : > { %v1960_v3 = vrot.slane %v1937_v31, %v5811_v60 }
 0x224   : > { %vm5974_vm13 = vcmp.eq.s32.totalorder %v1960_v3, 1 }
 0x225   : > { %2030 = vmax.xlane.f32.xlu0 %v2029_v4  ;;  %v1938_v4 = vsel %vm1930_vm12, 1, %v7290_v59 }
 0x226   : > { %v1964_v15 = vrot.slane %v1938_v4, %v5811_v60 }
 0x228   : > { %vm5980_vm14 = vcmp.eq.s32.totalorder %v1964_v15, 1 }
 0x230   : > { %v4130_v63 = vpop.f32.mrf.mxu0 }
 0x231   : > { %v4150_v0 = vpop.f32.mrf.mxu1  ;;  %v1674_v47 = vadd.f32 %v4130_v63, %v5821_v24 }
 0x232   : > { %v1723_v61 = vadd.f32 %v4150_v0, %v5821_v24  ;;  %v1665_v33 = vpop.f32.mrf.mxu0 }
 0x233   : > { %v1714_v23 = vpop.f32.mrf.mxu1  ;;  %v5914_v39 = vsel %vm5901_vm9, -1e+09, %v1674_v47  ;;  %v1666_v40 = vadd.f32 %v1665_v33, %v5814_v19 }
 0x234   : > { %v1715_v62 = vadd.f32 %v1714_v23, %v5814_v19  ;;  %v4131_v44 = vpop.f32.mrf.mxu0  ;;  %v2044_v48 = vsel %vm2013_vm6, %v5914_v39, -inf  ;;  %v5926_v22 = vsel %vm5907_vm10, -1e+09, %v1723_v61 }
 0x235   : > { %v4151_v57 = vpop.f32.mrf.mxu1  ;;  %v1677_v14 = vadd.f32 %v4131_v44, %v5838_v2  ;;  %2045 = vmax.xlane.f32.xlu1 %v2044_v48  ;;  %v2056_v11 = vsel %vm2013_vm6, %v5926_v22, -inf  ;;  %v5940_v12 = vsel %vm5901_vm9, -1e+09, %v1666_v40 }
 0x236   : > { %v5922_v8 = vsel %vm5907_vm10, -1e+09, %v1715_v62  ;;  %v1726_v53 = vadd.f32 %v4151_v57, %v5838_v2  ;;  %v1668_v55 = vpop.f32.mrf.mxu0  ;;  %v2038_v49 = vsel %vm2013_vm6, %v5940_v12, -inf }
 0x237   : > { %v1717_v35 = vpop.f32.mrf.mxu1  ;;  %v2050_v10 = vsel %vm2013_vm6, %v5922_v8, -inf  ;;  %v5933_v56 = vsel %vm5901_vm9, -1e+09, %v1677_v14  ;;  %v1669_v52 = vadd.f32 %v1668_v55, %v5819_v41 }
 0x238   : > { %2051 = vmax.xlane.f32.xlu0 %v2050_v10  ;;  %v1718_v37 = vadd.f32 %v1717_v35, %v5819_v41  ;;  %v2047_v58 = vsel %vm2013_vm6, %v5933_v56, -inf  ;;  %v5947_v28 = vsel %vm5907_vm10, -1e+09, %v1726_v53 }
 0x239   : > { %2057 = vmax.xlane.f32.xlu1 %v2056_v11  ;;  %v2059_v5 = vsel %vm2013_vm6, %v5947_v28, -inf  ;;  %v5959_v32 = vsel %vm5901_vm9, -1e+09, %v1669_v52 }
 0x23a   : > { %v5953_v26 = vsel %vm5907_vm10, -1e+09, %v1718_v37  ;;  %v2041_v16 = vsel %vm2013_vm6, %v5959_v32, -inf }
 0x23b   : > { %v2053_v51 = vsel %vm2013_vm6, %v5953_v26, -inf }
 0x23c   : > { %2048 = vmax.xlane.f32.xlu0 %v2047_v58 }
 0x23d   : > { %2039 = vmax.xlane.f32.xlu1 %v2038_v49 }
 0x240   : > { %2060 = vmax.xlane.f32.xlu0 %v2059_v5 }
 0x241   : > { %2054 = vmax.xlane.f32.xlu1 %v2053_v51 }
 0x244   : > { %2042 = vmax.xlane.f32.xlu0 %v2041_v16 }
 0x251   : > { %v4170_v36 = vpop.f32.mrf.mxu0 }
 0x252   : > { %v1772_v63 = vadd.f32 %v4170_v36, %v5821_v24  ;;  %v4190_v0 = vpop.f32.mrf.mxu1 }
 0x253   : > { %v1821_v50 = vadd.f32 %v4190_v0, %v5821_v24  ;;  %v1763_v47 = vpop.f32.mrf.mxu0  ;;  %v1968_v0 = vrot.slane %v1939_v34, %v5811_v60 }
 0x254   : > { %v1764_v33 = vadd.f32 %v1763_v47, %v5814_v19  ;;  %v1812_v23 = vpop.f32.mrf.mxu1  ;;  %v5987_v13 = vsel %vm5974_vm13, -1e+09, %v1772_v63  ;;  %v1940_v63 = vsel %vm1932_vm1, 1, %v7290_v59 }
 0x255   : > { %v1813_v62 = vadd.f32 %v1812_v23, %v5814_v19  ;;  %v4171_v44 = vpop.f32.mrf.mxu0  ;;  %v2068_v57 = vsel %vm2013_vm6, %v5987_v13, -inf  ;;  %v5998_v14 = vsel %vm5980_vm14, -1e+09, %v1821_v50  ;;  %v1972_v50 = vrot.slane %v1940_v63, %v5811_v60 }
 0x256   : > { %v4191_v48 = vpop.f32.mrf.mxu1  ;;  %2069 = vmax.xlane.f32.xlu1 %v2068_v57  ;;  %v5994_v40 = vsel %vm5974_vm13, -1e+09, %v1764_v33  ;;  %v1775_v53 = vadd.f32 %v4171_v44, %v5838_v2  ;;  %v2080_v58 = vsel %vm2013_vm6, %v5998_v14, -inf  ;;  %vm6044_vm2 = vcmp.eq.s32.totalorder %v1968_v0, 1 }
 0x257   : > { %v1766_v35 = vpop.f32.mrf.mxu0  ;;  %v2062_v10 = vsel %vm2013_vm6, %v5994_v40, -inf  ;;  %v6006_v37 = vsel %vm5980_vm14, -1e+09, %v1813_v62  ;;  %v1824_v51 = vadd.f32 %v4191_v48, %v5838_v2  ;;  %vm6050_vm3 = vcmp.eq.s32.totalorder %v1972_v50, 1 }
 0x258   : > { %v1767_v55 = vadd.f32 %v1766_v35, %v5819_v41  ;;  %v1815_v11 = vpop.f32.mrf.mxu1  ;;  %2063 = vmax.xlane.f32.xlu0 %v2062_v10  ;;  %v2074_v5 = vsel %vm2013_vm6, %v6006_v37, -inf  ;;  %v6020_v16 = vsel %vm5974_vm13, -1e+09, %v1775_v53 }
 0x259   : > { %v1816_v52 = vadd.f32 %v1815_v11, %v5819_v41  ;;  %v2071_v4 = vsel %vm2013_vm6, %v6020_v16, -inf  ;;  %v6032_v3 = vsel %vm5980_vm14, -1e+09, %v1824_v51 }
 0x25a   : > { %2081 = vmax.xlane.f32.xlu1 %v2080_v58  ;;  %v6013_v49 = vsel %vm5974_vm13, -1e+09, %v1767_v55  ;;  %v2083_v36 = vsel %vm2013_vm6, %v6032_v3, -inf }
 0x25b   : > { %v2065_v30 = vsel %vm2013_vm6, %v6013_v49, -inf  ;;  %v6026_v31 = vsel %vm5980_vm14, -1e+09, %v1816_v52 }
 0x25c   : > { %2075 = vmax.xlane.f32.xlu0 %v2074_v5  ;;  %v2077_v15 = vsel %vm2013_vm6, %v6026_v31, -inf }
 0x25e   : > { %2066 = vmax.xlane.f32.xlu1 %v2065_v30 }
 0x260   : > { %2072 = vmax.xlane.f32.xlu0 %v2071_v4 }
 0x262   : > { %2078 = vmax.xlane.f32.xlu1 %v2077_v15 }
 0x264   : > { %2084 = vmax.xlane.f32.xlu0 %v2083_v36 }
 0x271   : > { %v4210_v47 = vpop.f32.mrf.mxu0 }
 0x272   : > { %v1870_v33 = vadd.f32 %v4210_v47, %v5821_v24  ;;  %v4230_v23 = vpop.f32.mrf.mxu1 }
 0x273   : > { %v1919_v54 = vadd.f32 %v4230_v23, %v5821_v24  ;;  %v1861_v62 = vpop.f32.mrf.mxu0  ;;  %v6110_v23 = vpop.xlane.xlu0 %2371 }
 0x274   : > { %v1862_v59 = vadd.f32 %v1861_v62, %v5814_v19  ;;  %v1910_v44 = vpop.f32.mrf.mxu1  ;;  %v6057_v57 = vsel %vm6044_vm2, -1e+09, %v1870_v33  ;;  %v6108_v33 = vpop.xlane.xlu1 %2368 }
 0x275   : > { %v1911_v48 = vadd.f32 %v1910_v44, %v5814_v19  ;;  %v4211_v35 = vpop.f32.mrf.mxu0  ;;  %v2092_v10 = vsel %vm2013_vm6, %v6057_v57, -inf  ;;  %v6068_v55 = vsel %vm6050_vm3, -1e+09, %v1919_v54 }
 0x276   : > { %v4231_v53 = vpop.f32.mrf.mxu1  ;;  %2093 = vmax.xlane.f32.xlu1 %v2092_v10  ;;  %v6064_v24 = vsel %vm6044_vm2, -1e+09, %v1862_v59  ;;  %v1873_v19 = vadd.f32 %v4211_v35, %v5838_v2  ;;  %v2104_v30 = vsel %vm2013_vm6, %v6068_v55, -inf }
 0x277   : > { %v1864_v11 = vpop.f32.mrf.mxu0  ;;  %v2086_v58 = vsel %vm2013_vm6, %v6064_v24, -inf  ;;  %v6076_v51 = vsel %vm6050_vm3, -1e+09, %v1911_v48  ;;  %v1922_v34 = vadd.f32 %v4231_v53, %v5838_v2  ;;  %v6114_v62 = vpop.xlane.xlu0 %2377 }
 0x278   : > { %v1865_v52 = vadd.f32 %v1864_v11, %v5819_v41  ;;  %v1913_v5 = vpop.f32.mrf.mxu1  ;;  %2087 = vmax.xlane.f32.xlu0 %v2086_v58  ;;  %v2098_v36 = vsel %vm2013_vm6, %v6076_v51, -inf  ;;  %v6090_v63 = vsel %vm6044_vm2, -1e+09, %v1873_v19  ;;  %v6112_v54 = vpop.xlane.xlu1 %2374 }
 0x279   : > { %v1914_v4 = vadd.f32 %v1913_v5, %v5819_v41  ;;  %v2095_v50 = vsel %vm2013_vm6, %v6090_v63, -inf  ;;  %v6102_v2 = vsel %vm6050_vm3, -1e+09, %v1922_v34 }
 0x27a   : > { %2105 = vmax.xlane.f32.xlu1 %v2104_v30  ;;  %v6083_v15 = vsel %vm6044_vm2, -1e+09, %v1865_v52  ;;  %v2107_v61 = vsel %vm2013_vm6, %v6102_v2, -inf }
 0x27b   : > { %v2089_v0 = vsel %vm2013_vm6, %v6083_v15, -inf  ;;  %v6096_v41 = vsel %vm6050_vm3, -1e+09, %v1914_v4  ;;  %v6118_v25 = vpop.xlane.xlu0 %2383 }
 0x27c   : > { %2099 = vmax.xlane.f32.xlu0 %v2098_v36  ;;  %v2101_v47 = vsel %vm2013_vm6, %v6096_v41, -inf  ;;  %v6116_v59 = vpop.xlane.xlu1 %2380 }
 0x27e   : > { %2090 = vmax.xlane.f32.xlu1 %v2089_v0 }
 0x27f   : > { %v6122_v48 = vpop.xlane.xlu0 %2389 }
 0x280   : > { %2096 = vmax.xlane.f32.xlu0 %v2095_v50  ;;  %v6120_v44 = vpop.xlane.xlu1 %2386 }
 0x282   : > { %2102 = vmax.xlane.f32.xlu1 %v2101_v47 }
 0x284   : > { %2108 = vmax.xlane.f32.xlu0 %v2107_v61 }
 0x29d   : > { %v2022_v35 = vpop.xlane.xlu1 %2021 }
 0x29e   : > { %v2034_v10 = vpop.xlane.xlu0 %2033  ;;  %v2112_v53 = vsub.f32 %v5836_v18, %v2022_v35 }
 0x29f   : > { %v2116_v11 = vsub.f32 %v5842_v9, %v2034_v10 }
 0x2a0   : > { %v2146_v58 = vmul.f32 1.442695, %v2112_v53 }
 0x2a1   : > { %v2154_v19 = vmul.f32 1.442695, %v2116_v11  ;;  %v2025_v52 = vpop.xlane.xlu1 %2024 }
 0x2a2   : > { %4549 = vpow2.f32 %v2146_v58  ;;  %v2113_v5 = vsub.f32 %v5857_v29, %v2025_v52  ;;  %v2016_v30 = vpop.xlane.xlu0 %2015 }
 0x2a3   : > { %v2110_v4 = vsub.f32 %v5852_v17, %v2016_v30  ;;  %4551 = vpow2.f32 %v2154_v19 }
 0x2a4   : > { %v2148_v36 = vmul.f32 1.442695, %v2113_v5 }
 0x2a5   : > { %v2142_v34 = vmul.f32 1.442695, %v2110_v4  ;;  %v2019_v0 = vpop.xlane.xlu1 %2018 }
 0x2a6   : > { %4553 = vpow2.f32 %v2148_v36  ;;  %v2028_v50 = vpop.xlane.xlu0 %2027  ;;  %v2111_v18 = vsub.f32 %v5865_v42, %v2019_v0 }
 0x2a7   : > { %v2114_v47 = vsub.f32 %v5870_v46, %v2028_v50  ;;  %4555 = vpow2.f32 %v2142_v34 }
 0x2a8   : > { %v2144_v29 = vmul.f32 1.442695, %v2111_v18 }
 0x2a9   : > { %v2150_v9 = vmul.f32 1.442695, %v2114_v47 }
 0x2aa   : > { %v2037_v61 = vpop.xlane.xlu0 %2036 }
 0x2ab   : > { %v2117_v35 = vsub.f32 %v5879_v21, %v2037_v61  ;;  %4557 = vpow2.f32 %v2150_v9 }
 0x2ad   : > { %v2156_v10 = vmul.f32 1.442695, %v2117_v35 }
 0x2ae   : > { %v2031_v53 = vpop.xlane.xlu0 %2030 }
 0x2af   : > { %v6131_v17 = vpop.eup %4549  ;;  %4559 = vpow2.f32 %v2156_v10  ;;  %v2115_v11 = vsub.f32 %v5885_v38, %v2031_v53 }
 0x2b0   : > { %v2212_v58 = vsel %vm2013_vm6, %v6131_v17, 0.0  ;;  %v6136_v46 = vpop.eup %4551  ;;  %4561 = vpow2.f32 %v2144_v29 }
 0x2b1   : > { %v2152_v42 = vmul.f32 1.442695, %v2115_v11  ;;  %2213 = vadd.xlane.f32.xlu1 %v2212_v58  ;;  %v2224_v21 = vsel %vm2013_vm6, %v6136_v46, 0.0 }
 0x2b3   : > { %v6138_v19 = vpop.eup %4553  ;;  %4563 = vpow2.f32 %v2152_v42 }
 0x2b4   : > { %v2215_v52 = vsel %vm2013_vm6, %v6138_v19, 0.0  ;;  %v6144_v5 = vpop.eup %4555 }
 0x2b5   : > { %2225 = vadd.xlane.f32.xlu1 %v2224_v21  ;;  %2216 = vadd.xlane.f32.xlu0 %v2215_v52  ;;  %v2206_v38 = vsel %vm2013_vm6, %v6144_v5, 0.0 }
 0x2b8   : > { %v6148_v30 = vpop.eup %4557 }
 0x2b9   : > { %2207 = vadd.xlane.f32.xlu1 %v2206_v38  ;;  %v2218_v36 = vsel %vm2013_vm6, %v6148_v30, 0.0 }
 0x2bc   : > { %v6150_v4 = vpop.eup %4559 }
 0x2bd   : > { %2219 = vadd.xlane.f32.xlu1 %v2218_v36  ;;  %v2227_v34 = vsel %vm2013_vm6, %v6150_v4, 0.0  ;;  %v6156_v0 = vpop.eup %4561 }
 0x2be   : > { %v2046_v50 = vpop.xlane.xlu1 %2045  ;;  %2228 = vadd.xlane.f32.xlu0 %v2227_v34  ;;  %v2209_v61 = vsel %vm2013_vm6, %v6156_v0, 0.0 }
 0x2bf   : > { %v2120_v47 = vsub.f32 %v5914_v39, %v2046_v50 }
 0x2c0   : > { %v6161_v35 = vpop.eup %4563 }
 0x2c1   : > { %v2052_v18 = vpop.xlane.xlu0 %2051  ;;  %v2162_v9 = vmul.f32 1.442695, %v2120_v47  ;;  %v2221_v42 = vsel %vm2013_vm6, %v6161_v35, 0.0 }
 0x2c2   : > { %v2058_v29 = vpop.xlane.xlu1 %2057  ;;  %2210 = vadd.xlane.f32.xlu0 %v2209_v61  ;;  %v2122_v11 = vsub.f32 %v5922_v8, %v2052_v18 }
 0x2c3   : > { %4565 = vpow2.f32 %v2162_v9  ;;  %v2124_v10 = vsub.f32 %v5926_v22, %v2058_v29 }
 0x2c4   : > { %v2166_v36 = vmul.f32 1.442695, %v2122_v11 }
 0x2c5   : > { %v2049_v53 = vpop.xlane.xlu0 %2048  ;;  %v2170_v58 = vmul.f32 1.442695, %v2124_v10 }
 0x2c6   : > { %v2040_v39 = vpop.xlane.xlu1 %2039  ;;  %2222 = vadd.xlane.f32.xlu0 %v2221_v42  ;;  %v2121_v52 = vsub.f32 %v5933_v56, %v2049_v53 }
 0x2c7   : > { %4567 = vpow2.f32 %v2170_v58  ;;  %v2118_v21 = vsub.f32 %v5940_v12, %v2040_v39 }
 0x2c8   : > { %v2164_v47 = vmul.f32 1.442695, %v2121_v52 }
 0x2c9   : > { %v2061_v38 = vpop.xlane.xlu0 %2060  ;;  %v2158_v34 = vmul.f32 1.442695, %v2118_v21 }
 0x2ca   : > { %v2055_v50 = vpop.xlane.xlu1 %2054  ;;  %v2125_v18 = vsub.f32 %v5947_v28, %v2061_v38 }
 0x2cb   : > { %4569 = vpow2.f32 %v2158_v34  ;;  %v2123_v22 = vsub.f32 %v5953_v26, %v2055_v50 }
 0x2cc   : > { %4571 = vpow2.f32 %v2166_v36  ;;  %v2172_v56 = vmul.f32 1.442695, %v2125_v18 }
 0x2cd   : > { %v2043_v8 = vpop.xlane.xlu0 %2042  ;;  %v2168_v61 = vmul.f32 1.442695, %v2123_v22  ;;  %4573 = vpow2.f32 %v2164_v47 }
 0x2ce   : > { %v2119_v9 = vsub.f32 %v5959_v32, %v2043_v8 }
 0x2d0   : > { %v2160_v29 = vmul.f32 1.442695, %v2119_v9  ;;  %v6172_v10 = vpop.eup %4565 }
 0x2d1   : > { %v2236_v12 = vsel %vm2013_vm6, %v6172_v10, 0.0 }
 0x2d2   : > { %4575 = vpow2.f32 %v2160_v29  ;;  %2237 = vadd.xlane.f32.xlu1 %v2236_v12 }
 0x2d3   : > { %4577 = vpow2.f32 %v2168_v61 }
 0x2d4   : > { %v6176_v26 = vpop.eup %4567  ;;  %4579 = vpow2.f32 %v2172_v56 }
 0x2d5   : > { %v2248_v28 = vsel %vm2013_vm6, %v6176_v26, 0.0 }
 0x2d6   : > { %2249 = vadd.xlane.f32.xlu1 %v2248_v28 }
 0x2d8   : > { %v6180_v32 = vpop.eup %4569 }
 0x2d9   : > { %v2230_v53 = vsel %vm2013_vm6, %v6180_v32, 0.0  ;;  %v6184_v11 = vpop.eup %4571 }
 0x2da   : > { %2231 = vadd.xlane.f32.xlu0 %v2230_v53  ;;  %v6186_v58 = vpop.eup %4573  ;;  %v2242_v42 = vsel %vm2013_vm6, %v6184_v11, 0.0 }
 0x2db   : > { %v2239_v47 = vsel %vm2013_vm6, %v6186_v58, 0.0 }
 0x2de   : > { %2243 = vadd.xlane.f32.xlu0 %v2242_v42 }
 0x2df   : > { %v6190_v39 = vpop.eup %4575  ;;  %v2070_v21 = vpop.xlane.xlu1 %2069 }
 0x2e0   : > { %v2128_v52 = vsub.f32 %v5987_v13, %v2070_v21  ;;  %v2233_v38 = vsel %vm2013_vm6, %v6190_v39, 0.0  ;;  %v6195_v36 = vpop.eup %4577 }
 0x2e1   : > { %2234 = vadd.xlane.f32.xlu1 %v2233_v38  ;;  %v2064_v34 = vpop.xlane.xlu0 %2063  ;;  %v6200_v8 = vpop.eup %4579  ;;  %v2245_v61 = vsel %vm2013_vm6, %v6195_v36, 0.0 }
 0x2e2   : > { %v2178_v50 = vmul.f32 1.442695, %v2128_v52  ;;  %v2126_v22 = vsub.f32 %v5994_v40, %v2064_v34  ;;  %2240 = vadd.xlane.f32.xlu0 %v2239_v47  ;;  %v2251_v12 = vsel %vm2013_vm6, %v6200_v8, 0.0 }
 0x2e3   : > { %v2082_v18 = vpop.xlane.xlu1 %2081 }
 0x2e4   : > { %4581 = vpow2.f32 %v2178_v50  ;;  %v2174_v9 = vmul.f32 1.442695, %v2126_v22  ;;  %v2132_v13 = vsub.f32 %v5998_v14, %v2082_v18 }
 0x2e5   : > { %2246 = vadd.xlane.f32.xlu1 %v2245_v61  ;;  %v2076_v29 = vpop.xlane.xlu0 %2075 }
 0x2e6   : > { %4583 = vpow2.f32 %v2174_v9  ;;  %v2186_v56 = vmul.f32 1.442695, %v2132_v13  ;;  %v2130_v40 = vsub.f32 %v6006_v37, %v2076_v29  ;;  %2252 = vadd.xlane.f32.xlu0 %v2251_v12 }
 0x2e7   : > { %v2067_v28 = vpop.xlane.xlu1 %2066 }
 0x2e8   : > { %4585 = vpow2.f32 %v2186_v56  ;;  %v2182_v53 = vmul.f32 1.442695, %v2130_v40  ;;  %v2127_v42 = vsub.f32 %v6013_v49, %v2067_v28 }
 0x2e9   : > { %v2073_v21 = vpop.xlane.xlu0 %2072 }
 0x2ea   : > { %4587 = vpow2.f32 %v2182_v53  ;;  %v2176_v14 = vmul.f32 1.442695, %v2127_v42  ;;  %v2129_v52 = vsub.f32 %v6020_v16, %v2073_v21 }
 0x2eb   : > { %v2079_v38 = vpop.xlane.xlu1 %2078 }
 0x2ec   : > { %4589 = vpow2.f32 %v2176_v14  ;;  %v2180_v34 = vmul.f32 1.442695, %v2129_v52  ;;  %v2131_v50 = vsub.f32 %v6026_v31, %v2079_v38 }
 0x2ed   : > { %v2085_v37 = vpop.xlane.xlu0 %2084 }
 0x2ee   : > { %4591 = vpow2.f32 %v2180_v34  ;;  %v2184_v22 = vmul.f32 1.442695, %v2131_v50  ;;  %v2133_v47 = vsub.f32 %v6032_v3, %v2085_v37 }
 0x2f0   : > { %4593 = vpow2.f32 %v2184_v22  ;;  %v2188_v18 = vmul.f32 1.442695, %v2133_v47 }
 0x2f1   : > { %v6212_v9 = vpop.eup %4581 }
 0x2f2   : > { %4595 = vpow2.f32 %v2188_v18  ;;  %v2260_v49 = vsel %vm2013_vm6, %v6212_v9, 0.0 }
 0x2f3   : > { %v6216_v13 = vpop.eup %4583  ;;  %2261 = vadd.xlane.f32.xlu1 %v2260_v49 }
 0x2f4   : > { %v2254_v16 = vsel %vm2013_vm6, %v6216_v13, 0.0 }
 0x2f5   : > { %v6220_v31 = vpop.eup %4585  ;;  %2255 = vadd.xlane.f32.xlu0 %v2254_v16 }
 0x2f6   : > { %v2272_v3 = vsel %vm2013_vm6, %v6220_v31, 0.0 }
 0x2f7   : > { %v6224_v61 = vpop.eup %4587  ;;  %2273 = vadd.xlane.f32.xlu1 %v2272_v3 }
 0x2f8   : > { %v2266_v29 = vsel %vm2013_vm6, %v6224_v61, 0.0 }
 0x2f9   : > { %v6228_v56 = vpop.eup %4589  ;;  %2267 = vadd.xlane.f32.xlu0 %v2266_v29 }
 0x2fa   : > { %v2257_v40 = vsel %vm2013_vm6, %v6228_v56, 0.0 }
 0x2fb   : > { %v6232_v12 = vpop.eup %4591  ;;  %2258 = vadd.xlane.f32.xlu1 %v2257_v40 }
 0x2fc   : > { %v2263_v28 = vsel %vm2013_vm6, %v6232_v12, 0.0 }
 0x2fd   : > { %v6236_v53 = vpop.eup %4593  ;;  %2264 = vadd.xlane.f32.xlu0 %v2263_v28 }
 0x2fe   : > { %v2269_v42 = vsel %vm2013_vm6, %v6236_v53, 0.0 }
 0x2ff   : > { %v6240_v21 = vpop.eup %4595  ;;  %v2094_v14 = vpop.xlane.xlu1 %2093  ;;  %2270 = vadd.xlane.f32.xlu1 %v2269_v42 }
 0x300   : > { %v2136_v52 = vsub.f32 %v6057_v57, %v2094_v14  ;;  %v2275_v38 = vsel %vm2013_vm6, %v6240_v21, 0.0 }
 0x301   : > { %2276 = vadd.xlane.f32.xlu0 %v2275_v38  ;;  %v2088_v34 = vpop.xlane.xlu0 %2087 }
 0x302   : > { %v2194_v50 = vmul.f32 1.442695, %v2136_v52  ;;  %v2134_v37 = vsub.f32 %v6064_v24, %v2088_v34 }
 0x303   : > { %v2106_v22 = vpop.xlane.xlu1 %2105 }
 0x304   : > { %4597 = vpow2.f32 %v2194_v50  ;;  %v2190_v47 = vmul.f32 1.442695, %v2134_v37  ;;  %v2140_v18 = vsub.f32 %v6068_v55, %v2106_v22 }
 0x305   : > { %v2100_v49 = vpop.xlane.xlu0 %2099 }
 0x306   : > { %4599 = vpow2.f32 %v2190_v47  ;;  %v2202_v16 = vmul.f32 1.442695, %v2140_v18  ;;  %v2138_v3 = vsub.f32 %v6076_v51, %v2100_v49 }
 0x307   : > { %v2091_v29 = vpop.xlane.xlu1 %2090 }
 0x308   : > { %4601 = vpow2.f32 %v2202_v16  ;;  %v2198_v57 = vmul.f32 1.442695, %v2138_v3  ;;  %v2135_v40 = vsub.f32 %v6083_v15, %v2091_v29 }
 0x309   : > { %v2097_v28 = vpop.xlane.xlu0 %2096 }
 0x30a   : > { %4603 = vpow2.f32 %v2198_v57  ;;  %v2192_v42 = vmul.f32 1.442695, %v2135_v40  ;;  %v2137_v24 = vsub.f32 %v6090_v63, %v2097_v28 }
 0x30b   : > { %v2103_v14 = vpop.xlane.xlu1 %2102 }
 0x30c   : > { %4605 = vpow2.f32 %v2192_v42  ;;  %v2196_v52 = vmul.f32 1.442695, %v2137_v24  ;;  %v2139_v55 = vsub.f32 %v6096_v41, %v2103_v14 }
 0x30d   : > { %v2109_v38 = vpop.xlane.xlu0 %2108 }
 0x30e   : > { %4607 = vpow2.f32 %v2196_v52  ;;  %v2200_v34 = vmul.f32 1.442695, %v2139_v55  ;;  %v2141_v51 = vsub.f32 %v6102_v2, %v2109_v38 }
 0x310   : > { %4609 = vpow2.f32 %v2200_v34  ;;  %v2204_v50 = vmul.f32 1.442695, %v2141_v51  ;;  %v2418_v34 = vrot.slane %v5803_v43, %v5811_v60 }
 0x311   : > { %v6252_v37 = vpop.eup %4597 }
 0x312   : > { %4611 = vpow2.f32 %v2204_v50  ;;  %v2284_v15 = vsel %vm2013_vm6, %v6252_v37, 0.0 }
 0x313   : > { %v6256_v22 = vpop.eup %4599  ;;  %2285 = vadd.xlane.f32.xlu1 %v2284_v15 }
 0x314   : > { %v2278_v63 = vsel %vm2013_vm6, %v6256_v22, 0.0 }
 0x315   : > { %v6260_v41 = vpop.eup %4601  ;;  %2279 = vadd.xlane.f32.xlu0 %v2278_v63  ;;  %v6289_v63 = vrot.slane %v5807_v6, %v5811_v60 }
 0x316   : > { %v2296_v2 = vsel %vm2013_vm6, %v6260_v41, 0.0 }
 0x317   : > { %v6264_v47 = vpop.eup %4603  ;;  %2297 = vadd.xlane.f32.xlu1 %v2296_v2 }
 0x318   : > { %v2290_v18 = vsel %vm2013_vm6, %v6264_v47, 0.0 }
 0x319   : > { %v6268_v49 = vpop.eup %4605  ;;  %2291 = vadd.xlane.f32.xlu0 %v2290_v18 }
 0x31a   : > { %v2281_v16 = vsel %vm2013_vm6, %v6268_v49, 0.0 }
 0x31b   : > { %v6272_v3 = vpop.eup %4607  ;;  %2282 = vadd.xlane.f32.xlu1 %v2281_v16 }
 0x31c   : > { %v2287_v29 = vsel %vm2013_vm6, %v6272_v3, 0.0 }
 0x31d   : > { %v6276_v57 = vpop.eup %4609  ;;  %2288 = vadd.xlane.f32.xlu0 %v2287_v29 }
 0x31e   : > { %v2293_v40 = vsel %vm2013_vm6, %v6276_v57, 0.0 }
 0x31f   : > { %v6280_v28 = vpop.eup %4611  ;;  %2294 = vadd.xlane.f32.xlu1 %v2293_v40  ;;  %v4764_v40 = vld [vmem:[%s5037_s13 + $0x10] sm:$0xff] }
 0x320   : > { %v2299_v42 = vsel %vm2013_vm6, %v6280_v28, 0.0 }
 0x321   : > { %2300 = vadd.xlane.f32.xlu0 %v2299_v42 }
 0x33a   : > { %v2214_v24 = vpop.xlane.xlu1 %2213 }
 0x33b   : > { %4613 = vrcp.f32 %v2214_v24 }
 0x33e   : > { %v2226_v14 = vpop.xlane.xlu1 %2225  ;;  %v2217_v52 = vpop.xlane.xlu0 %2216 }
 0x33f   : > { %4615 = vrcp.f32 %v2226_v14 }
 0x340   : > { %4617 = vrcp.f32 %v2217_v52 }
 0x342   : > { %v2208_v55 = vpop.xlane.xlu1 %2207 }
 0x343   : > { %4619 = vrcp.f32 %v2208_v55 }
 0x346   : > { %v2220_v38 = vpop.xlane.xlu1 %2219 }
 0x347   : > { %4621 = vrcp.f32 %v2220_v38  ;;  %v2229_v51 = vpop.xlane.xlu0 %2228 }
 0x348   : > { %v4614_v50 = vpop.eup %4613  ;;  %4623 = vrcp.f32 %v2229_v51 }
 0x349   : > { %v2336_v15 = vmul.f32 %v4614_v50, %v6131_v17  ;;  %v4765_v50 = vld [vmem:[%s5037_s13 + $0x30] sm:$0xff] }
 0x34b   : > { %v2211_v2 = vpop.xlane.xlu0 %2210  ;;  %v2457_v18 = vmul.f32 %v2418_v34, %v2336_v15 }
 0x34c   : > { %v4616_v16 = vpop.eup %4615  ;;  %4625 = vrcp.f32 %v2211_v2 }
 0x34d   : > { %v4618_v29 = vpop.eup %4617  ;;  %v2489_v42 = vmul.f32 %v4764_v40, %v2457_v18  ;;  %v2340_v43 = vmul.f32 %v4616_v16, %v6136_v46  ;;  %v6300_v46 = vld [vmem:[%s5037_s13 + $0x18] sm:$0xff] }
 0x34e   : > { %v2337_v24 = vmul.f32 %v4618_v29, %v6138_v19 }
 0x34f   : > { %v2223_v14 = vpop.xlane.xlu0 %2222  ;;  %v2525_v17 = vsel %vm2013_vm6, %v2489_v42, 0.0  ;;  %v2681_v52 = vmul.f32 %v4764_v40, %v2489_v42  ;;  %v2461_v6 = vmul.f32 %v6289_v63, %v2340_v43  ;;  %v4767_v43 = vld [vmem:[%s5037_s13] sm:$0xff] }
 0x350   : > { %v4620_v55 = vpop.eup %4619  ;;  %4627 = vrcp.f32 %v2223_v14  ;;  %2526 = vadd.xlane.f32.xlu1 %v2525_v17  ;;  %v2458_v38 = vmul.f32 %v2418_v34, %v2337_v24 }
 0x351   : > { %v2717_v51 = vsel %vm2013_vm6, %v2681_v52, 0.0  ;;  %v2493_v15 = vmul.f32 %v4765_v50, %v2461_v6  ;;  %v2334_v2 = vmul.f32 %v4620_v55, %v6144_v5 }
 0x352   : > { %2718 = vadd.xlane.f32.xlu0 %v2717_v51  ;;  %v6303_v19 = vmul.f32 %v6300_v46, %v2458_v38  ;;  %v4768_v38 = vld [vmem:[%s5037_s13 + $0x20] sm:$0xff] }
 0x353   : > { %v2537_v18 = vsel %vm2013_vm6, %v2493_v15, 0.0  ;;  %v2455_v16 = vmul.f32 %v2418_v34, %v2334_v2  ;;  %v4769_v2 = vld [vmem:[%s5037_s13 + $0x38] sm:$0xff] }
 0x354   : > { %v4622_v29 = vpop.eup %4621  ;;  %2538 = vadd.xlane.f32.xlu1 %v2537_v18  ;;  %v2528_v42 = vsel %vm2013_vm6, %v6303_v19, 0.0 }
 0x355   : > { %v4624_v40 = vpop.eup %4623  ;;  %v2487_v24 = vmul.f32 %v4767_v43, %v2455_v16  ;;  %v2338_v5 = vmul.f32 %v4622_v29, %v6148_v30  ;;  %v2685_v29 = vmul.f32 %v4765_v50, %v2493_v15 }
 0x356   : > { %2529 = vadd.xlane.f32.xlu0 %v2528_v42  ;;  %v2341_v14 = vmul.f32 %v4624_v40, %v6150_v4 }
 0x357   : > { %v2519_v17 = vsel %vm2013_vm6, %v2487_v24, 0.0  ;;  %v2459_v52 = vmul.f32 %v6289_v63, %v2338_v5  ;;  %v2679_v40 = vmul.f32 %v4767_v43, %v2487_v24 }
 0x358   : > { %2520 = vadd.xlane.f32.xlu1 %v2519_v17  ;;  %v2462_v6 = vmul.f32 %v6289_v63, %v2341_v14 }
 0x359   : > { %v4626_v55 = vpop.eup %4625  ;;  %v2491_v51 = vmul.f32 %v4768_v38, %v2459_v52  ;;  %v2729_v52 = vsel %vm2013_vm6, %v2685_v29, 0.0 }
 0x35a   : > { %v2494_v18 = vmul.f32 %v4769_v2, %v2462_v6  ;;  %v2335_v16 = vmul.f32 %v4626_v55, %v6156_v0  ;;  %v4770_v0 = vld [vmem:[%s5037_s13 + $0x8] sm:$0xff] }
 0x35b   : > { %v2238_v20 = vpop.xlane.xlu1 %2237  ;;  %v2531_v30 = vsel %vm2013_vm6, %v2491_v51, 0.0  ;;  %v2683_v50 = vmul.f32 %v4768_v38, %v2491_v51  ;;  %v6330_v38 = vrot.slane %v5890_v27, %v5811_v60 }
 0x35c   : > { %4629 = vrcp.f32 %v2238_v20  ;;  %2532 = vadd.xlane.f32.xlu1 %v2531_v30  ;;  %v2540_v4 = vsel %vm2013_vm6, %v2494_v18, 0.0  ;;  %v2456_v42 = vmul.f32 %v2418_v34, %v2335_v16  ;;  %v2686_v6 = vmul.f32 %v4769_v2, %v2494_v18  ;;  %v4771_v16 = vld [vmem:[%s5037_s13 + $0x28] sm:$0xff] }
 0x35d   : > { %v4628_v5 = vpop.eup %4627  ;;  %2541 = vadd.xlane.f32.xlu0 %v2540_v4  ;;  %v2711_v20 = vsel %vm2013_vm6, %v2679_v40, 0.0  ;;  %v2723_v2 = vsel %vm2013_vm6, %v2683_v50, 0.0 }
 0x35e   : > { %v2339_v14 = vmul.f32 %v4628_v5, %v6161_v35  ;;  %v2488_v55 = vmul.f32 %v4770_v0, %v2456_v42  ;;  %v2732_v43 = vsel %vm2013_vm6, %v2686_v6, 0.0  ;;  %v6336_v42 = vrot.slane %v5894_v1, %v5811_v60  ;;  %v4772_v1 = vld [vmem:[%s5037_s13 + $0x50] sm:$0xff] }
 0x35f   : > { %v2250_v17 = vpop.xlane.xlu1 %2249 }
 0x360   : > { %4631 = vrcp.f32 %v2250_v17  ;;  %2730 = vadd.xlane.f32.xlu1 %v2729_v52  ;;  %v2460_v15 = vmul.f32 %v6289_v63, %v2339_v14  ;;  %v2680_v24 = vmul.f32 %v4770_v0, %v2488_v55  ;;  %v2522_v63 = vsel %vm2013_vm6, %v2488_v55, 0.0 }
 0x361   : > { %2712 = vadd.xlane.f32.xlu0 %v2711_v20  ;;  %v2682_v52 = vmul.f32 %v6300_v46, %v6303_v19  ;;  %v4773_v19 = vld [vmem:[%s5037_s13 + $0x70] sm:$0xff] }
 0x362   : > { %v2492_v35 = vmul.f32 %v4771_v16, %v2460_v15  ;;  %v2714_v30 = vsel %vm2013_vm6, %v2680_v24, 0.0 }
 0x363   : > { %v2232_v34 = vpop.xlane.xlu0 %2231  ;;  %v2720_v15 = vsel %vm2013_vm6, %v2682_v52, 0.0 }
 0x364   : > { %4633 = vrcp.f32 %v2232_v34  ;;  %2733 = vadd.xlane.f32.xlu1 %v2732_v43  ;;  %v2684_v29 = vmul.f32 %v4771_v16, %v2492_v35  ;;  %v2534_v27 = vsel %vm2013_vm6, %v2492_v35, 0.0 }
 0x365   : > { %2724 = vadd.xlane.f32.xlu0 %v2723_v2  ;;  %v4774_v2 = vld [vmem:[%s5037_s13 + $0x40] sm:$0xff] }
 0x366   : > { %v2726_v14 = vsel %vm2013_vm6, %v2684_v29, 0.0 }
 0x367   : > { %v2244_v18 = vpop.xlane.xlu0 %2243 }
 0x368   : > { %4635 = vrcp.f32 %v2244_v18  ;;  %2715 = vadd.xlane.f32.xlu1 %v2714_v30 }
 0x369   : > { %v4630_v51 = vpop.eup %4629  ;;  %2523 = vadd.xlane.f32.xlu0 %v2522_v63 }
 0x36a   : > { %v2235_v4 = vpop.xlane.xlu1 %2234  ;;  %v2344_v40 = vmul.f32 %v4630_v51, %v6172_v10 }
 0x36b   : > { %v2241_v5 = vpop.xlane.xlu0 %2240 }
 0x36c   : > { %4637 = vrcp.f32 %v2241_v5  ;;  %2727 = vadd.xlane.f32.xlu1 %v2726_v14  ;;  %v2465_v17 = vmul.f32 %v6330_v38, %v2344_v40  ;;  %v4775_v40 = vld [vmem:[%s5037_s13 + $0x60] sm:$0xff] }
 0x36d   : > { %v4632_v6 = vpop.eup %4631  ;;  %4639 = vrcp.f32 %v2235_v4  ;;  %2535 = vadd.xlane.f32.xlu0 %v2534_v27 }
 0x36e   : > { %v2247_v10 = vpop.xlane.xlu1 %2246  ;;  %v2497_v0 = vmul.f32 %v4772_v1, %v2465_v17  ;;  %v2348_v55 = vmul.f32 %v4632_v6, %v6176_v26 }
 0x36f   : > { %4641 = vrcp.f32 %v2247_v10  ;;  %v2253_v20 = vpop.xlane.xlu0 %2252 }
 0x370   : > { %4643 = vrcp.f32 %v2253_v20  ;;  %v2549_v50 = vsel %vm2013_vm6, %v2497_v0, 0.0  ;;  %v2469_v34 = vmul.f32 %v6336_v42, %v2348_v55  ;;  %v2689_v17 = vmul.f32 %v4772_v1, %v2497_v0 }
 0x371   : > { %v4634_v46 = vpop.eup %4633  ;;  %2550 = vadd.xlane.f32.xlu1 %v2549_v50  ;;  %2721 = vadd.xlane.f32.xlu0 %v2720_v15 }
 0x372   : > { %v2501_v43 = vmul.f32 %v4773_v19, %v2469_v34  ;;  %v2342_v24 = vmul.f32 %v4634_v46, %v6180_v32  ;;  %v4776_v34 = vld [vmem:[%s5037_s13 + $0x58] sm:$0xff] }
 0x374   : > { %v2561_v16 = vsel %vm2013_vm6, %v2501_v43, 0.0  ;;  %v2463_v26 = vmul.f32 %v6330_v38, %v2342_v24  ;;  %v4777_v24 = vld [vmem:[%s5037_s13 + $0x68] sm:$0xff] }
 0x375   : > { %v4636_v35 = vpop.eup %4635  ;;  %2562 = vadd.xlane.f32.xlu1 %v2561_v16 }
 0x376   : > { %v2495_v18 = vmul.f32 %v4774_v2, %v2463_v26  ;;  %v2346_v30 = vmul.f32 %v4636_v35, %v6184_v11  ;;  %v2693_v26 = vmul.f32 %v4773_v19, %v2501_v43  ;;  %v4779_v43 = vld [vmem:[%s5037_s13 + $0x48] sm:$0xff] }
 0x378   : > { %v2543_v29 = vsel %vm2013_vm6, %v2495_v18, 0.0  ;;  %v2467_v63 = vmul.f32 %v6336_v42, %v2346_v30 }
 0x379   : > { %v4638_v51 = vpop.eup %4637  ;;  %2544 = vadd.xlane.f32.xlu1 %v2543_v29 }
 0x37a   : > { %v4640_v4 = vpop.eup %4639  ;;  %v2499_v5 = vmul.f32 %v4775_v40, %v2467_v63  ;;  %v2345_v32 = vmul.f32 %v4638_v51, %v6186_v58  ;;  %v4778_v63 = vld [vmem:[%s5037_s13 + $0x78] sm:$0xff] }
 0x37b   : > { %v2343_v50 = vmul.f32 %v4640_v4, %v6190_v39  ;;  %v2753_v4 = vsel %vm2013_vm6, %v2693_v26, 0.0 }
 0x37c   : > { %v4642_v14 = vpop.eup %4641  ;;  %v2262_v27 = vpop.xlane.xlu1 %2261  ;;  %v2555_v52 = vsel %vm2013_vm6, %v2499_v5, 0.0  ;;  %v2691_v6 = vmul.f32 %v4775_v40, %v2499_v5  ;;  %v2466_v20 = vmul.f32 %v6330_v38, %v2345_v32  ;;  %v6377_v32 = vrot.slane %v5966_v7, %v5811_v60 }
 0x37d   : > { %4645 = vrcp.f32 %v2262_v27  ;;  %v2347_v11 = vmul.f32 %v4642_v14, %v6195_v36  ;;  %v4644_v10 = vpop.eup %4643  ;;  %2556 = vadd.xlane.f32.xlu0 %v2555_v52  ;;  %v2741_v36 = vsel %vm2013_vm6, %v2689_v17, 0.0  ;;  %v2464_v51 = vmul.f32 %v6330_v38, %v2343_v50 }
 0x37e   : > { %v2256_v55 = vpop.xlane.xlu0 %2255  ;;  %v2747_v58 = vsel %vm2013_vm6, %v2691_v6, 0.0  ;;  %v2349_v0 = vmul.f32 %v4644_v10, %v6200_v8  ;;  %v2498_v46 = vmul.f32 %v4776_v34, %v2466_v20  ;;  %v2687_v38 = vmul.f32 %v4774_v2, %v2495_v18  ;;  %v6386_v18 = vld [vmem:[%s5037_s13 + $0x90] sm:$0xff] }
 0x37f   : > { %4647 = vrcp.f32 %v2256_v55  ;;  %v2468_v1 = vmul.f32 %v6336_v42, %v2347_v11  ;;  %2748 = vadd.xlane.f32.xlu1 %v2747_v58  ;;  %v2496_v5 = vmul.f32 %v4779_v43, %v2464_v51 }
 0x380   : > { %v2274_v15 = vpop.xlane.xlu1 %2273  ;;  %v2470_v39 = vmul.f32 %v6336_v42, %v2349_v0  ;;  %v2690_v29 = vmul.f32 %v4776_v34, %v2498_v46  ;;  %v2552_v14 = vsel %vm2013_vm6, %v2498_v46, 0.0  ;;  %v2735_v7 = vsel %vm2013_vm6, %v2687_v38, 0.0 }
 0x381   : > { %4649 = vrcp.f32 %v2274_v15  ;;  %v2500_v16 = vmul.f32 %v4777_v24, %v2468_v1  ;;  %2742 = vadd.xlane.f32.xlu0 %v2741_v36  ;;  %v2688_v11 = vmul.f32 %v4779_v43, %v2496_v5 }
 0x382   : > { %v2268_v35 = vpop.xlane.xlu0 %2267  ;;  %v2502_v8 = vmul.f32 %v4778_v63, %v2470_v39  ;;  %v2744_v19 = vsel %vm2013_vm6, %v2690_v29, 0.0  ;;  %v2546_v39 = vsel %vm2013_vm6, %v2496_v5, 0.0 }
 0x383   : > { %v2558_v30 = vsel %vm2013_vm6, %v2500_v16, 0.0  ;;  %4651 = vrcp.f32 %v2268_v35  ;;  %v2738_v2 = vsel %vm2013_vm6, %v2688_v11, 0.0  ;;  %v2692_v35 = vmul.f32 %v4777_v24, %v2500_v16  ;;  %v4784_v24 = vld [vmem:[%s5037_s13 + $0xb0] sm:$0xff]  ;;  %v4785_v11 = vld [vmem:[%s5037_s13 + $0xb8] sm:$0xff] }
 0x384   : > { %2559 = vadd.xlane.f32.xlu1 %v2558_v30  ;;  %v2694_v42 = vmul.f32 %v4778_v63, %v2502_v8  ;;  %v2259_v17 = vpop.xlane.xlu1 %2258  ;;  %v2564_v15 = vsel %vm2013_vm6, %v2502_v8, 0.0  ;;  %v4782_v63 = vld [vmem:[%s5037_s13 + $0x80] sm:$0xff] }
 0x385   : > { %2754 = vadd.xlane.f32.xlu0 %v2753_v4 }
 0x386   : > { %v2265_v40 = vpop.xlane.xlu0 %2264  ;;  %v2756_v6 = vsel %vm2013_vm6, %v2694_v42, 0.0 }
 0x387   : > { %4653 = vrcp.f32 %v2265_v40  ;;  %v2750_v40 = vsel %vm2013_vm6, %v2692_v35, 0.0 }
 0x388   : > { %2745 = vadd.xlane.f32.xlu1 %v2744_v19  ;;  %v2271_v0 = vpop.xlane.xlu1 %2270  ;;  %v6408_v19 = vld [vmem:[%s5037_s13 + $0x98] sm:$0xff] }
 0x389   : > { %2553 = vadd.xlane.f32.xlu0 %v2552_v14 }
 0x38a   : > { %v4646_v27 = vpop.eup %4645  ;;  %v2277_v52 = vpop.xlane.xlu0 %2276 }
 0x38b   : > { %4655 = vrcp.f32 %v2277_v52  ;;  %v2352_v10 = vmul.f32 %v4646_v27, %v6212_v9  ;;  %v6393_v9 = vld [vmem:[%s5482_s26 + $0x5] ss:$0 sm:$0xff] }
 0x38c   : > { %v4648_v55 = vpop.eup %4647  ;;  %2757 = vadd.xlane.f32.xlu1 %v2756_v6  ;;  %4657 = vrcp.f32 %v2259_v17 }
 0x38d   : > { %v2473_v20 = vmul.f32 %v6377_v32, %v2352_v10  ;;  %2736 = vadd.xlane.f32.xlu0 %v2735_v7  ;;  %v2350_v1 = vmul.f32 %v4648_v55, %v6216_v13  ;;  %4659 = vrcp.f32 %v2271_v0  ;;  %v4786_v55 = vld [vmem:[%s5037_s13 + $0xa0] sm:$0xff] }
 0x38e   : > { %v4650_v50 = vpop.eup %4649 }
 0x38f   : > { %v6389_v58 = vmul.f32 %v6386_v18, %v2473_v20  ;;  %v2356_v36 = vmul.f32 %v4650_v50, %v6220_v31  ;;  %v2471_v26 = vmul.f32 %v6377_v32, %v2350_v1 }
 0x390   : > { %2739 = vadd.xlane.f32.xlu1 %v2738_v2  ;;  %v4652_v34 = vpop.eup %4651 }
 0x391   : > { %2565 = vadd.xlane.f32.xlu0 %v2564_v15  ;;  %v2573_v46 = vsel %vm2013_vm6, %v6389_v58, 0.0  ;;  %v2477_v29 = vmul.f32 %v6393_v9, %v2356_v36  ;;  %v2503_v8 = vmul.f32 %v4782_v63, %v2471_v26  ;;  %v2354_v51 = vmul.f32 %v4652_v34, %v6224_v61 }
 0x392   : > { %v2697_v26 = vmul.f32 %v6386_v18, %v6389_v58  ;;  %v4788_v18 = vld [vmem:[%s5037_s13 + $0xa8] sm:$0xff] }
 0x393   : > { %v2509_v16 = vmul.f32 %v4784_v24, %v2477_v29  ;;  %v2695_v61 = vmul.f32 %v4782_v63, %v2503_v8  ;;  %v2475_v38 = vmul.f32 %v6393_v9, %v2354_v51  ;;  %v2567_v2 = vsel %vm2013_vm6, %v2503_v8, 0.0 }
 0x394   : > { %v4654_v13 = vpop.eup %4653  ;;  %2574 = vadd.xlane.f32.xlu1 %v2573_v46 }
 0x395   : > { %v2353_v30 = vmul.f32 %v4654_v13, %v6232_v12  ;;  %2547 = vadd.xlane.f32.xlu0 %v2546_v39  ;;  %v2585_v17 = vsel %vm2013_vm6, %v2509_v16, 0.0  ;;  %v2759_v6 = vsel %vm2013_vm6, %v2695_v61, 0.0  ;;  %v2507_v7 = vmul.f32 %v4786_v55, %v2475_v38  ;;  %v4787_v39 = vld [vmem:[%s5037_s13 + $0x88] sm:$0xff]  ;;  %v4801_v38 = vld [vmem:[%s5482_s26 + $0x7] ss:$0 sm:$0xff] }
 0x396   : > { %v2701_v29 = vmul.f32 %v4784_v24, %v2509_v16 }
 0x397   : > { %v2474_v31 = vmul.f32 %v6377_v32, %v2353_v30  ;;  %v2699_v15 = vmul.f32 %v4786_v55, %v2507_v7  ;;  %v2579_v46 = vsel %vm2013_vm6, %v2507_v7, 0.0 }
 0x398   : > { %v4656_v4 = vpop.eup %4655 }
 0x399   : > { %v6411_v42 = vmul.f32 %v6408_v19, %v2474_v31  ;;  %v2357_v12 = vmul.f32 %v4656_v4, %v6240_v21  ;;  %2751 = vadd.xlane.f32.xlu0 %v2750_v40  ;;  %v4658_v43 = vpop.eup %4657  ;;  %v6438_v4 = vld [vmem:[%s5482_s26 + $0x6] ss:$0 sm:$0xff]  ;;  %s4834_s26 = sshll.u32 %s4900_s17, 4  ;;  %s4835_s26 = int_to_ptr.vmem [resolvable:$false] %s4834_s26 }
 0x39a   : > { %v2351_v21 = vmul.f32 %v4658_v43, %v6228_v56  ;;  %v4660_v20 = vpop.eup %4659  ;;  %s4836_s28 = scalar_lea.vmem %s4835_s26, 256 }
 0x39b   : > { %v2576_v5 = vsel %vm2013_vm6, %v6411_v42, 0.0  ;;  %v2478_v14 = vmul.f32 %v6393_v9, %v2357_v12  ;;  %v2355_v36 = vmul.f32 %v4660_v20, %v6236_v53  ;;  %v2765_v53 = vsel %vm2013_vm6, %v2697_v26, 0.0  ;;  %v4792_v20 = vld [vmem:[%s5037_s13 + $0xe0] sm:$0xff] }
 0x39c   : > { %v2286_v27 = vpop.xlane.xlu1 %2285  ;;  %2577 = vadd.xlane.f32.xlu1 %v2576_v5  ;;  %v2472_v0 = vmul.f32 %v6377_v32, %v2351_v21  ;;  %v2771_v32 = vsel %vm2013_vm6, %v2699_v15, 0.0  ;;  %v2698_v24 = vmul.f32 %v6408_v19, %v6411_v42  ;;  %v4791_v42 = vld [vmem:[%s5037_s13 + $0xc0] sm:$0xff] }
 0x39d   : > { %4661 = vrcp.f32 %v2286_v27  ;;  %2586 = vadd.xlane.f32.xlu0 %v2585_v17  ;;  %v2510_v10 = vmul.f32 %v4785_v11, %v2478_v14  ;;  %v2476_v30 = vmul.f32 %v6393_v9, %v2355_v36  ;;  %v2777_v9 = vsel %vm2013_vm6, %v2701_v29, 0.0 }
 0x39e   : > { %v2280_v52 = vpop.xlane.xlu0 %2279  ;;  %v2504_v35 = vmul.f32 %v4787_v39, %v2472_v0  ;;  %v2768_v19 = vsel %vm2013_vm6, %v2698_v24, 0.0  ;;  %v4797_v24 = vld [vmem:[%s5037_s13 + $0xf8] sm:$0xff] }
 0x39f   : > { %4663 = vrcp.f32 %v2280_v52  ;;  %v2588_v56 = vsel %vm2013_vm6, %v2510_v10, 0.0  ;;  %v2508_v58 = vmul.f32 %v4788_v18, %v2476_v30  ;;  %v2702_v12 = vmul.f32 %v4785_v11, %v2510_v10 }
 0x3a0   : > { %v2298_v50 = vpop.xlane.xlu1 %2297  ;;  %2760 = vadd.xlane.f32.xlu1 %v2759_v6  ;;  %v2570_v8 = vsel %vm2013_vm6, %v2504_v35, 0.0  ;;  %v2696_v17 = vmul.f32 %v4787_v39, %v2504_v35  ;;  %v4794_v39 = vld [vmem:[%s5037_s13 + $0xf0] sm:$0xff] }
 0x3a1   : > { %2568 = vadd.xlane.f32.xlu0 %v2567_v2  ;;  %v2582_v16 = vsel %vm2013_vm6, %v2508_v58, 0.0  ;;  %v2780_v27 = vsel %vm2013_vm6, %v2702_v12, 0.0  ;;  %v2700_v55 = vmul.f32 %v4788_v18, %v2508_v58  ;;  %v4793_v2 = vld [vmem:[%s5037_s13 + $0xd0] sm:$0xff] }
 0x3a2   : > { %v2292_v1 = vpop.xlane.xlu0 %2291  ;;  %v2762_v10 = vsel %vm2013_vm6, %v2696_v17, 0.0 }
 0x3a3   : > { %4665 = vrcp.f32 %v2292_v1 }
 0x3a4   : > { %2589 = vadd.xlane.f32.xlu1 %v2588_v56  ;;  %4667 = vrcp.f32 %v2298_v50  ;;  %v2283_v34 = vpop.xlane.xlu1 %2282  ;;  %v2774_v56 = vsel %vm2013_vm6, %v2700_v55, 0.0 }
 0x3a5   : > { %2580 = vadd.xlane.f32.xlu0 %v2579_v46 }
 0x3a6   : > { %v2289_v13 = vpop.xlane.xlu0 %2288 }
 0x3a7   : > { %4669 = vrcp.f32 %v2289_v13 }
 0x3a8   : > { %2772 = vadd.xlane.f32.xlu1 %v2771_v32  ;;  %v2295_v63 = vpop.xlane.xlu1 %2294  ;;  %4671 = vrcp.f32 %v2283_v34 }
 0x3a9   : > { %2766 = vadd.xlane.f32.xlu0 %v2765_v53  ;;  %4673 = vrcp.f32 %v2295_v63  ;;  %v4795_v53 = vld [vmem:[%s5037_s13 + $0xd8] sm:$0xff] }
 0x3aa   : > { %v4662_v31 = vpop.eup %4661  ;;  %v2301_v40 = vpop.xlane.xlu0 %2300 }
 0x3ab   : > { %4675 = vrcp.f32 %v2301_v40  ;;  %v2360_v61 = vmul.f32 %v4662_v31, %v6252_v37 }
 0x3ac   : > { %v4664_v51 = vpop.eup %4663  ;;  %2571 = vadd.xlane.f32.xlu1 %v2570_v8  ;;  %4677 = vrcp.f32 %v6108_v33 }
 0x3ad   : > { %v2358_v43 = vmul.f32 %v4664_v51, %v6256_v22  ;;  %2778 = vadd.xlane.f32.xlu0 %v2777_v9  ;;  %v2481_v11 = vmul.f32 %v6438_v4, %v2360_v61  ;;  %4679 = vrcp.f32 %v6110_v23 }
 0x3af   : > { %v2479_v5 = vmul.f32 %v6438_v4, %v2358_v43  ;;  %v2513_v1 = vmul.f32 %v4793_v2, %v2481_v11 }
 0x3b0   : > { %v4666_v14 = vpop.eup %4665  ;;  %2583 = vadd.xlane.f32.xlu1 %v2582_v16 }
 0x3b1   : > { %v2362_v22 = vmul.f32 %v4666_v14, %v6264_v47  ;;  %v4668_v52 = vpop.eup %4667  ;;  %2781 = vadd.xlane.f32.xlu0 %v2780_v27  ;;  %v2511_v21 = vmul.f32 %v4791_v42, %v2479_v5  ;;  %v2705_v46 = vmul.f32 %v4793_v2, %v2513_v1  ;;  %v2597_v32 = vsel %vm2013_vm6, %v2513_v1, 0.0  ;;  %v4798_v5 = vld [vmem:[%s5037_s13 + $0xe8] sm:$0xff] }
 0x3b2   : > { %v2364_v7 = vmul.f32 %v4668_v52, %v6260_v41 }
 0x3b3   : > { %v2483_v6 = vmul.f32 %v4801_v38, %v2362_v22  ;;  %v2591_v47 = vsel %vm2013_vm6, %v2511_v21, 0.0  ;;  %v2789_v30 = vsel %vm2013_vm6, %v2705_v46, 0.0  ;;  %v2703_v51 = vmul.f32 %v4791_v42, %v2511_v21 }
 0x3b4   : > { %v4670_v37 = vpop.eup %4669  ;;  %2769 = vadd.xlane.f32.xlu1 %v2768_v19  ;;  %v2485_v15 = vmul.f32 %v4801_v38, %v2364_v7 }
 0x3b5   : > { %2763 = vadd.xlane.f32.xlu0 %v2762_v10  ;;  %v2515_v50 = vmul.f32 %v4792_v20, %v2483_v6  ;;  %v2361_v0 = vmul.f32 %v4670_v37, %v6272_v3  ;;  %v4672_v36 = vpop.eup %4671 }
 0x3b6   : > { %v4674_v34 = vpop.eup %4673  ;;  %v2517_v35 = vmul.f32 %v4794_v39, %v2485_v15  ;;  %v2359_v3 = vmul.f32 %v4672_v36, %v6268_v49 }
 0x3b7   : > { %v2603_v41 = vsel %vm2013_vm6, %v2515_v50, 0.0  ;;  %v2482_v26 = vmul.f32 %v6438_v4, %v2361_v0  ;;  %v2363_v63 = vmul.f32 %v4674_v34, %v6276_v57  ;;  %v2707_v18 = vmul.f32 %v4792_v20, %v2515_v50 }
 0x3b8   : > { %2592 = vadd.xlane.f32.xlu1 %v2591_v47  ;;  %v4676_v13 = vpop.eup %4675  ;;  %v2609_v8 = vsel %vm2013_vm6, %v2517_v35, 0.0  ;;  %v2480_v58 = vmul.f32 %v6438_v4, %v2359_v3  ;;  %v2783_v57 = vsel %vm2013_vm6, %v2703_v51, 0.0  ;;  %v2709_v52 = vmul.f32 %v4794_v39, %v2517_v35 }
 0x3b9   : > { %2775 = vadd.xlane.f32.xlu0 %v2774_v56  ;;  %v2514_v29 = vmul.f32 %v4795_v53, %v2482_v26  ;;  %v2365_v31 = vmul.f32 %v4676_v13, %v6280_v28  ;;  %v2484_v9 = vmul.f32 %v4801_v38, %v2363_v63  ;;  %v2795_v12 = vsel %vm2013_vm6, %v2707_v18, 0.0  ;;  %v4796_v28 = vld [vmem:[%s5037_s13 + $0xc8] sm:$0xff]  ;;  %v4678_v11 = vpop.eup %4677  ;;  %s3670_s13 = sshll.u32 %s5033_s29, 3 }
 0x3ba   : > { %v2512_v43 = vmul.f32 %v4796_v28, %v2480_v58  ;;  %v2801_v33 = vsel %vm2013_vm6, %v2709_v52, 0.0  ;;  %v6487_v37 = vrot.slane %v4678_v11, %v5811_v60  ;;  %v4680_v1 = vpop.eup %4679  ;;  %v7307_v3 = vlaneseq  ;;  %s7067_s16 = scalar_lea.vmem [#allocation5], %s3670_s13 }
 0x3bb   : > { %v2600_v49 = vsel %vm2013_vm6, %v2514_v29, 0.0  ;;  %v2486_v40 = vmul.f32 %v4801_v38, %v2365_v31  ;;  %v2516_v61 = vmul.f32 %v4798_v5, %v2484_v9  ;;  %v2706_v17 = vmul.f32 %v4795_v53, %v2514_v29  ;;  %s3582_s19 = sshll.u32 %s7067_s16, 4  ;;  %s3583_s19 = int_to_ptr.vmem [resolvable:$true] %s3582_s19 }
 0x3bc   : > { %2604 = vadd.xlane.f32.xlu1 %v2603_v41  ;;  %v2594_v4 = vsel %vm2013_vm6, %v2512_v43, 0.0  ;;  %v2704_v42 = vmul.f32 %v4796_v28, %v2512_v43  ;;  %v6497_v15 = vrot.slane %v4680_v1, %v5811_v60  ;;  %s4830_s15 = scalar_lea.vmem %s3583_s19, 128  ;;  %p4837_p7 = scmp.lt.s32.totalorder %s3583_s19, %s4835_s26 }
 0x3bd   : > { %2598 = vadd.xlane.f32.xlu0 %v2597_v32  ;;  %v2518_v16 = vmul.f32 %v4797_v24, %v2486_v40  ;;  %v2708_v38 = vmul.f32 %v4798_v5, %v2516_v61  ;;  %v2606_v27 = vsel %vm2013_vm6, %v2516_v61, 0.0  ;;  %v2792_v19 = vsel %vm2013_vm6, %v2706_v17, 0.0  ;;  %p4831_p12 = scmp.ne.s32.totalorder %s3583_s19, %s4830_s15  ;;  %p4838_p8 = scmp.lt.s32.totalorder %s4836_s28, %s4830_s15 }
 0x3be   : > { %v2786_v21 = vsel %vm2013_vm6, %v2704_v42, 0.0 }
 0x3bf   : > { %v2612_v14 = vsel %vm2013_vm6, %v2518_v16, 0.0  ;;  %v2798_v22 = vsel %vm2013_vm6, %v2708_v38, 0.0  ;;  %v2710_v6 = vmul.f32 %v4797_v24, %v2518_v16  ;;  %p4832_p4 = pnand %p4831_p12, %p7311_p13  ;;  %p4839_p10 = por %p4838_p8, %p4837_p7 }
 0x3c0   : > { %2790 = vadd.xlane.f32.xlu1 %v2789_v30  ;;  %v6509_v30 = vand.u32 127, %v7307_v3 }
 0x3c1   : > { %2610 = vadd.xlane.f32.xlu0 %v2609_v8  ;;  %v2804_v10 = vsel %vm2013_vm6, %v2710_v6, 0.0  ;;  %vm3216_vm6 = vcmask 261312   ;;  %p4833_p5 = pneg %p4832_p4 }
 0x3c2   : > { %v3204_v9 = vadd.s32 4294967280, %v6509_v30  ;;  %v3211_v28 = vadd.s32 4294967272, %v6509_v30 }
 0x3c3   : > { %p4840_p0 = pnand %p4839_p10, %p4833_p5 }
 0x3c4   : > { %2601 = vadd.xlane.f32.xlu1 %v2600_v49  ;;  %v3197_v49 = vadd.s32 4294967288, %v6509_v30  ;;  %v6542_v17 = vsub.s32 %v3204_v9, %v5800_v45  ;;  %v6546_v52 = vsub.s32 %v3211_v28, %v5800_v45  ;;  %v3404_v28 = vadd.s32 4294967256, %v6509_v30 }
 0x3c5   : > { %2796 = vadd.xlane.f32.xlu0 %v2795_v12 }
 0x3c6   : > { %v6533_v61 = vsub.s32 %v3197_v49, %v5800_v45 }
 0x3c8   : > { %2784 = vadd.xlane.f32.xlu1 %v2783_v57 }
 0x3c9   : > { %2595 = vadd.xlane.f32.xlu0 %v2594_v4  ;;  %v6538_v4 = vsub.s32 %v6509_v30, %v5800_v45 }
 0x3cc   : > { %2613 = vadd.xlane.f32.xlu1 %v2612_v14 }
 0x3cd   : > { %2607 = vadd.xlane.f32.xlu0 %v2606_v27 }
 0x3d0   : > { %2799 = vadd.xlane.f32.xlu1 %v2798_v22 }
 0x3d1   : > { %2793 = vadd.xlane.f32.xlu0 %v2792_v19 }
 0x3d4   : > { %2802 = vadd.xlane.f32.xlu1 %v2801_v33 }
 0x3d5   : > { %2787 = vadd.xlane.f32.xlu0 %v2786_v21 }
 0x3d9   : > { %2805 = vadd.xlane.f32.xlu0 %v2804_v10  ;;  %v2527_v55 = vpop.xlane.xlu1 %2526 }
 0x3da   : > { %v6491_v7 = vmul.f32 %v6487_v37, %v2527_v55 }
 0x3db   : > { %v2719_v47 = vpop.xlane.xlu0 %2718 }
 0x3dc   : > { %v2841_v20 = vmul.f32 %v6491_v7, %v6491_v7  ;;  %v2809_v23 = vmul.f32 %v2719_v47, %v6487_v37  ;;  %v3208_v10 = vrot.slane %v6491_v7, %v6542_v17 }
 0x3dd   : > { %v2539_v50 = vpop.xlane.xlu1 %2538 }
 0x3de   : > { %v2873_v2 = vsub.f32 %v2809_v23, %v2841_v20  ;;  %v6500_v34 = vmul.f32 %v6497_v15, %v2539_v50 }
 0x3df   : > { %v2530_v56 = vpop.xlane.xlu0 %2529 }
 0x3e0   : > { %v6503_v26 = vmax.f32 %v2873_v2, 1e-05  ;;  %v2845_v32 = vmul.f32 %v6500_v34, %v6500_v34  ;;  %v2650_v19 = vmul.f32 %v6487_v37, %v2530_v56  ;;  %v3230_v3 = vrot.slane %v6500_v34, %v6542_v17 }
 0x3e1   : > { %v2521_v0 = vpop.xlane.xlu1 %2520  ;;  %v3418_v34 = vadd.s32 4294967240, %v6509_v30 }
 0x3e2   : > { %v2647_v46 = vmul.f32 %v6487_v37, %v2521_v0  ;;  %4681 = vrsqrt.f32 %v6503_v26  ;;  %v3215_v47 = vrot.slane %v2650_v19, %v6546_v52  ;;  %vm2951_vm8 = vcmp.eq.f32.partialorder %v6503_v26, inf }
 0x3e3   : > { %4683 = vrcp.f32 %v6114_v62  ;;  %vm2953_vm9 = vcmp.eq.f32.partialorder %v6503_v26, 0.0 }
 0x3e4   : > { %v2839_v53 = vmul.f32 %v2647_v46, %v2647_v46  ;;  %4685 = vrcp.f32 %v6112_v54  ;;  %v3196_v21 = vrot.slane %v2647_v46, %v6538_v4 }
 0x3e5   : > { %v2533_v36 = vpop.xlane.xlu1 %2532 }
 0x3e6   : > { %v2542_v41 = vpop.xlane.xlu0 %2541  ;;  %v6514_v31 = vmul.f32 %v6497_v15, %v2533_v36 }
 0x3e7   : > { %v6517_v63 = vmul.f32 %v6497_v15, %v2542_v41 }
 0x3e8   : > { %v2843_v43 = vmul.f32 %v6514_v31, %v6514_v31 }
 0x3e9   : > { %v2731_v13 = vpop.xlane.xlu1 %2730  ;;  %v2846_v57 = vmul.f32 %v6517_v63, %v6517_v63 }
 0x3ea   : > { %v2813_v39 = vmul.f32 %v2731_v13, %v6497_v15  ;;  %v2713_v35 = vpop.xlane.xlu0 %2712  ;;  %v3221_v13 = vrot.slane %v6514_v31, %v6538_v4 }
 0x3eb   : > { %v2807_v29 = vmul.f32 %v2713_v35, %v6487_v37 }
 0x3ec   : > { %v2877_v8 = vsub.f32 %v2813_v39, %v2845_v32 }
 0x3ed   : > { %v2871_v18 = vsub.f32 %v2807_v29, %v2839_v53  ;;  %v2734_v58 = vpop.xlane.xlu1 %2733  ;;  %v2842_v53 = vmul.f32 %v2650_v19, %v2650_v19  ;;  %v3235_v29 = vrot.slane %v6517_v63, %v6546_v52 }
 0x3ee   : > { %v2814_v51 = vmul.f32 %v2734_v58, %v6497_v15  ;;  %v2725_v40 = vpop.xlane.xlu0 %2724  ;;  %v6530_v16 = vmax.f32 %v2877_v8, 1e-05 }
 0x3ef   : > { %v2811_v12 = vmul.f32 %v2725_v40, %v6497_v15  ;;  %v6528_v24 = vmax.f32 %v2871_v18, 1e-05  ;;  %v4682_v2 = vpop.eup %4681  ;;  %v3411_v18 = vadd.s32 4294967248, %v6509_v30 }
 0x3f0   : > { %v2878_v14 = vsub.f32 %v2814_v51, %v2846_v57  ;;  %v2950_v35 = vmul.f32 %v4682_v2, %v6503_v26  ;;  %v4684_v51 = vpop.eup %4683  ;;  %vm2979_vm10 = vcmp.eq.f32.partialorder %v6530_v16, inf  ;;  %vm2981_vm11 = vcmp.eq.f32.partialorder %v6530_v16, 0.0 }
 0x3f1   : > { %v2716_v5 = vpop.xlane.xlu1 %2715  ;;  %v2875_v38 = vsub.f32 %v2811_v12, %v2843_v43  ;;  %4687 = vrsqrt.f32 %v6528_v24  ;;  %v4686_v9 = vpop.eup %4685  ;;  %vm2937_vm12 = vcmp.eq.f32.partialorder %v6528_v24, inf  ;;  %vm2939_vm13 = vcmp.eq.f32.partialorder %v6528_v24, 0.0 }
 0x3f2   : > { %v2524_v27 = vpop.xlane.xlu0 %2523  ;;  %4689 = vrsqrt.f32 %v6530_v16  ;;  %v2808_v6 = vmul.f32 %v2716_v5, %v6487_v37  ;;  %v6558_v55 = vmax.f32 %v2878_v14, 1e-05  ;;  %v2952_v12 = vsel %vm2951_vm8, %v6503_v26, %v2950_v35 }
 0x3f3   : > { %v2648_v22 = vmul.f32 %v6487_v37, %v2524_v27  ;;  %v6551_v62 = vmax.f32 %v2875_v38, 1e-05  ;;  %v2954_v14 = vand.u32 2147483648, %v6503_v26  ;;  %v6599_v27 = vrot.slane %v4684_v51, %v5811_v60 }
 0x3f4   : > { %vm2986_vm14 = vcmp.eq.f32.partialorder %v6558_v55, inf  ;;  %vm2988_vm3 = vcmp.eq.f32.partialorder %v6558_v55, 0.0 }
 0x3f5   : > { %v2840_v42 = vmul.f32 %v2648_v22, %v2648_v22  ;;  %v3201_v54 = vrot.slane %v2648_v22, %v6533_v61  ;;  %v2728_v33 = vpop.xlane.xlu1 %2727  ;;  %4691 = vrsqrt.f32 %v6551_v62  ;;  %v6602_v22 = vsub.s32 %v3411_v18, %v5800_v45 }
 0x3f6   : > { %v2536_v11 = vpop.xlane.xlu0 %2535  ;;  %4693 = vrsqrt.f32 %v6558_v55  ;;  %v2812_v32 = vmul.f32 %v2728_v33, %v6497_v15  ;;  %v6608_v19 = vsel %vm2953_vm9, %v2954_v14, %v2952_v12  ;;  %v6617_v33 = vsub.s32 %v3418_v34, %v5800_v45 }
 0x3f7   : > { %v2872_v20 = vsub.f32 %v2808_v6, %v2840_v42  ;;  %v3203_v23 = vsel %vm3202_vm4, %v3201_v54, %v3196_v21  ;;  %v2652_v50 = vmul.f32 %v6497_v15, %v2536_v11  ;;  %v3399_v15 = vadd.s32 4294967264, %v6509_v30 }
 0x3f8   : > { %v3210_v1 = vsel %vm3209_vm5, %v3208_v10, %v3203_v23  ;;  %v6606_v30 = vrot.slane %v4686_v9, %v5811_v60  ;;  %v6620_v21 = vsub.s32 %v3404_v28, %v5800_v45  ;;  %v2982_v11 = vand.u32 2147483648, %v6530_v16 }
 0x3f9   : > { %v6565_v0 = vmax.f32 %v2872_v20, 1e-05  ;;  %v3217_v56 = vsel %vm3216_vm6, %v3215_v47, %v3210_v1  ;;  %v2844_v7 = vmul.f32 %v2652_v50, %v2652_v50  ;;  %v3225_v36 = vrot.slane %v2652_v50, %v6533_v61 }
 0x3fa   : > { %v2551_v41 = vpop.xlane.xlu1 %2550  ;;  %v2722_v46 = vpop.xlane.xlu0 %2721  ;;  %v6611_v42 = vsub.s32 %v3399_v15, %v5800_v45  ;;  %v3415_v47 = vrot.slane %v6608_v19, %v6602_v22  ;;  %v2940_v20 = vand.u32 2147483648, %v6528_v24  ;;  %v2989_v50 = vand.u32 2147483648, %v6558_v55 }
 0x3fb   : > { %v2810_v39 = vmul.f32 %v2722_v46, %v6487_v37  ;;  %4695 = vrsqrt.f32 %v6565_v0  ;;  %v2876_v8 = vsub.f32 %v2812_v32, %v2844_v7  ;;  %v3226_v31 = vsel %vm3202_vm4, %v3225_v36, %v3221_v13 }
 0x3fc   : > { %v3231_v37 = vsel %vm3209_vm5, %v3230_v3, %v3226_v31  ;;  %v6633_v45 = vmul.f32 %v6606_v30, %v2551_v41  ;;  %vm2965_vm15 = vcmp.eq.f32.partialorder %v6551_v62, inf  ;;  %vm2967_vm1 = vcmp.eq.f32.partialorder %v6551_v62, 0.0 }
 0x3fd   : > { %v2874_v58 = vsub.f32 %v2810_v39, %v2842_v53  ;;  %v6586_v40 = vmax.f32 %v2876_v8, 1e-05  ;;  %v3236_v63 = vsel %vm3216_vm6, %v3235_v29, %v3231_v37  ;;  %vm2944_vm2 = vcmp.eq.f32.partialorder %v6565_v0, inf }
 0x3fe   : > { %v2563_v49 = vpop.xlane.xlu1 %2562  ;;  %v6592_v43 = vsel %vm3351_vm7, %v3236_v63, %v3217_v56  ;;  %v4688_v5 = vpop.eup %4687  ;;  %v2968_v56 = vand.u32 2147483648, %v6551_v62  ;;  %vm2946_vm8 = vcmp.eq.f32.partialorder %v6565_v0, 0.0  ;;  %vm3409_vm9 = vcmask 392512  }
 0x3ff   : > { %v6594_v57 = vmax.f32 %v2874_v58, 1e-05  ;;  %4697 = vrsqrt.f32 %v6586_v40  ;;  %v4690_v38 = vpop.eup %4689  ;;  %v2936_v54 = vmul.f32 %v4688_v5, %v6528_v24  ;;  %v2947_v35 = vand.u32 2147483648, %v6565_v0 }
 0x400   : > { %v2978_v6 = vmul.f32 %v4690_v38, %v6530_v16  ;;  %v6656_v3 = vmul.f32 %v6633_v45, %v6633_v45  ;;  %v2661_v18 = vmul.f32 %v6599_v27, %v2563_v49  ;;  %v2975_v28 = vand.u32 2147483648, %v6586_v40 }
 0x401   : > { %4699 = vrsqrt.f32 %v6594_v57  ;;  %v2938_v1 = vsel %vm2937_vm12, %v6528_v24, %v2936_v54  ;;  %vm2972_vm12 = vcmp.eq.f32.partialorder %v6586_v40, inf }
 0x402   : > { %v6622_v26 = vpop.xlane.xlu1 %2544  ;;  %v4692_v10 = vpop.eup %4691  ;;  %v2980_v46 = vsel %vm2979_vm10, %v6530_v16, %v2978_v6  ;;  %vm3416_vm10 = vcmask 458112   ;;  %v2941_v8 = vsel %vm2939_vm13, %v2940_v20, %v2938_v1  ;;  %vm3423_vm13 = vcmask 523712  }
 0x403   : > { %v4694_v2 = vpop.eup %4693  ;;  %v2964_v13 = vmul.f32 %v4692_v10, %v6551_v62  ;;  %v2983_v37 = vsel %vm2981_vm11, %v2982_v11, %v2980_v46  ;;  %v3403_v12 = vrot.slane %v2941_v8, %v6611_v42  ;;  %vm2974_vm11 = vcmp.eq.f32.partialorder %v6586_v40, 0.0 }
 0x404   : > { %v2985_v31 = vmul.f32 %v4694_v2, %v6558_v55  ;;  %v2961_v10 = vand.u32 2147483648, %v6594_v57  ;;  %v6709_v46 = vmul.f32 %v6606_v30, %v6622_v26  ;;  %4701 = vrcp.f32 %v6118_v25 }
 0x405   : > { %v2966_v49 = vsel %vm2965_vm15, %v6551_v62, %v2964_v13  ;;  %vm2960_vm15 = vcmp.eq.f32.partialorder %v6594_v57, 0.0 }
 0x406   : > { %v2557_v23 = vpop.xlane.xlu0 %2556  ;;  %v2969_v6 = vsel %vm2967_vm1, %v2968_v56, %v2966_v49 }
 0x407   : > { %v2659_v7 = vmul.f32 %v6599_v27, %v2557_v23 }
 0x408   : > { %v2749_v36 = vpop.xlane.xlu1 %2748  ;;  %v4696_v41 = vpop.eup %4695 }
 0x409   : > { %v6650_v32 = vmul.f32 %v2749_v36, %v6599_v27  ;;  %v2943_v39 = vmul.f32 %v4696_v41, %v6565_v0  ;;  %v2851_v53 = vmul.f32 %v2659_v7, %v2659_v7  ;;  %v3259_v20 = vrot.slane %v2659_v7, %v6538_v4 }
 0x40a   : > { %v2743_v29 = vpop.xlane.xlu0 %2742  ;;  %v2853_v36 = vmul.f32 %v2661_v18, %v2661_v18  ;;  %v3268_v41 = vrot.slane %v2661_v18, %v6542_v17 }
 0x40b   : > { %v6663_v15 = vmul.f32 %v2743_v29, %v6606_v30  ;;  %v2945_v58 = vsel %vm2944_vm2, %v6565_v0, %v2943_v39  ;;  %v2883_v51 = vsub.f32 %v6650_v32, %v2851_v53  ;;  %vm2958_vm2 = vcmp.eq.f32.partialorder %v6594_v57, inf }
 0x40c   : > { %v2948_v34 = vsel %vm2946_vm8, %v2947_v35, %v2945_v58  ;;  %v4698_v9 = vpop.eup %4697  ;;  %v2987_v0 = vsel %vm2986_vm14, %v6558_v55, %v2985_v31  ;;  %v3428_v32 = vrot.slane %v2969_v6, %v6611_v42  ;;  %v3437_v29 = vrot.slane %v2983_v37, %v6602_v22 }
 0x40d   : > { %v2560_v24 = vpop.xlane.xlu1 %2559  ;;  %v2881_v16 = vsub.f32 %v6663_v15, %v6656_v3  ;;  %v2971_v14 = vmul.f32 %v4698_v9, %v6586_v40  ;;  %v3408_v11 = vrot.slane %v2948_v34, %v6620_v21  ;;  %v2990_v62 = vsel %vm2988_vm3, %v2989_v50, %v2987_v0 }
 0x40e   : > { %v6680_v63 = vmul.f32 %v6599_v27, %v2560_v24  ;;  %v2755_v5 = vpop.xlane.xlu0 %2754  ;;  %v4700_v54 = vpop.eup %4699  ;;  %v3442_v18 = vrot.slane %v2990_v62, %v6617_v33  ;;  %v6738_v34 = vmax.f32 %v2883_v51, 1e-05  ;;  %vm3355_vm14 = vcmask 1043459  }
 0x40f   : > { %v2973_v2 = vsel %vm2972_vm12, %v6586_v40, %v2971_v14  ;;  %v2957_v1 = vmul.f32 %v4700_v54, %v6594_v57  ;;  %v2821_v55 = vmul.f32 %v2755_v5, %v6599_v27  ;;  %v3410_v53 = vsel %vm3409_vm9, %v3408_v11, %v3403_v12 }
 0x410   : > { %v3263_v38 = vrot.slane %v6680_v63, %v6533_v61  ;;  %v2976_v56 = vsel %vm2974_vm11, %v2975_v28, %v2973_v2  ;;  %v6749_v0 = vmax.f32 %v2881_v16, 1e-05  ;;  %4703 = vrsqrt.f32 %v6738_v34 }
 0x411   : > { %v2746_v23 = vpop.xlane.xlu1 %2745  ;;  %v3432_v39 = vrot.slane %v2976_v56, %v6620_v21  ;;  %v2959_v35 = vsel %vm2958_vm2, %v6594_v57, %v2957_v1  ;;  %v2885_v31 = vsub.f32 %v2821_v55, %v2853_v36  ;;  %v3417_v57 = vsel %vm3416_vm10, %v3415_v47, %v3410_v53 }
 0x412   : > { %v3264_v7 = vsel %vm3202_vm4, %v3263_v38, %v3259_v20  ;;  %v2554_v13 = vpop.xlane.xlu0 %2553  ;;  %v2962_v40 = vsel %vm2960_vm15, %v2961_v10, %v2959_v35  ;;  %v2818_v15 = vmul.f32 %v2746_v23, %v6606_v30  ;;  %v2847_v47 = vmul.f32 %v6709_v46, %v6709_v46 }
 0x413   : > { %v6721_v50 = vmul.f32 %v6606_v30, %v2554_v13  ;;  %v6724_v3 = vsel %vm3209_vm5, %v3268_v41, %v3264_v7  ;;  %v3422_v8 = vrot.slane %v2962_v40, %v6617_v33  ;;  %v3433_v49 = vsel %vm3409_vm9, %v3432_v39, %v3428_v32 }
 0x414   : > { %v3438_v19 = vsel %vm3416_vm10, %v3437_v29, %v3433_v49  ;;  %v6746_v5 = vmax.f32 %v2885_v31, 1e-05  ;;  %4705 = vrcp.f32 %v6116_v59  ;;  %v2852_v41 = vmul.f32 %v6680_v63, %v6680_v63 }
 0x415   : > { %v2758_v26 = vpop.xlane.xlu1 %2757  ;;  %v2850_v58 = vmul.f32 %v6721_v50, %v6721_v50  ;;  %v3424_v9 = vsel %vm3423_vm13, %v3422_v8, %v3417_v57  ;;  %v3443_v28 = vsel %vm3423_vm13, %v3442_v18, %v3438_v19  ;;  %v3240_v56 = vrot.slane %v6709_v46, %v6538_v4 }
 0x416   : > { %v2737_v24 = vpop.xlane.xlu0 %2736  ;;  %v6752_v54 = vsel %vm3351_vm7, %v3443_v28, %v3424_v9  ;;  %4707 = vrsqrt.f32 %v6746_v5  ;;  %v2822_v25 = vmul.f32 %v2758_v26, %v6599_v27  ;;  %v3249_v63 = vrot.slane %v6633_v45, %v6542_v17 }
 0x417   : > { %v2815_v37 = vmul.f32 %v2737_v24, %v6606_v30  ;;  %v2882_v12 = vsub.f32 %v2818_v15, %v2850_v58  ;;  %4709 = vrsqrt.f32 %v6749_v0  ;;  %vm3353_vm7 = vcmask 1042434  }
 0x418   : > { %v3254_v46 = vrot.slane %v6721_v50, %v6546_v52  ;;  %vm3021_vm1 = vcmp.eq.f32.partialorder %v6738_v34, inf  ;;  %vm3023_vm3 = vcmp.eq.f32.partialorder %v6738_v34, 0.0  ;;  %vm3007_vm8 = vcmp.eq.f32.partialorder %v6749_v0, inf }
 0x419   : > { %v2879_v51 = vsub.f32 %v2815_v37, %v2847_v47  ;;  %v2740_v14 = vpop.xlane.xlu1 %2739  ;;  %v6762_v20 = vmax.f32 %v2882_v12, 1e-05  ;;  %vm3009_vm12 = vcmp.eq.f32.partialorder %v6749_v0, 0.0  ;;  %vm3035_vm11 = vcmp.eq.f32.partialorder %v6746_v5, inf }
 0x41a   : > { %v2566_v38 = vpop.xlane.xlu0 %2565  ;;  %v2816_v13 = vmul.f32 %v2740_v14, %v6606_v30  ;;  %vm3037_vm2 = vcmp.eq.f32.partialorder %v6746_v5, 0.0 }
 0x41b   : > { %v2662_v6 = vmul.f32 %v6599_v27, %v2566_v38  ;;  %v6760_v16 = vmax.f32 %v2879_v51, 1e-05  ;;  %v3024_v38 = vand.u32 2147483648, %v6738_v34  ;;  %vm3014_vm15 = vcmp.eq.f32.partialorder %v6762_v20, inf }
 0x41d   : > { %v2854_v11 = vmul.f32 %v2662_v6, %v2662_v6  ;;  %v6764_v2 = vpop.xlane.xlu1 %2574  ;;  %4711 = vrsqrt.f32 %v6760_v16  ;;  %v3273_v15 = vrot.slane %v2662_v6, %v6546_v52  ;;  %vm2993_vm0 = vcmp.eq.f32.partialorder %v6760_v16, inf }
 0x41e   : > { %v2548_v10 = vpop.xlane.xlu0 %2547  ;;  %4713 = vrsqrt.f32 %v6762_v20 }
 0x41f   : > { %v2886_v23 = vsub.f32 %v2822_v25, %v2854_v11  ;;  %v2656_v59 = vmul.f32 %v6606_v30, %v2548_v10  ;;  %v3274_v12 = vsel %vm3216_vm6, %v3273_v15, %v6724_v3  ;;  %v3010_v25 = vand.u32 2147483648, %v6749_v0 }
 0x421   : > { %v6767_v1 = vmax.f32 %v2886_v23, 1e-05  ;;  %v2848_v32 = vmul.f32 %v2656_v59, %v2656_v59  ;;  %v3244_v39 = vrot.slane %v2656_v59, %v6533_v61 }
 0x422   : > { %v2752_v36 = vpop.xlane.xlu0 %2751 }
 0x423   : > { %v2820_v62 = vmul.f32 %v2752_v36, %v6599_v27  ;;  %4715 = vrsqrt.f32 %v6767_v1  ;;  %v4702_v27 = vpop.eup %4701  ;;  %v2880_v40 = vsub.f32 %v2816_v13, %v2848_v32  ;;  %v3245_v26 = vsel %vm3202_vm4, %v3244_v39, %v3240_v56 }
 0x424   : > { %v4704_v30 = vpop.eup %4703  ;;  %v3250_v29 = vsel %vm3209_vm5, %v3249_v63, %v3245_v26  ;;  %v6803_v9 = vrot.slane %v4702_v27, %v5811_v60  ;;  %v2996_v27 = vand.u32 2147483648, %v6760_v16  ;;  %v3045_v26 = vand.u32 2147483648, %v6767_v1 }
 0x425   : > { %v6777_v7 = vpop.xlane.xlu1 %2577  ;;  %v2884_v35 = vsub.f32 %v2820_v62, %v2852_v41  ;;  %v4706_v31 = vpop.eup %4705  ;;  %v6791_v57 = vmax.f32 %v2880_v40, 1e-05  ;;  %v3255_v45 = vsel %vm3216_vm6, %v3254_v46, %v3250_v29  ;;  %v3020_v49 = vmul.f32 %v4704_v30, %v6738_v34 }
 0x426   : > { %v6783_v55 = vpop.xlane.xlu0 %2586  ;;  %v4708_v18 = vpop.eup %4707  ;;  %v3354_v50 = vsel %vm3353_vm7, %v3255_v45, %v6592_v43  ;;  %v6806_v19 = vrot.slane %v4706_v31, %v5811_v60  ;;  %v3017_v62 = vand.u32 2147483648, %v6762_v20 }
 0x427   : > { %v6788_v53 = vmax.f32 %v2884_v35, 1e-05  ;;  %v4710_v24 = vpop.eup %4709  ;;  %v3034_v47 = vmul.f32 %v4708_v18, %v6746_v5  ;;  %v3022_v14 = vsel %vm3021_vm1, %v6738_v34, %v3020_v49  ;;  %v3038_v34 = vand.u32 2147483648, %v6746_v5 }
 0x428   : > { %v3006_v43 = vmul.f32 %v4710_v24, %v6749_v0  ;;  %v3025_v23 = vsel %vm3023_vm3, %v3024_v38, %v3022_v14  ;;  %vm3016_vm1 = vcmp.eq.f32.partialorder %v6762_v20, 0.0  ;;  %vm2995_vm3 = vcmp.eq.f32.partialorder %v6760_v16, 0.0 }
 0x429   : > { %v2761_v8 = vpop.xlane.xlu1 %2760  ;;  %4717 = vrsqrt.f32 %v6788_v53  ;;  %v3036_v10 = vsel %vm3035_vm11, %v6746_v5, %v3034_v47  ;;  %v3466_v35 = vrot.slane %v3025_v23, %v6611_v42  ;;  %vm3044_vm11 = vcmp.eq.f32.partialorder %v6767_v1, 0.0 }
 0x42a   : > { %v2569_v58 = vpop.xlane.xlu0 %2568  ;;  %4719 = vrsqrt.f32 %v6791_v57  ;;  %v4712_v51 = vpop.eup %4711  ;;  %v3008_v59 = vsel %vm3007_vm8, %v6749_v0, %v3006_v43  ;;  %v3039_v13 = vsel %vm3037_vm2, %v3038_v34, %v3036_v10  ;;  %vm3042_vm8 = vcmp.eq.f32.partialorder %v6767_v1, inf }
 0x42b   : > { %4721 = vrcp.f32 %v6122_v48  ;;  %v6819_v48 = vsel %vm3355_vm14, %v3274_v12, %v3354_v50  ;;  %v4714_v6 = vpop.eup %4713  ;;  %v2992_v36 = vmul.f32 %v4712_v51, %v6760_v16  ;;  %v3011_v63 = vsel %vm3009_vm12, %v3010_v25, %v3008_v59 }
 0x42c   : > { %4723 = vrcp.f32 %v6120_v44  ;;  %v6825_v44 = vmul.f32 %v6806_v19, %v2569_v58  ;;  %v3013_v5 = vmul.f32 %v4714_v6, %v6762_v20  ;;  %v2823_v30 = vmul.f32 %v2761_v8, %v6806_v19 }
 0x42d   : > { %v6800_v37 = vpop.xlane.xlu1 %2589  ;;  %v2994_v40 = vsel %vm2993_vm0, %v6760_v16, %v2992_v36  ;;  %v3475_v31 = vrot.slane %v3039_v13, %v6602_v22  ;;  %vm3028_vm12 = vcmp.eq.f32.partialorder %v6788_v53, inf  ;;  %v3031_v50 = vand.u32 2147483648, %v6788_v53 }
 0x42e   : > { %v2581_v28 = vpop.xlane.xlu0 %2580  ;;  %v2855_v32 = vmul.f32 %v6825_v44, %v6825_v44  ;;  %v3015_v15 = vsel %vm3014_vm15, %v6762_v20, %v3013_v5  ;;  %v2997_v49 = vsel %vm2995_vm3, %v2996_v27, %v2994_v40  ;;  %vm3030_vm0 = vcmp.eq.f32.partialorder %v6788_v53, 0.0 }
 0x42f   : > { %v6864_v8 = vmul.f32 %v6803_v9, %v2581_v28  ;;  %vm3000_vm2 = vcmp.eq.f32.partialorder %v6791_v57, inf  ;;  %v3003_v14 = vand.u32 2147483648, %v6791_v57  ;;  %v3018_v16 = vsel %vm3016_vm1, %v3017_v62, %v3015_v15 }
 0x430   : > { %v4716_v11 = vpop.eup %4715  ;;  %v2887_v58 = vsub.f32 %v2823_v30, %v2855_v32  ;;  %vm3002_vm15 = vcmp.eq.f32.partialorder %v6791_v57, 0.0  ;;  %v3447_v25 = vrot.slane %v2997_v49, %v6611_v42  ;;  %v3461_v5 = vrot.slane %v3018_v16, %v6617_v33 }
 0x431   : > { %v2773_v3 = vpop.xlane.xlu1 %2772  ;;  %v3041_v56 = vmul.f32 %v4716_v11, %v6767_v1  ;;  %v2859_v34 = vmul.f32 %v6864_v8, %v6864_v8 }
 0x432   : > { %v6834_v41 = vpop.xlane.xlu0 %2766  ;;  %v6881_v10 = vmax.f32 %v2887_v58, 1e-05  ;;  %v2827_v36 = vmul.f32 %v2773_v3, %v6803_v9 }
 0x433   : > { %v3043_v0 = vsel %vm3042_vm8, %v6767_v1, %v3041_v56  ;;  %v2825_v58 = vmul.f32 %v6834_v41, %v6806_v19  ;;  %vm7283_vm8 = vcmask 1046534  }
 0x434   : > { %v3046_v51 = vsel %vm3044_vm11, %v3045_v26, %v3043_v0  ;;  %4725 = vrsqrt.f32 %v6881_v10  ;;  %v2665_v0 = vmul.f32 %v6806_v19, %v6764_v2  ;;  %vm3049_vm1 = vcmp.eq.f32.partialorder %v6881_v10, inf }
 0x435   : > { %v2572_v39 = vpop.xlane.xlu1 %2571  ;;  %v3480_v59 = vrot.slane %v3046_v51, %v6617_v33  ;;  %v2666_v51 = vmul.f32 %v6806_v19, %v6777_v7  ;;  %vm3051_vm3 = vcmp.eq.f32.partialorder %v6881_v10, 0.0  ;;  %vm7282_vm11 = vcmask 1047559  }
 0x436   : > { %v4718_v46 = vpop.eup %4717  ;;  %v6853_v29 = vpop.xlane.xlu0 %2778  ;;  %v2664_v40 = vmul.f32 %v6806_v19, %v2572_v39  ;;  %v2669_v39 = vmul.f32 %v6803_v9, %v6783_v55 }
 0x437   : > { %v3027_v45 = vmul.f32 %v4718_v46, %v6788_v53  ;;  %v4720_v18 = vpop.eup %4719  ;;  %v2829_v55 = vmul.f32 %v6853_v29, %v6803_v9 }
 0x438   : > { %v2999_v47 = vmul.f32 %v4720_v18, %v6791_v57  ;;  %v4722_v12 = vpop.eup %4721  ;;  %v2856_v18 = vmul.f32 %v2664_v40, %v2664_v40  ;;  %v2861_v16 = vmul.f32 %v2669_v39, %v2669_v39 }
 0x439   : > { %v2584_v24 = vpop.xlane.xlu1 %2583  ;;  %v3029_v43 = vsel %vm3028_vm12, %v6788_v53, %v3027_v45  ;;  %v4724_v6 = vpop.eup %4723 }
 0x43a   : > { %v3032_v28 = vsel %vm3030_vm0, %v3031_v50, %v3029_v43  ;;  %v2782_v38 = vpop.xlane.xlu0 %2781  ;;  %v3001_v11 = vsel %vm3000_vm2, %v6791_v57, %v2999_v47  ;;  %v3456_v57 = vrot.slane %v3011_v63, %v6602_v22  ;;  %v2891_v63 = vsub.f32 %v2827_v36, %v2859_v34 }
 0x43b   : > { %v3470_v53 = vrot.slane %v3032_v28, %v6620_v21  ;;  %v3004_v1 = vsel %vm3002_vm15, %v3003_v14, %v3001_v11  ;;  %v2668_v49 = vmul.f32 %v6803_v9, %v2584_v24  ;;  %v2857_v43 = vmul.f32 %v2665_v0, %v2665_v0 }
 0x43c   : > { %v3451_v20 = vrot.slane %v3004_v1, %v6620_v21  ;;  %v6910_v50 = vmax.f32 %v2891_v63, 1e-05  ;;  %v6924_v14 = vrot.slane %v4722_v12, %v5811_v60  ;;  %v6927_v41 = vrot.slane %v4724_v6, %v5811_v60 }
 0x43d   : > { %v2770_v23 = vpop.xlane.xlu1 %2769  ;;  %v3471_v62 = vsel %vm3409_vm9, %v3470_v53, %v3466_v35  ;;  %v2830_v28 = vmul.f32 %v2782_v38, %v6803_v9  ;;  %v3278_v11 = vrot.slane %v6825_v44, %v6538_v4  ;;  %v2889_v7 = vsub.f32 %v2825_v58, %v2857_v43 }
 0x43e   : > { %v3476_v56 = vsel %vm3416_vm10, %v3475_v31, %v3471_v62  ;;  %v2764_v13 = vpop.xlane.xlu0 %2763  ;;  %v3452_v32 = vsel %vm3409_vm9, %v3451_v20, %v3447_v25  ;;  %4727 = vrsqrt.f32 %v6910_v50  ;;  %v3301_v12 = vrot.slane %v2668_v49, %v6533_v61 }
 0x43f   : > { %v3481_v27 = vsel %vm3423_vm13, %v3480_v59, %v3476_v56  ;;  %v3457_v46 = vsel %vm3416_vm10, %v3456_v57, %v3452_v32  ;;  %v2824_v30 = vmul.f32 %v2764_v13, %v6806_v19  ;;  %v2826_v60 = vmul.f32 %v2770_v23, %v6806_v19 }
 0x440   : > { %v3462_v35 = vsel %vm3423_vm13, %v3461_v5, %v3457_v46  ;;  %v3287_v38 = vrot.slane %v2665_v0, %v6542_v17  ;;  %v2858_v25 = vmul.f32 %v2666_v51, %v2666_v51  ;;  %v2893_v1 = vsub.f32 %v2829_v55, %v2861_v16 }
 0x441   : > { %v6897_v3 = vpop.xlane.xlu1 %2592  ;;  %v3559_v26 = vsel %vm3353_vm7, %v3462_v35, %v6752_v54  ;;  %v6916_v54 = vmul.f32 %v6803_v9, %v6800_v37  ;;  %v2888_v2 = vsub.f32 %v2824_v30, %v2856_v18  ;;  %v3282_v37 = vrot.slane %v2664_v40, %v6533_v61  ;;  %v4726_v62 = vpop.eup %4725 }
 0x442   : > { %v2776_v31 = vpop.xlane.xlu0 %2775  ;;  %v6906_v45 = vsel %vm3355_vm14, %v3481_v27, %v3559_v26  ;;  %vm3357_vm7 = vcmask 1044484   ;;  %v3297_v44 = vrot.slane %v6864_v8, %v6538_v4  ;;  %v3292_v19 = vrot.slane %v2666_v51, %v6546_v52 }
 0x443   : > { %v2862_v29 = vmul.f32 %v6916_v54, %v6916_v54  ;;  %v6938_v6 = vmax.f32 %v2888_v2, 1e-05  ;;  %v3283_v34 = vsel %vm3202_vm4, %v3282_v37, %v3278_v11  ;;  %v2828_v20 = vmul.f32 %v2776_v31, %v6803_v9 }
 0x444   : > { %v3306_v23 = vrot.slane %v2669_v39, %v6542_v17  ;;  %v6947_v57 = vmax.f32 %v2889_v7, 1e-05  ;;  %vm3359_vm14 = vcmask 1045509   ;;  %v2860_v13 = vmul.f32 %v2668_v49, %v2668_v49 }
 0x445   : > { %v2605_v15 = vpop.xlane.xlu1 %2604  ;;  %v2894_v59 = vsub.f32 %v2830_v28, %v2862_v29  ;;  %v3302_v8 = vsel %vm3202_vm4, %v3301_v12, %v3297_v44  ;;  %v2890_v5 = vsub.f32 %v2826_v60, %v2858_v25  ;;  %4729 = vrsqrt.f32 %v6938_v6 }
 0x446   : > { %v2599_v47 = vpop.xlane.xlu0 %2598  ;;  %v3311_v9 = vrot.slane %v6916_v54, %v6546_v52  ;;  %v3288_v27 = vsel %vm3209_vm5, %v3287_v38, %v3283_v34  ;;  %v6958_v46 = vmax.f32 %v2893_v1, 1e-05  ;;  %v3048_v40 = vmul.f32 %v4726_v62, %v6881_v10 }
 0x447   : > { %v6950_v56 = vmul.f32 %v6927_v41, %v2599_v47  ;;  %v6962_v35 = vmax.f32 %v2894_v59, 1e-05  ;;  %v2892_v63 = vsub.f32 %v2828_v20, %v2860_v13  ;;  %v3307_v30 = vsel %vm3209_vm5, %v3306_v23, %v3302_v8 }
 0x448   : > { %v6966_v31 = vmul.f32 %v6924_v14, %v2605_v15  ;;  %v3052_v39 = vand.u32 2147483648, %v6881_v10  ;;  %4731 = vrsqrt.f32 %v6947_v57  ;;  %v3293_v58 = vsel %vm3216_vm6, %v3292_v19, %v3288_v27 }
 0x449   : > { %v2791_v24 = vpop.xlane.xlu1 %2790  ;;  %v2865_v0 = vmul.f32 %v6950_v56, %v6950_v56  ;;  %v6974_v54 = vmax.f32 %v2890_v5, 1e-05  ;;  %4733 = vrsqrt.f32 %v6958_v46  ;;  %v2671_v15 = vmul.f32 %v6927_v41, %v6897_v3 }
 0x44a   : > { %v2611_v53 = vpop.xlane.xlu0 %2610  ;;  %v2833_v18 = vmul.f32 %v2791_v24, %v6927_v41  ;;  %v3080_v43 = vand.u32 2147483648, %v6910_v50  ;;  %v3312_v51 = vsel %vm3216_vm6, %v3311_v9, %v3307_v30  ;;  %4735 = vrsqrt.f32 %v6962_v35 }
 0x44b   : > { %v6984_v55 = vmax.f32 %v2892_v63, 1e-05  ;;  %v3050_v28 = vsel %vm3049_vm1, %v6881_v10, %v3048_v40  ;;  %v2867_v3 = vmul.f32 %v6966_v31, %v6966_v31  ;;  %v4728_v11 = vpop.eup %4727  ;;  %v3066_v7 = vand.u32 2147483648, %v6947_v57 }
 0x44c   : > { %v2897_v24 = vsub.f32 %v2833_v18, %v2865_v0  ;;  %v3358_v29 = vsel %vm3357_vm7, %v3293_v58, %v6819_v48  ;;  %4737 = vrsqrt.f32 %v6974_v54  ;;  %v2677_v12 = vmul.f32 %v6924_v14, %v2611_v53 }
 0x44d   : > { %v2602_v36 = vpop.xlane.xlu1 %2601  ;;  %v2863_v38 = vmul.f32 %v2671_v15, %v2671_v15  ;;  %v7001_v34 = vsel %vm3051_vm3, %v3052_v39, %v3050_v28  ;;  %v3094_v59 = vand.u32 2147483648, %v6958_v46  ;;  %v3360_v48 = vsel %vm3359_vm14, %v3312_v51, %v3358_v29 }
 0x44e   : > { %v2797_v32 = vpop.xlane.xlu0 %2796  ;;  %v2674_v25 = vmul.f32 %v6927_v41, %v2602_v36  ;;  %4739 = vrsqrt.f32 %v6984_v55  ;;  %v7007_v20 = vmul.f32 %v4728_v11, %v6910_v50  ;;  %v3316_v36 = vrot.slane %v2671_v15, %v6538_v4 }
 0x44f   : > { %v2835_v2 = vmul.f32 %v2797_v32, %v6924_v14  ;;  %v7010_v62 = vmax.f32 %v2897_v24, 1e-05  ;;  %v3335_v10 = vrot.slane %v6966_v31, %v6538_v4  ;;  %v3325_v23 = vrot.slane %v6950_v56, %v6542_v17 }
 0x450   : > { %v2869_v13 = vmul.f32 %v2677_v12, %v2677_v12  ;;  %v3344_v8 = vrot.slane %v2677_v12, %v6542_v17  ;;  %v2866_v9 = vmul.f32 %v2674_v25, %v2674_v25  ;;  %vm3077_vm12 = vcmp.eq.f32.partialorder %v6910_v50, inf }
 0x451   : > { %v2785_v26 = vpop.xlane.xlu1 %2784  ;;  %v2899_v1 = vsub.f32 %v2835_v2, %v2867_v3  ;;  %vm3063_vm0 = vcmp.eq.f32.partialorder %v6947_v57, inf  ;;  %4741 = vrsqrt.f32 %v7010_v62  ;;  %v3330_v31 = vrot.slane %v2674_v25, %v6546_v52 }
 0x452   : > { %v2596_v49 = vpop.xlane.xlu0 %2595  ;;  %v2831_v16 = vmul.f32 %v2785_v26, %v6927_v41  ;;  %v4730_v32 = vpop.eup %4729  ;;  %vm3091_vm2 = vcmp.eq.f32.partialorder %v6958_v46, inf  ;;  %vm3079_vm15 = vcmp.eq.f32.partialorder %v6910_v50, 0.0  ;;  %vm3065_vm1 = vcmp.eq.f32.partialorder %v6947_v57, 0.0 }
 0x453   : > { %v2672_v47 = vmul.f32 %v6927_v41, %v2596_v49  ;;  %v7017_v27 = vmax.f32 %v2899_v1, 1e-05  ;;  %v3055_v39 = vmul.f32 %v4730_v32, %v6938_v6  ;;  %vm3093_vm3 = vcmp.eq.f32.partialorder %v6958_v46, 0.0 }
 0x454   : > { %v2895_v19 = vsub.f32 %v2831_v16, %v2863_v38 }
 0x455   : > { %v2614_v37 = vpop.xlane.xlu1 %2613  ;;  %v3320_v44 = vrot.slane %v2672_v47, %v6533_v61  ;;  %v2864_v58 = vmul.f32 %v2672_v47, %v2672_v47  ;;  %v4732_v51 = vpop.eup %4731  ;;  %4743 = vrsqrt.f32 %v7017_v27 }
 0x456   : > { %v2608_v60 = vpop.xlane.xlu0 %2607  ;;  %v7021_v63 = vmul.f32 %v6924_v14, %v2614_v37  ;;  %v7031_v0 = vmax.f32 %v2895_v19, 1e-05  ;;  %v4734_v16 = vpop.eup %4733  ;;  %v3062_v38 = vmul.f32 %v4732_v51, %v6947_v57  ;;  %v3087_v51 = vand.u32 2147483648, %v6984_v55 }
 0x457   : > { %v3321_v40 = vsel %vm3202_vm4, %v3320_v44, %v3316_v36  ;;  %v2676_v56 = vmul.f32 %v6924_v14, %v2608_v60  ;;  %v4736_v29 = vpop.eup %4735 }
 0x458   : > { %v3326_v4 = vsel %vm3209_vm5, %v3325_v23, %v3321_v40  ;;  %v3349_v47 = vrot.slane %v7021_v63, %v6546_v52  ;;  %4745 = vrsqrt.f32 %v7031_v0  ;;  %v3064_v32 = vsel %vm3063_vm0, %v6947_v57, %v3062_v38 }
 0x459   : > { %v2800_v53 = vpop.xlane.xlu1 %2799  ;;  %v2868_v49 = vmul.f32 %v2676_v56, %v2676_v56  ;;  %v3339_v15 = vrot.slane %v2676_v56, %v6533_v61  ;;  %v3331_v37 = vsel %vm3216_vm6, %v3330_v31, %v3326_v4  ;;  %v4738_v44 = vpop.eup %4737  ;;  %v3097_v40 = vmul.f32 %v4736_v29, %v6962_v35 }
 0x45a   : > { %v2794_v5 = vpop.xlane.xlu0 %2793  ;;  %v2836_v26 = vmul.f32 %v2800_v53, %v6924_v14  ;;  %v3362_v25 = vsel %vm7283_vm8, %v3331_v37, %v3360_v48  ;;  %v3090_v53 = vmul.f32 %v4734_v16, %v6958_v46  ;;  %v3067_v31 = vsel %vm3065_vm1, %v3066_v7, %v3064_v32 }
 0x45b   : > { %v2834_v17 = vmul.f32 %v2794_v5, %v6927_v41  ;;  %v3340_v61 = vsel %vm3202_vm4, %v3339_v15, %v3335_v10  ;;  %vm3098_vm4 = vcmp.eq.f32.partialorder %v6962_v35, inf  ;;  %v3101_v10 = vand.u32 2147483648, %v6962_v35  ;;  %v4740_v23 = vpop.eup %4739 }
 0x45c   : > { %v2900_v11 = vsub.f32 %v2836_v26, %v2868_v49  ;;  %v3345_v12 = vsel %vm3209_vm5, %v3344_v8, %v3340_v61  ;;  %vm3056_vm5 = vcmp.eq.f32.partialorder %v6938_v6, inf  ;;  %v3078_v8 = vsel %vm3077_vm12, %v6910_v50, %v7007_v20 }
 0x45d   : > { %v2803_v30 = vpop.xlane.xlu1 %2802  ;;  %v2898_v28 = vsub.f32 %v2834_v17, %v2866_v9  ;;  %v3350_v52 = vsel %vm3216_vm6, %v3349_v47, %v3345_v12  ;;  %vm7308_vm6 = vcmask 261120   ;;  %v3057_v5 = vsel %vm3056_vm5, %v6938_v6, %v3055_v39 }
 0x45e   : > { %v2837_v18 = vmul.f32 %v2803_v30, %v6924_v14  ;;  %v2788_v2 = vpop.xlane.xlu0 %2787  ;;  %v7056_v1 = vmax.f32 %v2900_v11, 1e-05  ;;  %v3364_v36 = vsel %vm7282_vm11, %v3350_v52, %v3362_v25  ;;  %vm3100_vm11 = vcmp.eq.f32.partialorder %v6962_v35, 0.0  ;;  %v4742_v50 = vpop.eup %4741 }
 0x45f   : > { %v2832_v24 = vmul.f32 %v2788_v2, %v6927_v41  ;;  %v7049_v60 = vmax.f32 %v2898_v28, 1e-05  ;;  %3366 = vst.msk [vmem:[%s7067_s16] sm:$0xff] %vm7308_vm6, %v3364_v36  ;;  %v3069_v9 = vmul.f32 %v4738_v44, %v6974_v54  ;;  %vm3058_vm6 = vcmp.eq.f32.partialorder %v6938_v6, 0.0 }
 0x460   : > { %v2901_v3 = vsub.f32 %v2837_v18, %v2869_v13  ;;  %v3485_v13 = vrot.slane %v7001_v34, %v6611_v42  ;;  %v3059_v34 = vand.u32 2147483648, %v6938_v6  ;;  %v3092_v20 = vsel %vm3091_vm2, %v6958_v46, %v3090_v53 }
 0x461   : > { %4747 = vrsqrt.f32 %v7049_v60  ;;  %v2896_v19 = vsub.f32 %v2832_v24, %v2864_v58  ;;  %v7097_v26 = vsel %vm3079_vm15, %v3080_v43, %v3078_v8  ;;  %v3083_v30 = vmul.f32 %v4740_v23, %v6984_v55 }
 0x462   : > { %v7051_v41 = vmax.f32 %v2901_v3, 1e-05  ;;  %4749 = vrsqrt.f32 %v7056_v1  ;;  %v2806_v48 = vpop.xlane.xlu0 %2805  ;;  %v3060_v17 = vsel %vm3058_vm6, %v3059_v34, %v3057_v5  ;;  %v2870_v6 = vmul.f32 %v7021_v63, %v7021_v63  ;;  %v4744_v49 = vpop.eup %4743 }
 0x463   : > { %v7090_v4 = vmax.f32 %v2896_v19, 1e-05  ;;  %v2838_v56 = vmul.f32 %v2806_v48, %v6924_v14  ;;  %vm3070_vm12 = vcmp.eq.f32.partialorder %v6974_v54, inf  ;;  %vm3072_vm0 = vcmp.eq.f32.partialorder %v6974_v54, 0.0 }
 0x464   : > { %4751 = vrsqrt.f32 %v7051_v41  ;;  %v7113_v14 = vsel %vm3093_vm3, %v3094_v59, %v3092_v20  ;;  %v3071_v43 = vsel %vm3070_vm12, %v6974_v54, %v3069_v9  ;;  %v3073_v63 = vand.u32 2147483648, %v6974_v54 }
 0x465   : > { %4753 = vrsqrt.f32 %v7090_v4  ;;  %v2902_v18 = vsub.f32 %v2838_v56, %v2870_v6  ;;  %v3504_v57 = vrot.slane %v7097_v26, %v6611_v42  ;;  %v3099_v7 = vsel %vm3098_vm4, %v6962_v35, %v3097_v40  ;;  %v4746_v37 = vpop.eup %4745 }
 0x466   : > { %v3489_v39 = vrot.slane %v3060_v17, %v6620_v21  ;;  %vm3084_vm2 = vcmp.eq.f32.partialorder %v6984_v55, inf  ;;  %v3494_v46 = vrot.slane %v3067_v31, %v6602_v22  ;;  %vm3086_vm15 = vcmp.eq.f32.partialorder %v6984_v55, 0.0 }
 0x467   : > { %v3085_v59 = vsel %vm3084_vm2, %v6984_v55, %v3083_v30  ;;  %v7127_v58 = vmax.f32 %v2902_v18, 1e-05  ;;  %v3513_v15 = vrot.slane %v7113_v14, %v6602_v22  ;;  %v3074_v2 = vsel %vm3072_vm0, %v3073_v63, %v3071_v43 }
 0x468   : > { %vm3119_vm1 = vcmp.eq.f32.partialorder %v7010_v62, inf  ;;  %v7137_v28 = vsel %vm3100_vm11, %v3101_v10, %v3099_v7  ;;  %v3118_v3 = vmul.f32 %v4742_v50, %v7010_v62  ;;  %vm3121_vm3 = vcmp.eq.f32.partialorder %v7010_v62, 0.0 }
 0x469   : > { %4755 = vrsqrt.f32 %v7127_v58  ;;  %v3088_v24 = vsel %vm3086_vm15, %v3087_v51, %v3085_v59  ;;  %v3122_v16 = vand.u32 2147483648, %v7010_v62  ;;  %vm3133_vm4 = vcmp.eq.f32.partialorder %v7017_v27, inf }
 0x46a   : > { %v3490_v54 = vsel %vm3409_vm9, %v3489_v39, %v3485_v13  ;;  %v3499_v47 = vrot.slane %v3074_v2, %v6617_v33  ;;  %vm3135_vm5 = vcmp.eq.f32.partialorder %v7017_v27, 0.0  ;;  %v3136_v35 = vand.u32 2147483648, %v7017_v27 }
 0x46b   : > { %vm3105_vm11 = vcmp.eq.f32.partialorder %v7031_v0, inf  ;;  %v3132_v11 = vmul.f32 %v4744_v49, %v7017_v27  ;;  %v3104_v29 = vmul.f32 %v4746_v37, %v7031_v0  ;;  %vm3107_vm6 = vcmp.eq.f32.partialorder %v7031_v0, 0.0 }
 0x46c   : > { %v3108_v12 = vand.u32 2147483648, %v7031_v0  ;;  %v3508_v25 = vrot.slane %v3088_v24, %v6620_v21  ;;  %v3120_v52 = vsel %vm3119_vm1, %v7010_v62, %v3118_v3  ;;  %v3495_v53 = vsel %vm3416_vm10, %v3494_v46, %v3490_v54 }
 0x46d   : > { %vm3140_vm12 = vcmp.eq.f32.partialorder %v7056_v1, inf  ;;  %vm3126_vm0 = vcmp.eq.f32.partialorder %v7049_v60, inf  ;;  %vm3142_vm2 = vcmp.eq.f32.partialorder %v7056_v1, 0.0  ;;  %v3143_v10 = vand.u32 2147483648, %v7056_v1 }
 0x46e   : > { %v4748_v55 = vpop.eup %4747  ;;  %vm3128_vm15 = vcmp.eq.f32.partialorder %v7049_v60, 0.0  ;;  %v3129_v48 = vand.u32 2147483648, %v7049_v60  ;;  %v3123_v23 = vsel %vm3121_vm3, %v3122_v16, %v3120_v52  ;;  %v3134_v13 = vsel %vm3133_vm4, %v7017_v27, %v3132_v11 }
 0x46f   : > { %v4750_v61 = vpop.eup %4749  ;;  %v3125_v36 = vmul.f32 %v4748_v55, %v7049_v60  ;;  %v3106_v8 = vsel %vm3105_vm11, %v7031_v0, %v3104_v29  ;;  %vm3147_vm1 = vcmp.eq.f32.partialorder %v7051_v41, inf  ;;  %vm3149_vm8 = vcmp.eq.f32.partialorder %v7051_v41, 0.0 }
 0x470   : > { %v3139_v44 = vmul.f32 %v4750_v61, %v7056_v1  ;;  %v3150_v9 = vand.u32 2147483648, %v7051_v41  ;;  %v3509_v62 = vsel %vm3409_vm9, %v3508_v25, %v3504_v57  ;;  %v3500_v56 = vsel %vm3423_vm13, %v3499_v47, %v3495_v53 }
 0x471   : > { %v4752_v38 = vpop.eup %4751  ;;  %v3127_v34 = vsel %vm3126_vm0, %v7049_v60, %v3125_v36  ;;  %v3137_v26 = vsel %vm3135_vm5, %v3136_v35, %v3134_v13  ;;  %v3109_v17 = vsel %vm3107_vm6, %v3108_v12, %v3106_v8  ;;  %vm3112_vm3 = vcmp.eq.f32.partialorder %v7090_v4, inf }
 0x472   : > { %v3146_v19 = vmul.f32 %v4752_v38, %v7051_v41  ;;  %v4754_v5 = vpop.eup %4753  ;;  %v3141_v32 = vsel %vm3140_vm12, %v7056_v1, %v3139_v44  ;;  %v3115_v30 = vand.u32 2147483648, %v7090_v4  ;;  %vm3114_vm4 = vcmp.eq.f32.partialorder %v7090_v4, 0.0 }
 0x473   : > { %v3111_v40 = vmul.f32 %v4754_v5, %v7090_v4  ;;  %v3144_v6 = vsel %vm3142_vm2, %v3143_v10, %v3141_v32  ;;  %v3514_v50 = vsel %vm3416_vm10, %v3513_v15, %v3509_v62  ;;  %v3130_v27 = vsel %vm3128_vm15, %v3129_v48, %v3127_v34 }
 0x474   : > { %v3148_v20 = vsel %vm3147_vm1, %v7051_v41, %v3146_v19  ;;  %v3518_v43 = vrot.slane %v7137_v28, %v6617_v33  ;;  %v3523_v1 = vrot.slane %v3109_v17, %v6611_v42  ;;  %v3532_v57 = vrot.slane %v3123_v23, %v6602_v22 }
 0x475   : > { %v3113_v31 = vsel %vm3112_vm3, %v7090_v4, %v3111_v40  ;;  %v3151_v0 = vsel %vm3149_vm8, %v3150_v9, %v3148_v20  ;;  %v3542_v4 = vrot.slane %v3137_v26, %v6611_v42  ;;  %vm3154_vm5 = vcmp.eq.f32.partialorder %v7127_v58, inf }
 0x476   : > { %v3116_v14 = vsel %vm3114_vm4, %v3115_v30, %v3113_v31  ;;  %v4756_v63 = vpop.eup %4755  ;;  %v3519_v60 = vsel %vm3423_vm13, %v3518_v43, %v3514_v50  ;;  %v3546_v41 = vrot.slane %v3144_v6, %v6620_v21  ;;  %v3157_v39 = vand.u32 2147483648, %v7127_v58 }
 0x477   : > { %v3527_v18 = vrot.slane %v3116_v14, %v6620_v21  ;;  %v3153_v7 = vmul.f32 %v4756_v63, %v7127_v58  ;;  %v3537_v59 = vrot.slane %v3130_v27, %v6617_v33  ;;  %v3551_v49 = vrot.slane %v3151_v0, %v6602_v22 }
 0x478   : > { %vm3156_vm8 = vcmp.eq.f32.partialorder %v7127_v58, 0.0  ;;  %v3561_v2 = vsel %vm3357_vm7, %v3500_v56, %v6906_v45  ;;  %v3547_v22 = vsel %vm3409_vm9, %v3546_v41, %v3542_v4  ;;  %vm7309_vm11 = vcmask 1046534  }
 0x479   : > { %v3528_v46 = vsel %vm3409_vm9, %v3527_v18, %v3523_v1  ;;  %v3155_v42 = vsel %vm3154_vm5, %v7127_v58, %v3153_v7  ;;  %v3562_v37 = vsel %vm3359_vm14, %v3519_v60, %v3561_v2  ;;  %v3552_v3 = vsel %vm3416_vm10, %v3551_v49, %v3547_v22 }
 0x47a   : > { %v3533_v15 = vsel %vm3416_vm10, %v3532_v57, %v3528_v46  ;;  %v3158_v21 = vsel %vm3156_vm8, %v3157_v39, %v3155_v42  ;;  %vm3566_vm6 = vcmask 523520   ;;  %vm7310_vm7 = vcmask 1047559  }
 0x47b   : > { %v3538_v51 = vsel %vm3423_vm13, %v3537_v59, %v3533_v15  ;;  %v3556_v28 = vrot.slane %v3158_v21, %v6617_v33 }
 0x47c   : > { %v3563_v58 = vsel %vm7309_vm11, %v3538_v51, %v3562_v37 }
 0x47d   : > { %v3557_v45 = vsel %vm3423_vm13, %v3556_v28, %v3552_v3 }
 0x47e   : > { %v3564_v24 = vsel %vm7310_vm7, %v3557_v45, %v3563_v58 }
 0x47f   : > { %3567 = vst.msk [vmem:[%s7067_s16] sm:$0xff] %vm3566_vm6, %v3564_v24 }
 0x480   : > { %4843 = shalt.err (!%p4840_p0)
}
 0x481   : > { %s4844_s12 = scalar_lea.hbm %s7230_s14, 128  ;;  %s4848_s8 = scalar_lea.hbm %s7275_s6, 256 }
 0x482   : > { %p4845_p2 = scmp.ne.s32.totalorder %s7230_s14, %s4844_s12  ;;  %p4849_p3 = scmp.lt.s32.totalorder %s7230_s14, %s7275_s6 }
 0x483   : > { %p4850_p6 = scmp.lt.s32.totalorder %s4848_s8, %s4844_s12 }
 0x484   : > { %p4846_p9 = pnand %p4845_p2, %p7311_p13 }
 0x485   : > { %p4851_p11 = por %p4850_p6, %p4849_p3 }
 0x486   : > { %p4847_p1 = pneg %p4846_p9 }
 0x488   : > { %p4852_p12 = pnand %p4851_p11, %p4847_p1 }
 0x48a   : > { %4855 = shalt.err (!%p4852_p12)
}
 0x48b   : > { %4234 = dma.vmem_to_hbm [thread:$0]  (%p7311_p13), %s3583_s19, 128, %s7230_s14, %s3569_s25  }
 0x48c PF: > { %s3594_s18 = sand.u32 1, %s4882_s21   ;;  %p7312_p4 = scmp.ne.s32.totalorder %s7287_s10, 0 }
 0x48d   : > { %p7313_p5 = scmp.ge.s32.totalorder %s4894_s24, 2  ;;  %s3595_s20 = scalar_lea.sflag [#allocation4], %s3594_s18 }
 0x48f   : > { %p4241_p7 = pnand %p7313_p5, %p7312_p4 }
 0x491   : > { %p4242_p8 = pneg %p4241_p7 }
 0x493   : > { %4877 = dma.done.wait (%p4242_p8), %s3595_s20, 128  }
 0x494   : > { %4879 = vsyncadd (%p4242_p8), %s3595_s20, 4294967168  ;;  %p19_p10 = scmp.ge.s32.totalorder %s4961_s27, 4   ;;  %s7314_s21 = smov %s4886_s22 }
 0x495   : > { %s7315_s22 = smov %s4890_s23  ;;  %s7316_s23 = smov %s4973_s30 }
 0x496   : > { %s7317_s24 = smov %s4961_s27  ;;  %21 = sbr.rel (!%p19_p10) target bundleno = 5 (0x5), region = 92 }
 0x49b   :  { %3600 = vsyncpa [#allocation3], 1 }
 0x49c   :  { %3602 = vsyncpa [#allocation3 + $0x1], 1 }
 0x49d   :  { %3603 = vsyncpa [#allocation4], 1 }
 0x49e   :  { %3605 = vsyncpa [#allocation4 + $0x1], 1 }

</bundles_post_ra>
